<compile_context>
chip_gen: v7x
topology: tpu7x:2x2x1
jax: 0.10.0
libtpu: 0.0.40
codegen_flags: <defaults>
</compile_context>

<pallas_src>
import jax
import jax.numpy as jnp
from jax.experimental import pallas as pl
from jax.experimental.pallas import tpu as pltpu


def _round_up(x, m):
    return ((x + m - 1) // m) * m


# --------------------------------------------------------------------------- #
# Kernels
# --------------------------------------------------------------------------- #
def _make_single_kernel(n_rows):
    """Whole class axis in one block: straight per-row logsumexp, one partial sum
    per row tile (lane-dense (1, 128) store)."""

    def kernel(logits_ref, targets_ref, out_ref):
        i = pl.program_id(0)
        logits = logits_ref[...].astype(jnp.float32)        # (TN, C), cast in-vreg
        tgt = targets_ref[...]                               # (TN, 1) int32
        tn, c = logits.shape

        class_ids = jax.lax.broadcasted_iota(jnp.int32, (tn, c), 1)
        # gather the target logit from the *raw* logits; the shifted tile below is
        # consumed only by the exp/sum (one less live (TN, C) temporary)
        tgt_logit = jnp.sum(jnp.where(class_ids == tgt, logits, 0.0),
                            axis=-1, keepdims=True)          # (TN, 1)

        row_max = jnp.max(logits, axis=-1, keepdims=True)     # (TN, 1)
        sum_exp = jnp.sum(jnp.exp(logits - row_max), axis=-1, keepdims=True)
        nll = jnp.log(sum_exp) + row_max - tgt_logit           # (TN, 1)

        # mask padding rows of the ragged last row tile, then one partial sum / tile
        row_ids = i * tn + jax.lax.broadcasted_iota(jnp.int32, (tn, 1), 0)
        nll = jnp.where(row_ids < n_rows, nll, 0.0)
        out_ref[...] = jnp.broadcast_to(
            jnp.sum(nll, axis=0, keepdims=True), out_ref.shape)

    return kernel


def _make_online_kernel(n_rows, c_total):
    """Class-tiled kernel: online logsumexp across the trailing ("arbitrary") class
    axis, with max / sum-exp / target-logit accumulators in VMEM scratch."""

    def kernel(logits_ref, targets_ref, out_ref, m_sc, s_sc, t_sc):
        i = pl.program_id(0)
        k = pl.program_id(1)

        @pl.when(k == 0)
        def _():
            m_sc[...] = jnp.full(m_sc.shape, -jnp.inf, m_sc.dtype)
            s_sc[...] = jnp.zeros(s_sc.shape, s_sc.dtype)
            t_sc[...] = jnp.zeros(t_sc.shape, t_sc.dtype)

        logits = logits_ref[...].astype(jnp.float32)          # (TN, TC)
        tgt = targets_ref[...]                                 # (TN, 1) int32
        tn, tc = logits.shape

        class_ids = k * tc + jax.lax.broadcasted_iota(jnp.int32, (tn, tc), 1)
        t_sc[...] += jnp.sum(jnp.where(class_ids == tgt, logits, 0.0),
                             axis=-1, keepdims=True)

        if c_total % tc != 0:                                  # ragged class tail
            logits = jnp.where(class_ids < c_total, logits, -jnp.inf)

        m_new = jnp.maximum(m_sc[...], jnp.max(logits, axis=-1, keepdims=True))
        s_sc[...] = (s_sc[...] * jnp.exp(m_sc[...] - m_new)
                     + jnp.sum(jnp.exp(logits - m_new), axis=-1, keepdims=True))
        m_sc[...] = m_new

        @pl.when(k == pl.num_programs(1) - 1)
        def _():
            nll = jnp.log(s_sc[...]) + m_sc[...] - t_sc[...]   # (TN, 1)
            row_ids = i * tn + jax.lax.broadcasted_iota(jnp.int32, (tn, 1), 0)
            nll = jnp.where(row_ids < n_rows, nll, 0.0)
            out_ref[...] = jnp.broadcast_to(
                jnp.sum(nll, axis=0, keepdims=True), out_ref.shape)

    return kernel


# --------------------------------------------------------------------------- #
# Tiling
# --------------------------------------------------------------------------- #
def _choose_tiling(n, c, in_itemsize, block_budget_bytes=None):
    try:
        vmem_cap = int(pltpu.get_tpu_info().vmem_capacity_bytes)
    except Exception:                               # no TPU info available
        vmem_cap = 64 * 2**20                        # v7x-conservative default

    if block_budget_bytes is None:
        # One logits block; 2x of it (double-buffered input) plus ~4 same-size f32
        # temporaries live inside the kernel -> keep ~12x the block under capacity.
        block_budget_bytes = max(2 * 2**20, min(8 * 2**20, vmem_cap // 12))
    vmem_limit = int(max(32 * 2**20, min(vmem_cap - 8 * 2**20, 100 * 2**20)))

    sub = max(8, 32 // in_itemsize)   # sublane multiple: f32 -> 8, bf16 -> 16, int8 -> 32

    # Class-tile only when a full-class block would force tiny, overhead-bound row tiles.
    if c * in_itemsize * 256 <= block_budget_bytes:
        tc, grid_c = c, 1
    else:
        tc = (block_budget_bytes // (512 * in_itemsize)) // 128 * 128
        tc = int(max(128, min(tc, _round_up(c, 128))))
        grid_c = pl.cdiv(c, tc)

    rows = block_budget_bytes // max(1, tc * in_itemsize)
    if rows >= 128:
        tn = (rows // 128) * 128
    else:
        tn = max(sub, (rows // sub) * sub)

    half = _round_up(pl.cdiv(n, 2), 128)   # >= 2 row tiles so both v7x cores get work
    n_cap = _round_up(n, sub)
    tn = int(max(sub, min(tn, half, n_cap)))
    grid_r = pl.cdiv(n, tn)
    return tn, tc, grid_r, grid_c, vmem_limit


# --------------------------------------------------------------------------- #
# Wrapper (forward of CE_loss)
# --------------------------------------------------------------------------- #
def ce_loss(ind, outputs, targets, *, block_budget_bytes=None):
    """Cross-entropy with mean reduction over class-index targets, matching the
    defaults of torch.nn.functional.cross_entropy used by the reference module."""
    del ind  # unused, matches the PyTorch module
    n, c = outputs.shape
    tgt = targets.astype(jnp.int32)

    # Small-problem fast path: with C < 128 (e.g. module default cls=12) ~90% of every
    # 128-lane vreg / HBM burst would be dead -> plain XLA is faster than any kernel.
    if c < 128 or n < 64:
        logits = outputs.astype(jnp.float32)
        lse = jax.nn.logsumexp(logits, axis=-1)
        tl = jnp.take_along_axis(logits, tgt[:, None], axis=-1)[:, 0]
        return jnp.mean(lse - tl)

    in_itemsize = jnp.dtype(outputs.dtype).itemsize
    tn, tc, grid_r, grid_c, vmem_limit = _choose_tiling(
        n, c, in_itemsize, block_budget_bytes)
    targets_2d = tgt.reshape(n, 1)

    cost = pl.CostEstimate(
        flops=5 * n * c,
        transcendentals=n * c,
        bytes_accessed=n * c * in_itemsize + n * 4 + grid_r * 128 * 4,
    )

    if grid_c == 1:
        kernel = _make_single_kernel(n)
        grid = (grid_r,)
        in_specs = [
            pl.BlockSpec((tn, c), lambda i: (i, 0)),     # full class axis per block
            pl.BlockSpec((tn, 1), lambda i: (i, 0)),
        ]
        out_specs = pl.BlockSpec((1, 128), lambda i: (0, i))
        scratch_shapes = ()
        dims = ("parallel",)
    else:
        kernel = _make_online_kernel(n, c)
        grid = (grid_r, grid_c)                          # class (reduction) axis last
        in_specs = [
            pl.BlockSpec((tn, tc), lambda i, k: (i, k)),
            pl.BlockSpec((tn, 1), lambda i, k: (i, 0)),
        ]
        out_specs = pl.BlockSpec((1, 128), lambda i, k: (0, i))
        scratch_shapes = [pltpu.VMEM((tn, 1), jnp.float32)] * 3
        dims = ("parallel", "arbitrary")

    partial = pl.pallas_call(
        kernel,
        out_shape=jax.ShapeDtypeStruct((1, grid_r * 128), jnp.float32),
        grid=grid,
        in_specs=in_specs,
        out_specs=out_specs,
        scratch_shapes=scratch_shapes,
        compiler_params=pltpu.CompilerParams(
            dimension_semantics=dims,
            vmem_limit_bytes=vmem_limit,
        ),
        cost_estimate=cost,
    )(outputs, targets_2d)                                # native dtype in, cast in-vreg

    # one partial sum per row tile (replicated across the 128 lanes of its block)
    return jnp.sum(partial.reshape(grid_r, 128)[:, 0]) / n


# --------------------------------------------------------------------------- #
# Demo / self-test
# --------------------------------------------------------------------------- #
if __name__ == "__main__":
    key = jax.random.PRNGKey(0)
    k1, k2, k3, k4, k5, k6, k7, k8 = jax.random.split(key, 8)

    def ref_loss(outputs, targets):
        logits = outputs.astype(jnp.float32)
        lse = jax.nn.logsumexp(logits, axis=-1)
        return jnp.mean(lse - logits[jnp.arange(outputs.shape[0]), targets])

    # 1) module-default-sized case (cls=12): small-C XLA fast path
    N, C = 8, 12
    o = jax.random.normal(k1, (N, C), jnp.float32)
    t = jax.random.randint(k2, (N,), 0, C, jnp.int32)
    ind = jnp.arange(N, dtype=jnp.int32)                  # unused by the loss
    loss = ce_loss(ind, o, t)
    jax.block_until_ready(loss)
    assert jnp.allclose(loss, ref_loss(o, t), atol=1e-5, rtol=1e-5), (loss, ref_loss(o, t))

    # 2) Pallas path: single class block, 2 row tiles, ragged last row tile
    N, C = 1000, 256
    o = jax.random.normal(k3, (N, C), jnp.float32)
    t = jax.random.randint(k4, (N,), 0, C, jnp.int32)
    loss = ce_loss(jnp.arange(N, dtype=jnp.int32), o, t)
    jax.block_until_ready(loss)
    assert jnp.allclose(loss, ref_loss(o, t), atol=1e-5, rtol=1e-5), (loss, ref_loss(o, t))

    # 3) Pallas path: class-tiled online logsumexp with a ragged class tail
    #    (a small block budget forces the class split even on big-VMEM chips)
    N, C = 256, 1000
    o = jax.random.normal(k5, (N, C), jnp.float32)
    t = jax.random.randint(k6, (N,), 0, C, jnp.int32)
    loss = ce_loss(jnp.arange(N, dtype=jnp.int32), o, t, block_budget_bytes=256 * 1024)
    jax.block_until_ready(loss)
    assert jnp.allclose(loss, ref_loss(o, t), atol=1e-5, rtol=1e-5), (loss, ref_loss(o, t))

    # 4) Pallas path: bf16 logits (16-row sublane multiple), ragged batch
    N, C = 200, 256
    o = jax.random.normal(k7, (N, C), jnp.float32).astype(jnp.bfloat16)
    t = jax.random.randint(k8, (N,), 0, C, jnp.int32)
    loss = ce_loss(jnp.arange(N, dtype=jnp.int32), o, t)
    jax.block_until_ready(loss)
    assert jnp.allclose(loss, ref_loss(o, t), atol=1e-4, rtol=1e-4), (loss, ref_loss(o, t))

    print("KERNEL_OK")
</pallas_src>

<mosaic_0001>
module attributes {stable_mosaic.version = 11 : i64} {
  func.func @kernel(%arg0: i32, %arg1: memref<512x256xf32, #tpu.memory_space<vmem>>, %arg2: memref<512x1xi32, #tpu.memory_space<vmem>>, %arg3: memref<1x128xf32, #tpu.memory_space<vmem>>) attributes {dimension_semantics = [#tpu.dimension_semantics<parallel>], iteration_bounds = array<i64: 2>, scalar_prefetch = 0 : i64, scratch_operands = 0 : i64, tpu.core_type = #tpu.core_type<tc>, window_params = [{transform_indices = @transform_0, window_bounds = array<i64: 512, 256>}, {transform_indices = @transform_1, window_bounds = array<i64: 512, 1>}, {transform_indices = @transform_2, window_bounds = array<i64: 1, 128>}]} {
    %c0 = arith.constant 0 : index
    %c0_0 = arith.constant 0 : index
    %0 = vector.load %arg1[%c0, %c0_0] : memref<512x256xf32, #tpu.memory_space<vmem>>, vector<512x256xf32>
    %c0_1 = arith.constant 0 : index
    %c0_2 = arith.constant 0 : index
    %1 = vector.load %arg2[%c0_1, %c0_2] : memref<512x1xi32, #tpu.memory_space<vmem>>, vector<512x1xi32>
    %2 = tpu.iota {dimensions = array<i32: 1>} : vector<512x256xi32>
    %3 = vector.broadcast %1 : vector<512x1xi32> to vector<512x256xi32>
    %4 = arith.cmpi eq, %2, %3 : vector<512x256xi32>
    %cst = arith.constant 0.000000e+00 : f32
    %5 = vector.broadcast %cst : f32 to vector<512x256xf32>
    %6 = arith.select %4, %0, %5 : vector<512x256xi1>, vector<512x256xf32>
    %cst_3 = arith.constant dense<0.000000e+00> : vector<512xf32>
    %7 = vector.multi_reduction <add>, %6, %cst_3 [1] : vector<512x256xf32> to vector<512xf32>
    %8 = vector.shape_cast %7 : vector<512xf32> to vector<512x1xf32>
    %cst_4 = arith.constant dense<0xFF800000> : vector<512xf32>
    %9 = vector.multi_reduction <maximumf>, %0, %cst_4 [1] : vector<512x256xf32> to vector<512xf32>
    %10 = vector.shape_cast %9 : vector<512xf32> to vector<512x1xf32>
    %11 = vector.broadcast %10 : vector<512x1xf32> to vector<512x256xf32>
    %12 = arith.subf %0, %11 : vector<512x256xf32>
    %13 = math.exp %12 : vector<512x256xf32>
    %cst_5 = arith.constant dense<0.000000e+00> : vector<512xf32>
    %14 = vector.multi_reduction <add>, %13, %cst_5 [1] : vector<512x256xf32> to vector<512xf32>
    %15 = vector.shape_cast %14 : vector<512xf32> to vector<512x1xf32>
    %16 = math.log %15 : vector<512x1xf32>
    %17 = arith.addf %16, %10 : vector<512x1xf32>
    %18 = arith.subf %17, %8 : vector<512x1xf32>
    %c512_i32 = arith.constant 512 : i32
    %19 = arith.muli %arg0, %c512_i32 : i32
    %20 = tpu.iota {dimensions = array<i32: 0>} : vector<512x1xi32>
    %21 = vector.broadcast %19 : i32 to vector<512x1xi32>
    %22 = arith.addi %21, %20 : vector<512x1xi32>
    %c1000_i32 = arith.constant 1000 : i32
    %23 = vector.broadcast %c1000_i32 : i32 to vector<512x1xi32>
    %24 = arith.cmpi slt, %22, %23 : vector<512x1xi32>
    %cst_6 = arith.constant 0.000000e+00 : f32
    %25 = vector.broadcast %cst_6 : f32 to vector<512x1xf32>
    %26 = arith.select %24, %18, %25 : vector<512x1xi1>, vector<512x1xf32>
    %cst_7 = arith.constant dense<0.000000e+00> : vector<1xf32>
    %27 = vector.multi_reduction <add>, %26, %cst_7 [0] : vector<512x1xf32> to vector<1xf32>
    %28 = vector.shape_cast %27 : vector<1xf32> to vector<1x1xf32>
    %29 = vector.shape_cast %28 : vector<1x1xf32> to vector<1x1xf32>
    %30 = vector.broadcast %29 : vector<1x1xf32> to vector<1x128xf32>
    %c0_8 = arith.constant 0 : index
    %c0_9 = arith.constant 0 : index
    %31 = vector.load %arg3[%c0_8, %c0_9] : memref<1x128xf32, #tpu.memory_space<vmem>>, vector<1x128xf32>
    tpu.vector_store %arg3[%c0_8, %c0_9], %30 {strides = array<i32>} : memref<1x128xf32, #tpu.memory_space<vmem>>, vector<1x128xf32>,
    return
  }
  func.func @transform_0(%arg0: i32) -> (i32, i32) {
    %c0_i32 = arith.constant 0 : i32
    %c0_i32_0 = arith.constant 0 : i32
    return %arg0, %c0_i32 : i32, i32
  }
  func.func @transform_1(%arg0: i32) -> (i32, i32) {
    %c0_i32 = arith.constant 0 : i32
    %c0_i32_0 = arith.constant 0 : i32
    return %arg0, %c0_i32 : i32, i32
  }
  func.func @transform_2(%arg0: i32) -> (i32, i32) {
    %c0_i32 = arith.constant 0 : i32
    %c0_i32_0 = arith.constant 0 : i32
    return %c0_i32, %arg0 : i32, i32
  }
}

</mosaic_0001>

<bundles_post_ra>
// kernel: tpu_custom_call.1
= control target key start
LH: loop header
LB: loop body
LE: loop exit
PB: predicated region body
PF: predicated region fallthrough
CT: control target
= control target key end

     0   :  { %7 = vsyncpa [#allocation3], 0  ;;  %s5422_s0 = inlined_call_operand.hbm [shape: f32[1000,256], index: 0, kind: input, shape index: {}]   ;;  %s5423_s1 = inlined_call_operand.vmem [shape: s32[1000,1], index: 1, kind: input, shape index: {}]   ;;  %s5424_s2 = inlined_call_operand.hbm [shape: f32[1,256], index: 2, kind: output, shape index: {}]  }
   0x1   :  { %9 = vsyncpa [#allocation3 + $0x1], 0 }
   0x2   :  { %10 = vsyncpa [#allocation4], 0 }
   0x3   :  { %12 = vsyncpa [#allocation4 + $0x1], 0  ;;  %s3165_s9 = smov 0   ;;  %s3167_s10 = smov 0  }
   0x4   :  { %s3169_s11 = smov 0   ;;  %s3171_s12 = smov 0  }
   0x5 LB: > { %s3186_s13 = sadd.s32 4294967295, %s3143_s12   ;;  %s2496_s14 = sadd.s32 4294967294, %s3143_s12   ;;  %s3143_s12 = sphi %s3171_s12, %s5750_s12   ;;  %s3139_s11 = sphi %s3169_s11, %s5749_s11   ;;  %s3135_s10 = sphi %s3167_s10, %s5748_s10   ;;  %s3131_s9 = sphi %s3165_s9, %s5747_s9  }
   0x6   : > { %s3190_s15 = sadd.s32 1, %s3143_s12   ;;  %s25_s16 = sadd.s32 1, %s3139_s11 }
   0x7   : > { %s22_s17 = ssub.s32 %s3143_s12, %s3190_s15  ;;  %p32_p0 = scmp.ne.s32.totalorder %s3139_s11, %s3135_s10 }
   0x8   : > { %p23_p1 = scmp.eq.s32.totalorder %s22_s17, 0  ;;  %p33_p2 = scmp.eq.s32.totalorder %s3143_s12, 0 }
   0x9   : > { %p38_p3 = scmp.ne.s32.totalorder %s3135_s10, %s3131_s9  ;;  %p39_p4 = scmp.eq.s32.totalorder %s3186_s13, 0 }
   0xa   : > { %s3202_s18 = scalar_select %p23_p1, %s3139_s11, %s25_s16  }
   0xb   : > { %p34_p5 = por %p33_p2, %p32_p0  ;;  %p3204_p6 = por %p39_p4, %p38_p3 }
   0xc   : > { %p88_p7 = scmp.eq.s32.totalorder %s3186_s13, 1  ;;  %p94_p8 = scmp.eq.s32.totalorder %s2496_s14, 1 }
   0xd   : > { %p5425_p11 = scmp.ge.s32.totalorder %s3143_s12, 2 }
   0xe   : > { %p3209_p9 = por %p88_p7, %p32_p0  ;;  %p3213_p10 = por %p94_p8, %p38_p3 }
   0xf   : > { %110 = sbr.rel (%p5425_p11) target bundleno = 57 (0x39), region = 16 }
  0x10   : > { %s5515_s21 = scalar_select %p3213_p10, 1, 0 }
  0x16   : > { %113 = sbr.rel (!%p34_p5) target bundleno = 57 (0x39), region = 20  ;;  %s114_s22 = sand.u32 (%p34_p5), 1, %s3139_s11  }
  0x17   : > { %s2500_s23 = sshll.u32 (%p34_p5), %s3143_s12, 6  ;;  %s2499_s24 = sshll.u32 (%p34_p5), %s114_s22, 10 }
  0x18   : > { %s120_s25 = ssub.s32 (%p34_p5), 125, %s2500_s23  ;;  %s3225_s28 = scalar_lea.sflag (%p34_p5), [#allocation3], %s114_s22 }
  0x19   : > { %p121_p12 = scmp.lt.s32.totalorder (%p34_p5), %s120_s25, 64  ;;  %s118_s29 = scalar_lea.vmem (%p34_p5), [#allocation2], %s2499_s24 }
  0x1d   : > { %s5752_s25 = smov (!%p121_p12, %s120_s25), 64 }
  0x1e   : > { %s3222_s26 = sshll.u32 %s5752_s25, 8 }
  0x1f   : > { %s126_s27 = ssub.s32 16384, %s3222_s26 }
  0x20   : > { %127 = vsyncadd %s3225_s28, %s126_s27  ;;  %p2503_p13 = scmp.ne.s32.totalorder %s3222_s26, 0  ;;  %s2518_s30 = sshll.u32 %s3143_s12, 14 }
  0x21   : > { %s3233_s5 = scalar_lea.hbm %s5422_s0, %s2518_s30  ;;  %s133_s6 = sshll.u32 %s118_s29, 4  ;;  %s3235_s6 = int_to_ptr.vmem [resolvable:$true] %s133_s6 }
  0x22   : > { %s3049_s7 = scalar_lea.hbm %s3233_s5, %s3222_s26  ;;  %s3053_s16 = scalar_lea.hbm %s5422_s0, 32000 }
  0x23   : > { %p3050_p0 = scmp.ne.s32.totalorder %s3233_s5, %s3049_s7  ;;  %p3054_p3 = scmp.lt.u32.totalorder %s3233_s5, %s5422_s0 }
  0x24   : > { %p3055_p4 = scmp.lt.u32.totalorder %s3053_s16, %s3049_s7  ;;  %p3057_p7 = scmp.lt.u32.totalorder %s3049_s7, %s3233_s5 }
  0x25   : > { %p3051_p1 = pnand %p3050_p0, %p2503_p13 }
  0x26   : > { %p3056_p5 = por %p3055_p4, %p3054_p3 }
  0x27   : > { %p3052_p2 = pneg %p3051_p1 }
  0x28   : > { %p3058_p8 = por %p3057_p7, %p3056_p5 }
  0x2a   : > { %p3059_p12 = pnand %p3058_p8, %p3052_p2 }
  0x2c   : > { %3062 = shalt.err (!%p3059_p12)
}
  0x2d   : > { %s3063_s23 = scalar_lea.vmem %s3235_s6, %s3222_s26  ;;  %s3145_s24 = smov [#allocation2]  }
  0x2e   : > { %p3064_p0 = scmp.ne.s32.totalorder %s3235_s6, %s3063_s23  ;;  %s3067_s25 = sshll.u32 %s3145_s24, 4  ;;  %s3068_s25 = int_to_ptr.vmem [resolvable:$false] %s3067_s25 }
  0x2f   : > { %s3069_s27 = scalar_lea.vmem %s3068_s25, 32768  ;;  %p3070_p10 = scmp.lt.s32.totalorder %s3235_s6, %s3068_s25 }
  0x30   : > { %p3065_p1 = pnand %p3064_p0, %p2503_p13  ;;  %p3071_p3 = scmp.lt.s32.totalorder %s3069_s27, %s3063_s23 }
  0x32   : > { %p3066_p11 = pneg %p3065_p1  ;;  %p3072_p4 = por %p3071_p3, %p3070_p10 }
  0x34   : > { %p3073_p5 = pnand %p3072_p4, %p3066_p11 }
  0x36   : > { %3076 = shalt.err (!%p3073_p5)
}
  0x37   : > { %s3146_s29 = smov 256   ;;  %s3147_s30 = smov 16  }
  0x38   : > { %139 = dma.hbm_to_vmem [thread:$0]  (%p2503_p13), %s3233_s5, %s3222_s26, %s3235_s6, %s3225_s28, %s3146_s29, %s3146_s29, %s3147_s30  }
  0x39 PF: > { %p2508_p2 = scmp.ge.s32.totalorder %s3143_s12, 1  ;;  %p158_p7 = scmp.lt.s32.totalorder %s3143_s12, 3 }
  0x3b   : > { %p159_p8 = pnand %p2508_p2, %p158_p7 }
  0x3d   : > { %162 = sbr.rel (%p159_p8) target bundleno = 885 (0x375), region = 28 }
  0x44   : > { %s3265_s3 = sand.u32 1, %s3135_s10  }
  0x45   : > { %s2509_s4 = sshll.u32 %s3265_s3, 10  ;;  %s165_s7 = scalar_lea.sflag [#allocation3], %s3265_s3 }
  0x46   : > { %s3269_s8 = scalar_lea.vmem [#allocation2], %s2509_s4 }
  0x47   : > { %3122 = dma.done.wait (%p3204_p6), %s165_s7, 16384  }
  0x48   : > { %3124 = vsyncadd (%p3204_p6), %s165_s7, 4294950912  ;;  %s2510_s26 = sshll.u32 %s3186_s13, 6  ;;  %v3148_v0 = vmov 0   ;;  %s2512_s19 = sshll.u32 %s3186_s13, 9 }
  0x49   : > { %2563 = vset.pattern.permute.xlu1 %v3148_v0  ;;  %2562 = vset.pattern.permute.xlu0 %v3148_v0  ;;  %p208_p10 = scmp.lt.s32.totalorder %s2510_s26, 124  ;;  %s2513_s16 = sshll.u32 %s3186_s13, 4 }
  0x4a   : > { %s196_s17 = scalar_lea.vmem [#allocation5], %s3265_s3  ;;  %s5378_s25 = scalar_lea.hbm %s5424_s2, %s2513_s16 }
  0x4b   : > { %s5754_s26 = smov (!%p208_p10, %s2510_s26), 124  ;;  %s2418_s22 = sshll.u32 %s196_s17, 4  ;;  %s5380_s22 = int_to_ptr.vmem [resolvable:$true] %s2418_s22 }
  0x4c   : > { %s2511_s28 = sshll.u32 %s5754_s26, 3  ;;  %s2406_s27 = scalar_lea.sflag [#allocation4], %s3265_s3 }
  0x4d   : > { %s3279_s14 = scalar_lea.vmem %s5423_s1, %s2511_s28  ;;  %s3077_s29 = scalar_lea.vmem %s5380_s22, 16 }
  0x4e   : > { %v347_v1 = vld [vmem:[%s3279_s14 + $0x10] sm:$0xff]  ;;  %v345_v2 = vld [vmem:[%s3279_s14] sm:$0xff]  ;;  %v348_v3 = vld [vmem:[%s3279_s14 + $0x18] sm:$0xff]  ;;  %p3078_p6 = scmp.ne.s32.totalorder %s5380_s22, %s3077_s29  ;;  %s3149_s13 = smov [#allocation5]  }
  0x4f   : > { %419 = vperm.xlu1 %2563, %v347_v1   ;;  %413 = vperm.xlu0 %2562, %v345_v2   ;;  %v346_v4 = vld [vmem:[%s3279_s14 + $0x8] sm:$0xff]  ;;  %v349_v6 = vld [vmem:[%s3279_s14 + $0x20] sm:$0xff]  ;;  %v352_v7 = vld [vmem:[%s3279_s14 + $0x38] sm:$0xff]  ;;  %s3081_s30 = sshll.u32 %s3149_s13, 4  ;;  %s3082_s30 = int_to_ptr.vmem [resolvable:$false] %s3081_s30 }
  0x50   : > { %v350_v5 = vld [vmem:[%s3279_s14 + $0x28] sm:$0xff]  ;;  %v351_v8 = vld [vmem:[%s3279_s14 + $0x30] sm:$0xff]  ;;  %v353_v10 = vld [vmem:[%s3279_s14 + $0x40] sm:$0xff]  ;;  %p3079_p11 = pnand %p3078_p6, %p3209_p9  ;;  %s3083_s4 = scalar_lea.vmem %s3082_s30, 32 }
  0x51   : > { %v354_v9 = vld [vmem:[%s3279_s14 + $0x48] sm:$0xff]  ;;  %v356_v11 = vld [vmem:[%s3279_s14 + $0x58] sm:$0xff]  ;;  %v355_v12 = vld [vmem:[%s3279_s14 + $0x50] sm:$0xff]  ;;  %p3084_p12 = scmp.lt.s32.totalorder %s5380_s22, %s3082_s30  ;;  %p3085_p0 = scmp.lt.s32.totalorder %s3083_s4, %s3077_s29 }
  0x52   : > { %v358_v13 = vld [vmem:[%s3279_s14 + $0x68] sm:$0xff]  ;;  %v357_v14 = vld [vmem:[%s3279_s14 + $0x60] sm:$0xff]  ;;  %v360_v15 = vld [vmem:[%s3279_s14 + $0x78] sm:$0xff]  ;;  %p3080_p13 = pneg %p3079_p11 }
  0x53   : > { %422 = vperm.xlu1 %2563, %v348_v3   ;;  %416 = vperm.xlu0 %2562, %v346_v4   ;;  %v359_v16 = vld [vmem:[%s3279_s14 + $0x70] sm:$0xff]  ;;  %v362_v17 = vld [vmem:[%s3279_s14 + $0x88] sm:$0xff]  ;;  %v361_v18 = vld [vmem:[%s3279_s14 + $0x80] sm:$0xff]  ;;  %p3086_p1 = por %p3085_p0, %p3084_p12 }
  0x54   : > { %v364_v19 = vld [vmem:[%s3279_s14 + $0x98] sm:$0xff]  ;;  %v363_v20 = vld [vmem:[%s3279_s14 + $0x90] sm:$0xff]  ;;  %v366_v21 = vld [vmem:[%s3279_s14 + $0xa8] sm:$0xff] }
  0x55   : > { %v365_v22 = vld [vmem:[%s3279_s14 + $0xa0] sm:$0xff]  ;;  %v368_v23 = vld [vmem:[%s3279_s14 + $0xb8] sm:$0xff]  ;;  %v367_v24 = vld [vmem:[%s3279_s14 + $0xb0] sm:$0xff]  ;;  %p3087_p3 = pnand %p3086_p1, %p3080_p13 }
  0x56   : > { %v370_v25 = vld [vmem:[%s3279_s14 + $0xc8] sm:$0xff]  ;;  %v369_v26 = vld [vmem:[%s3279_s14 + $0xc0] sm:$0xff]  ;;  %v372_v27 = vld [vmem:[%s3279_s14 + $0xd8] sm:$0xff] }
  0x57   : > { %428 = vperm.xlu1 %2563, %v350_v5   ;;  %425 = vperm.xlu0 %2562, %v349_v6   ;;  %v371_v28 = vld [vmem:[%s3279_s14 + $0xd0] sm:$0xff]  ;;  %v374_v29 = vld [vmem:[%s3279_s14 + $0xe8] sm:$0xff]  ;;  %v373_v30 = vld [vmem:[%s3279_s14 + $0xe0] sm:$0xff] }
  0x58   : > { %v376_v31 = vld [vmem:[%s3279_s14 + $0xf8] sm:$0xff]  ;;  %v375_v32 = vld [vmem:[%s3279_s14 + $0xf0] sm:$0xff]  ;;  %v378_v33 = vld [vmem:[%s3279_s14 + $0x108] sm:$0xff] }
  0x59   : > { %v377_v34 = vld [vmem:[%s3279_s14 + $0x100] sm:$0xff]  ;;  %v380_v35 = vld [vmem:[%s3279_s14 + $0x118] sm:$0xff]  ;;  %v379_v36 = vld [vmem:[%s3279_s14 + $0x110] sm:$0xff] }
  0x5a   : > { %v382_v37 = vld [vmem:[%s3279_s14 + $0x128] sm:$0xff]  ;;  %v381_v38 = vld [vmem:[%s3279_s14 + $0x120] sm:$0xff]  ;;  %v384_v39 = vld [vmem:[%s3279_s14 + $0x138] sm:$0xff] }
  0x5b   : > { %434 = vperm.xlu1 %2563, %v352_v7   ;;  %431 = vperm.xlu0 %2562, %v351_v8   ;;  %v383_v40 = vld [vmem:[%s3279_s14 + $0x130] sm:$0xff]  ;;  %v386_v41 = vld [vmem:[%s3279_s14 + $0x148] sm:$0xff]  ;;  %v385_v42 = vld [vmem:[%s3279_s14 + $0x140] sm:$0xff]  ;;  %v5426_v7 = vlaneseq }
  0x5c   : > { %v388_v43 = vld [vmem:[%s3279_s14 + $0x158] sm:$0xff]  ;;  %v387_v44 = vld [vmem:[%s3279_s14 + $0x150] sm:$0xff]  ;;  %v390_v45 = vld [vmem:[%s3279_s14 + $0x168] sm:$0xff] }
  0x5d   : > { %v389_v46 = vld [vmem:[%s3279_s14 + $0x160] sm:$0xff]  ;;  %v392_v47 = vld [vmem:[%s3279_s14 + $0x178] sm:$0xff]  ;;  %v391_v48 = vld [vmem:[%s3279_s14 + $0x170] sm:$0xff] }
  0x5e   : > { %v394_v49 = vld [vmem:[%s3279_s14 + $0x188] sm:$0xff]  ;;  %v393_v50 = vld [vmem:[%s3279_s14 + $0x180] sm:$0xff]  ;;  %v396_v51 = vld [vmem:[%s3279_s14 + $0x198] sm:$0xff] }
  0x5f   : > { %440 = vperm.xlu1 %2563, %v354_v9   ;;  %437 = vperm.xlu0 %2562, %v353_v10   ;;  %v395_v52 = vld [vmem:[%s3279_s14 + $0x190] sm:$0xff]  ;;  %v398_v53 = vld [vmem:[%s3279_s14 + $0x1a8] sm:$0xff]  ;;  %v397_v54 = vld [vmem:[%s3279_s14 + $0x1a0] sm:$0xff]  ;;  %v3352_v10 = vand.u32 127, %v5426_v7 }
  0x60   : > { %v400_v55 = vld [vmem:[%s3279_s14 + $0x1b8] sm:$0xff]  ;;  %v399_v56 = vld [vmem:[%s3279_s14 + $0x1b0] sm:$0xff]  ;;  %v402_v57 = vld [vmem:[%s3279_s14 + $0x1c8] sm:$0xff] }
  0x61   : > { %v401_v58 = vld [vmem:[%s3279_s14 + $0x1c0] sm:$0xff]  ;;  %v404_v59 = vld [vmem:[%s3279_s14 + $0x1d8] sm:$0xff]  ;;  %v403_v60 = vld [vmem:[%s3279_s14 + $0x1d0] sm:$0xff]  ;;  %5516 = vst [vmem:[#allocation8_spill] sm:$0xff] %v3352_v10 }
  0x62   : > { %v406_v61 = vld [vmem:[%s3279_s14 + $0x1e8] sm:$0xff]  ;;  %v405_v62 = vld [vmem:[%s3279_s14 + $0x1e0] sm:$0xff]  ;;  %v408_v63 = vld [vmem:[%s3279_s14 + $0x1f8] sm:$0xff] }
  0x63   : > { %446 = vperm.xlu1 %2563, %v356_v11   ;;  %443 = vperm.xlu0 %2562, %v355_v12   ;;  %v407_v0 = vld [vmem:[%s3279_s14 + $0x1f0] sm:$0xff] }
  0x64   : > { %v3642_v7 = vld [vmem:[%s3269_s8 + $0x150] sm:$0xff] }
  0x65   : > { %5521 = vst [vmem:[#allocation13_spill] sm:$0xff] %v3642_v7 }
  0x67   : > { %452 = vperm.xlu1 %2563, %v358_v13   ;;  %449 = vperm.xlu0 %2562, %v357_v14   ;;  %v3359_v13 = vadd.s32 128, %v3352_v10 }
  0x6b   : > { %458 = vperm.xlu1 %2563, %v360_v15   ;;  %455 = vperm.xlu0 %2562, %v359_v16   ;;  %v3366_v16 = vld [vmem:[%s3269_s8] sm:$0xff] }
  0x6f   : > { %464 = vperm.xlu1 %2563, %v362_v17   ;;  %461 = vperm.xlu0 %2562, %v361_v18   ;;  %v3369_v17 = vld [vmem:[%s3269_s8 + $0x8] sm:$0xff] }
  0x73   : > { %470 = vperm.xlu1 %2563, %v364_v19   ;;  %467 = vperm.xlu0 %2562, %v363_v20  }
  0x77   : > { %476 = vperm.xlu1 %2563, %v366_v21   ;;  %473 = vperm.xlu0 %2562, %v365_v22   ;;  %v3380_v22 = vld [vmem:[%s3269_s8 + $0x20] sm:$0xff] }
  0x7b   : > { %482 = vperm.xlu1 %2563, %v368_v23   ;;  %479 = vperm.xlu0 %2562, %v367_v24   ;;  %v3383_v23 = vld [vmem:[%s3269_s8 + $0x28] sm:$0xff]  ;;  %v3388_v24 = vld [vmem:[%s3269_s8 + $0x10] sm:$0xff] }
  0x7f   : > { %488 = vperm.xlu1 %2563, %v370_v25   ;;  %485 = vperm.xlu0 %2562, %v369_v26   ;;  %v3391_v25 = vld [vmem:[%s3269_s8 + $0x18] sm:$0xff] }
  0x83   : > { %494 = vperm.xlu1 %2563, %v372_v27   ;;  %491 = vperm.xlu0 %2562, %v371_v28  }
  0x87   : > { %500 = vperm.xlu1 %2563, %v374_v29   ;;  %497 = vperm.xlu0 %2562, %v373_v30  }
  0x8b   : > { %506 = vperm.xlu1 %2563, %v376_v31   ;;  %503 = vperm.xlu0 %2562, %v375_v32  }
  0x8f   : > { %512 = vperm.xlu1 %2563, %v378_v33   ;;  %509 = vperm.xlu0 %2562, %v377_v34   ;;  %v3404_v33 = vld [vmem:[%s3269_s8 + $0x30] sm:$0xff]  ;;  %v3407_v34 = vld [vmem:[%s3269_s8 + $0x38] sm:$0xff] }
  0x93   : > { %518 = vperm.xlu1 %2563, %v380_v35   ;;  %515 = vperm.xlu0 %2562, %v379_v36   ;;  %v3412_v35 = vld [vmem:[%s3269_s8 + $0x40] sm:$0xff]  ;;  %v3415_v36 = vld [vmem:[%s3269_s8 + $0x48] sm:$0xff] }
  0x97   : > { %524 = vperm.xlu1 %2563, %v382_v37   ;;  %521 = vperm.xlu0 %2562, %v381_v38  }
  0x9b   : > { %530 = vperm.xlu1 %2563, %v384_v39   ;;  %527 = vperm.xlu0 %2562, %v383_v40  }
  0x9f   : > { %536 = vperm.xlu1 %2563, %v386_v41   ;;  %533 = vperm.xlu0 %2562, %v385_v42  }
  0xa3   : > { %542 = vperm.xlu1 %2563, %v388_v43   ;;  %539 = vperm.xlu0 %2562, %v387_v44  }
  0xa7   : > { %548 = vperm.xlu1 %2563, %v390_v45   ;;  %545 = vperm.xlu0 %2562, %v389_v46   ;;  %v3428_v45 = vld [vmem:[%s3269_s8 + $0x50] sm:$0xff]  ;;  %v3431_v46 = vld [vmem:[%s3269_s8 + $0x58] sm:$0xff] }
  0xab   : > { %554 = vperm.xlu1 %2563, %v392_v47   ;;  %551 = vperm.xlu0 %2562, %v391_v48   ;;  %v3438_v47 = vld [vmem:[%s3269_s8 + $0x60] sm:$0xff]  ;;  %v3441_v48 = vld [vmem:[%s3269_s8 + $0x68] sm:$0xff] }
  0xaf   : > { %560 = vperm.xlu1 %2563, %v394_v49   ;;  %557 = vperm.xlu0 %2562, %v393_v50  }
  0xb3   : > { %566 = vperm.xlu1 %2563, %v396_v51   ;;  %563 = vperm.xlu0 %2562, %v395_v52  }
  0xb7   : > { %572 = vperm.xlu1 %2563, %v398_v53   ;;  %569 = vperm.xlu0 %2562, %v397_v54  }
  0xbb   : > { %578 = vperm.xlu1 %2563, %v400_v55   ;;  %575 = vperm.xlu0 %2562, %v399_v56   ;;  %v3454_v56 = vld [vmem:[%s3269_s8 + $0x70] sm:$0xff] }
  0xbf   : > { %584 = vperm.xlu1 %2563, %v402_v57   ;;  %581 = vperm.xlu0 %2562, %v401_v58   ;;  %v3457_v57 = vld [vmem:[%s3269_s8 + $0x78] sm:$0xff]  ;;  %v3464_v58 = vld [vmem:[%s3269_s8 + $0x80] sm:$0xff] }
  0xc3   : > { %590 = vperm.xlu1 %2563, %v404_v59   ;;  %587 = vperm.xlu0 %2562, %v403_v60   ;;  %v3467_v59 = vld [vmem:[%s3269_s8 + $0x88] sm:$0xff] }
  0xc7   : > { %596 = vperm.xlu1 %2563, %v406_v61   ;;  %593 = vperm.xlu0 %2562, %v405_v62  }
  0xcb   : > { %602 = vperm.xlu1 %2563, %v408_v63   ;;  %599 = vperm.xlu0 %2562, %v407_v0  }
  0xce   : > { %v420_v1 = vpop.permute.xlu1 %419  ;;  %v414_v2 = vpop.permute.xlu0 %413 }
  0xcf   : > { %vm604_vm0 = vcmp.eq.s32.totalorder %v3352_v10, %v414_v2  ;;  %vm605_vm1 = vcmp.eq.s32.totalorder %v3359_v13, %v414_v2  ;;  %vm608_vm2 = vcmp.eq.s32.totalorder %v3352_v10, %v420_v1  ;;  %vm609_vm3 = vcmp.eq.s32.totalorder %v3359_v13, %v420_v1 }
  0xd0   : > { %v732_v18 = vsel %vm604_vm0, %v3366_v16, 0.0  ;;  %v733_v19 = vsel %vm605_vm1, %v3369_v17, 0.0  ;;  %v736_v27 = vsel %vm608_vm2, %v3380_v22, 0.0  ;;  %v737_v28 = vsel %vm609_vm3, %v3383_v23, 0.0 }
  0xd1   : > { %v860_v26 = vadd.f32 %v733_v19, %v732_v18  ;;  %v866_v37 = vadd.f32 %v737_v28, %v736_v27  ;;  %v3508_v28 = vld [vmem:[%s3269_s8 + $0xb0] sm:$0xff] }
  0xd2   : > { %v423_v3 = vpop.permute.xlu1 %422  ;;  %v417_v4 = vpop.permute.xlu0 %416 }
  0xd3   : > { %vm606_vm4 = vcmp.eq.s32.totalorder %v3352_v10, %v417_v4  ;;  %vm607_vm5 = vcmp.eq.s32.totalorder %v3359_v13, %v417_v4  ;;  %vm610_vm6 = vcmp.eq.s32.totalorder %v3352_v10, %v423_v3  ;;  %vm611_vm7 = vcmp.eq.s32.totalorder %v3359_v13, %v423_v3  ;;  %v3482_v4 = vld [vmem:[%s3269_s8 + $0x90] sm:$0xff] }
  0xd4   : > { %v734_v31 = vsel %vm606_vm4, %v3388_v24, 0.0  ;;  %v735_v32 = vsel %vm607_vm5, %v3391_v25, 0.0  ;;  %v738_v39 = vsel %vm610_vm6, %v3404_v33, 0.0  ;;  %v739_v40 = vsel %vm611_vm7, %v3407_v34, 0.0 }
  0xd5   : > { %v863_v38 = vadd.f32 %v735_v32, %v734_v31  ;;  %v869_v49 = vadd.f32 %v739_v40, %v738_v39  ;;  %v3511_v31 = vld [vmem:[%s3269_s8 + $0xb8] sm:$0xff]  ;;  %v3520_v32 = vld [vmem:[%s3269_s8 + $0xc0] sm:$0xff] }
  0xd6   : > { %v3345_v5 = vpop.permute.xlu1 %428  ;;  %v426_v6 = vpop.permute.xlu0 %425 }
  0xd7   : > { %vm612_vm8 = vcmp.eq.s32.totalorder %v3352_v10, %v426_v6  ;;  %vm613_vm9 = vcmp.eq.s32.totalorder %v3359_v13, %v426_v6  ;;  %vm614_vm10 = vcmp.eq.s32.totalorder %v3352_v10, %v3345_v5  ;;  %vm615_vm11 = vcmp.eq.s32.totalorder %v3359_v13, %v3345_v5  ;;  %v3485_v5 = vld [vmem:[%s3269_s8 + $0x98] sm:$0xff]  ;;  %v3492_v6 = vld [vmem:[%s3269_s8 + $0xa0] sm:$0xff] }
  0xd8   : > { %v740_v43 = vsel %vm612_vm8, %v3412_v35, 0.0  ;;  %v741_v44 = vsel %vm613_vm9, %v3415_v36, 0.0  ;;  %v742_v51 = vsel %vm614_vm10, %v3428_v45, 0.0  ;;  %v743_v52 = vsel %vm615_vm11, %v3431_v46, 0.0 }
  0xd9   : > { %v872_v50 = vadd.f32 %v741_v44, %v740_v43  ;;  %v875_v61 = vadd.f32 %v743_v52, %v742_v51  ;;  %v3547_v51 = vld [vmem:[%s3269_s8 + $0xe8] sm:$0xff] }
  0xda   : > { %v3347_v8 = vpop.permute.xlu1 %434  ;;  %v3349_v9 = vpop.permute.xlu0 %431 }
  0xdb   : > { %vm616_vm12 = vcmp.eq.s32.totalorder %v3352_v10, %v3349_v9  ;;  %vm617_vm13 = vcmp.eq.s32.totalorder %v3359_v13, %v3349_v9  ;;  %vm618_vm14 = vcmp.eq.s32.totalorder %v3352_v10, %v3347_v8  ;;  %vm619_vm15 = vcmp.eq.s32.totalorder %v3359_v13, %v3347_v8  ;;  %v3495_v8 = vld [vmem:[%s3269_s8 + $0xa8] sm:$0xff] }
  0xdc   : > { %v744_v54 = vsel %vm616_vm12, %v3438_v47, 0.0  ;;  %v745_v55 = vsel %vm617_vm13, %v3441_v48, 0.0  ;;  %v746_v63 = vsel %vm618_vm14, %v3454_v56, 0.0  ;;  %v747_v0 = vsel %vm619_vm15, %v3457_v57, 0.0 }
  0xdd   : > { %v878_v62 = vadd.f32 %v745_v55, %v744_v54  ;;  %v881_v9 = vadd.f32 %v747_v0, %v746_v63 }
  0xde   : > { %v3354_v11 = vpop.permute.xlu1 %440  ;;  %v3356_v12 = vpop.permute.xlu0 %437 }
  0xdf   : > { %vm620_vm0 = vcmp.eq.s32.totalorder %v3352_v10, %v3356_v12  ;;  %vm621_vm1 = vcmp.eq.s32.totalorder %v3359_v13, %v3356_v12  ;;  %vm622_vm2 = vcmp.eq.s32.totalorder %v3352_v10, %v3354_v11  ;;  %vm623_vm3 = vcmp.eq.s32.totalorder %v3359_v13, %v3354_v11 }
  0xe0   : > { %v748_v2 = vsel %vm620_vm0, %v3464_v58, 0.0  ;;  %v749_v3 = vsel %vm621_vm1, %v3467_v59, 0.0  ;;  %v750_v18 = vsel %vm622_vm2, %v3482_v4, 0.0  ;;  %v751_v19 = vsel %vm623_vm3, %v3485_v5, 0.0 }
  0xe1   : > { %v884_v12 = vadd.f32 %v749_v3, %v748_v2  ;;  %v3562_v2 = vld [vmem:[%s3269_s8 + $0xf0] sm:$0xff]  ;;  %v3565_v3 = vld [vmem:[%s3269_s8 + $0xf8] sm:$0xff] }
  0xe2   : > { %v3361_v14 = vpop.permute.xlu1 %446  ;;  %v3363_v15 = vpop.permute.xlu0 %443 }
  0xe3   : > { %vm624_vm4 = vcmp.eq.s32.totalorder %v3352_v10, %v3363_v15  ;;  %vm625_vm5 = vcmp.eq.s32.totalorder %v3359_v13, %v3363_v15  ;;  %vm626_vm6 = vcmp.eq.s32.totalorder %v3352_v10, %v3361_v14  ;;  %vm627_vm7 = vcmp.eq.s32.totalorder %v3359_v13, %v3361_v14 }
  0xe4   : > { %v753_v27 = vsel %vm625_vm5, %v3495_v8, 0.0  ;;  %v754_v40 = vsel %vm626_vm6, %v3508_v28, 0.0  ;;  %v755_v14 = vsel %vm627_vm7, %v3511_v31, 0.0 }
  0xe5   : > { %v893_v54 = vadd.f32 %v755_v14, %v754_v40  ;;  %v3591_v40 = vld [vmem:[%s3269_s8 + $0x118] sm:$0xff]  ;;  %v3600_v14 = vld [vmem:[%s3269_s8 + $0x120] sm:$0xff] }
  0xe6   : > { %v3375_v20 = vpop.permute.xlu1 %452  ;;  %v3377_v21 = vpop.permute.xlu0 %449  ;;  %5517 = vst [vmem:[#allocation9_spill] sm:$0xff] %v3600_v14 }
  0xe7   : > { %vm628_vm8 = vcmp.eq.s32.totalorder %v3352_v10, %v3377_v21  ;;  %vm629_vm9 = vcmp.eq.s32.totalorder %v3359_v13, %v3377_v21  ;;  %vm630_vm10 = vcmp.eq.s32.totalorder %v3352_v10, %v3375_v20  ;;  %vm631_vm11 = vcmp.eq.s32.totalorder %v3359_v13, %v3375_v20  ;;  %v3544_v21 = vld [vmem:[%s3269_s8 + $0xe0] sm:$0xff] }
  0xe8   : > { %v756_v43 = vsel %vm628_vm8, %v3520_v32, 0.0 }
  0xea   : > { %v3397_v29 = vpop.permute.xlu1 %458  ;;  %v3399_v30 = vpop.permute.xlu0 %455  ;;  %861 = vadd.xlane.f32.xlu0 %v860_v26  ;;  %v752_v26 = vsel %vm624_vm4, %v3492_v6, 0.0 }
  0xeb   : > { %v890_v39 = vadd.f32 %v753_v27, %v752_v26  ;;  %vm632_vm12 = vcmp.eq.s32.totalorder %v3352_v10, %v3399_v30  ;;  %vm633_vm13 = vcmp.eq.s32.totalorder %v3359_v13, %v3399_v30  ;;  %vm634_vm14 = vcmp.eq.s32.totalorder %v3352_v10, %v3397_v29  ;;  %v3572_v30 = vld [vmem:[%s3269_s8 + $0x100] sm:$0xff] }
  0xec   : > { %v760_v63 = vsel %vm632_vm12, %v3544_v21, 0.0  ;;  %v761_v0 = vsel %vm633_vm13, %v3547_v51, 0.0  ;;  %vm635_vm15 = vcmp.eq.s32.totalorder %v3359_v13, %v3397_v29 }
  0xed   : > { %v763_v26 = vsel %vm635_vm15, %v3565_v3, 0.0 }
  0xee   : > { %v3421_v41 = vpop.permute.xlu1 %464  ;;  %v3423_v42 = vpop.permute.xlu0 %461  ;;  %867 = vadd.xlane.f32.xlu0 %v866_v37  ;;  %v3523_v37 = vld [vmem:[%s3269_s8 + $0xc8] sm:$0xff] }
  0xef   : > { %864 = vadd.xlane.f32.xlu1 %v863_v38  ;;  %v887_v38 = vadd.f32 %v751_v19, %v750_v18  ;;  %v757_v44 = vsel %vm629_vm9, %v3523_v37, 0.0  ;;  %vm636_vm0 = vcmp.eq.s32.totalorder %v3352_v10, %v3423_v42  ;;  %vm637_vm1 = vcmp.eq.s32.totalorder %v3359_v13, %v3423_v42 }
  0xf0   : > { %v896_v20 = vadd.f32 %v757_v44, %v756_v43  ;;  %v902_v18 = vadd.f32 %v761_v0, %v760_v63  ;;  %v762_v19 = vsel %vm634_vm14, %v3562_v2, 0.0  ;;  %v764_v27 = vsel %vm636_vm0, %v3572_v30, 0.0  ;;  %v3603_v43 = vld [vmem:[%s3269_s8 + $0x128] sm:$0xff]  ;;  %v3614_v63 = vld [vmem:[%s3269_s8 + $0x130] sm:$0xff]  ;;  %v3617_v0 = vld [vmem:[%s3269_s8 + $0x138] sm:$0xff] }
  0xf1   : > { %vm638_vm2 = vcmp.eq.s32.totalorder %v3352_v10, %v3421_v41  ;;  %vm639_vm3 = vcmp.eq.s32.totalorder %v3359_v13, %v3421_v41  ;;  %v905_v44 = vadd.f32 %v763_v26, %v762_v19  ;;  %5518 = vst [vmem:[#allocation10_spill] sm:$0xff] %v3614_v63 }
  0xf2   : > { %v3449_v53 = vpop.permute.xlu0 %467  ;;  %870 = vadd.xlane.f32.xlu0 %v869_v49  ;;  %v3473_v60 = vpop.permute.xlu1 %470  ;;  %v3534_v49 = vld [vmem:[%s3269_s8 + $0xd0] sm:$0xff]  ;;  %v767_v41 = vsel %vm639_vm3, %v3591_v40, 0.0 }
  0xf3   : > { %873 = vadd.xlane.f32.xlu1 %v872_v50  ;;  %v3537_v50 = vld [vmem:[%s3269_s8 + $0xd8] sm:$0xff]  ;;  %vm640_vm4 = vcmp.eq.s32.totalorder %v3352_v10, %v3449_v53  ;;  %vm641_vm5 = vcmp.eq.s32.totalorder %v3359_v13, %v3449_v53  ;;  %vm642_vm6 = vcmp.eq.s32.totalorder %v3352_v10, %v3473_v60  ;;  %vm643_vm7 = vcmp.eq.s32.totalorder %v3359_v13, %v3473_v60  ;;  %v3624_v53 = vld [vmem:[%s3269_s8 + $0x140] sm:$0xff] }
  0xf4   : > { %5519 = vst [vmem:[#allocation11_spill] sm:$0xff] %v3624_v53 }
  0xf6   : > { %v3477_v1 = vpop.permute.xlu0 %473  ;;  %876 = vadd.xlane.f32.xlu0 %v875_v61  ;;  %v3503_v11 = vpop.permute.xlu1 %476  ;;  %v758_v61 = vsel %vm630_vm10, %v3534_v49, 0.0 }
  0xf7   : > { %879 = vadd.xlane.f32.xlu1 %v878_v62  ;;  %v759_v62 = vsel %vm631_vm11, %v3537_v50, 0.0  ;;  %vm644_vm8 = vcmp.eq.s32.totalorder %v3352_v10, %v3477_v1  ;;  %vm645_vm9 = vcmp.eq.s32.totalorder %v3359_v13, %v3477_v1  ;;  %vm646_vm10 = vcmp.eq.s32.totalorder %v3352_v10, %v3503_v11  ;;  %v3652_v1 = vld [vmem:[%s3269_s8 + $0x160] sm:$0xff] }
  0xf8   : > { %vm647_vm11 = vcmp.eq.s32.totalorder %v3359_v13, %v3503_v11  ;;  %5522 = vst [vmem:[#allocation14_spill] sm:$0xff] %v3652_v1 }
  0xfa   : > { %882 = vadd.xlane.f32.xlu0 %v881_v9  ;;  %v3517_v15 = vpop.permute.xlu0 %479  ;;  %v3553_v52 = vpop.permute.xlu1 %482  ;;  %v3575_v9 = vld [vmem:[%s3269_s8 + $0x108] sm:$0xff] }
  0xfb   : > { %885 = vadd.xlane.f32.xlu1 %v884_v12  ;;  %v899_v12 = vadd.f32 %v759_v62, %v758_v61  ;;  %v768_v61 = vsel %vm640_vm4, %v3600_v14, 0.0  ;;  %v769_v62 = vsel %vm641_vm5, %v3603_v43, 0.0  ;;  %v3645_v14 = vld [vmem:[%s3269_s8 + $0x158] sm:$0xff]  ;;  %vm648_vm12 = vcmp.eq.s32.totalorder %v3352_v10, %v3517_v15 }
  0xfc   : > { %v914_v60 = vadd.f32 %v769_v62, %v768_v61  ;;  %vm649_vm13 = vcmp.eq.s32.totalorder %v3359_v13, %v3517_v15  ;;  %v774_v62 = vsel %vm646_vm10, %v3642_v7, 0.0  ;;  %vm650_vm14 = vcmp.eq.s32.totalorder %v3352_v10, %v3553_v52  ;;  %v3697_v7 = vld [vmem:[%s3269_s8 + $0x198] sm:$0xff] }
  0xfd   : > { %vm651_vm15 = vcmp.eq.s32.totalorder %v3359_v13, %v3553_v52 }
  0xfe   : > { %888 = vadd.xlane.f32.xlu0 %v887_v38  ;;  %v3555_v55 = vpop.permute.xlu0 %485  ;;  %v3583_v29 = vpop.permute.xlu1 %488  ;;  %v765_v38 = vsel %vm637_vm1, %v3575_v9, 0.0 }
  0xff   : > { %891 = vadd.xlane.f32.xlu1 %v890_v39  ;;  %v3588_v39 = vld [vmem:[%s3269_s8 + $0x110] sm:$0xff]  ;;  %vm652_vm0 = vcmp.eq.s32.totalorder %v3352_v10, %v3555_v55  ;;  %vm653_vm1 = vcmp.eq.s32.totalorder %v3359_v13, %v3555_v55  ;;  %vm655_vm3 = vcmp.eq.s32.totalorder %v3359_v13, %v3583_v29  ;;  %v3704_v55 = vld [vmem:[%s3269_s8 + $0x1a0] sm:$0xff] }
 0x100   : > { %5529 = vst [vmem:[#allocation21_spill] sm:$0xff] %v3704_v55 }
 0x102   : > { %894 = vadd.xlane.f32.xlu0 %v893_v54  ;;  %v3597_v42 = vpop.permute.xlu0 %491  ;;  %v908_v54 = vadd.f32 %v765_v38, %v764_v27  ;;  %v770_v27 = vsel %vm642_vm6, %v3614_v63, 0.0  ;;  %v771_v38 = vsel %vm643_vm7, %v3617_v0, 0.0  ;;  %v3671_v63 = vld [vmem:[%s3269_s8 + $0x178] sm:$0xff] }
 0x103   : > { %897 = vadd.xlane.f32.xlu1 %v896_v20  ;;  %v766_v20 = vsel %vm638_vm2, %v3588_v39, 0.0  ;;  %5525 = vst [vmem:[#allocation17_spill] sm:$0xff] %v3671_v63  ;;  %v779_v52 = vsel %vm651_vm15, %v3671_v63, 0.0  ;;  %vm654_vm2 = vcmp.eq.s32.totalorder %v3352_v10, %v3583_v29  ;;  %vm656_vm4 = vcmp.eq.s32.totalorder %v3352_v10, %v3597_v42  ;;  %v3721_v63 = vld [vmem:[%s3269_s8 + $0x1b8] sm:$0xff] }
 0x104   : > { %v911_v19 = vadd.f32 %v767_v41, %v766_v20  ;;  %v3655_v20 = vld [vmem:[%s3269_s8 + $0x168] sm:$0xff]  ;;  %v917_v41 = vadd.f32 %v771_v38, %v770_v27  ;;  %v3680_v27 = vld [vmem:[%s3269_s8 + $0x180] sm:$0xff]  ;;  %vm657_vm5 = vcmp.eq.s32.totalorder %v3359_v13, %v3597_v42 }
 0x105   : > { %5523 = vst [vmem:[#allocation15_spill] sm:$0xff] %v3655_v20  ;;  %5526 = vst [vmem:[#allocation18_spill] sm:$0xff] %v3680_v27  ;;  %v3683_v38 = vld [vmem:[%s3269_s8 + $0x188] sm:$0xff]  ;;  %v3728_v42 = vld [vmem:[%s3269_s8 + $0x1c0] sm:$0xff] }
 0x106   : > { %900 = vadd.xlane.f32.xlu0 %v899_v12  ;;  %v3627_v12 = vld [vmem:[%s3269_s8 + $0x148] sm:$0xff]  ;;  %v3635_v26 = vpop.permute.xlu0 %497  ;;  %5527 = vst [vmem:[#allocation19_spill] sm:$0xff] %v3683_v38  ;;  %5531 = vst [vmem:[#allocation23_spill] sm:$0xff] %v3728_v42 }
 0x107   : > { %903 = vadd.xlane.f32.xlu1 %v902_v18  ;;  %5520 = vst [vmem:[#allocation12_spill] sm:$0xff] %v3627_v12  ;;  %v3633_v18 = vpop.permute.xlu1 %494 }
 0x108   : > { %vm658_vm6 = vcmp.eq.s32.totalorder %v3352_v10, %v3633_v18  ;;  %vm659_vm7 = vcmp.eq.s32.totalorder %v3359_v13, %v3633_v18 }
 0x10a   : > { %906 = vadd.xlane.f32.xlu0 %v905_v44  ;;  %v772_v44 = vsel %vm644_vm8, %v3624_v53, 0.0  ;;  %v777_v53 = vsel %vm649_vm13, %v3655_v20, 0.0  ;;  %v3677_v15 = vpop.permute.xlu0 %503  ;;  %v3694_v20 = vld [vmem:[%s3269_s8 + $0x190] sm:$0xff]  ;;  %vm660_vm8 = vcmp.eq.s32.totalorder %v3352_v10, %v3635_v26 }
 0x10b   : > { %909 = vadd.xlane.f32.xlu1 %v908_v54  ;;  %v773_v54 = vsel %vm645_vm9, %v3627_v12, 0.0  ;;  %v3663_v11 = vpop.permute.xlu1 %500  ;;  %v3668_v12 = vld [vmem:[%s3269_s8 + $0x170] sm:$0xff]  ;;  %5528 = vst [vmem:[#allocation20_spill] sm:$0xff] %v3694_v20  ;;  %v782_v29 = vsel %vm654_vm2, %v3694_v20, 0.0  ;;  %vm661_vm9 = vcmp.eq.s32.totalorder %v3359_v13, %v3635_v26  ;;  %v3747_v20 = vld [vmem:[%s3269_s8 + $0x1d8] sm:$0xff]  ;;  %vm665_vm13 = vcmp.eq.s32.totalorder %v3359_v13, %v3677_v15 }
 0x10c   : > { %v920_v61 = vadd.f32 %v773_v54, %v772_v44  ;;  %5524 = vst [vmem:[#allocation16_spill] sm:$0xff] %v3668_v12  ;;  %5534 = vst [vmem:[#allocation26_spill] sm:$0xff] %v3747_v20  ;;  %vm662_vm10 = vcmp.eq.s32.totalorder %v3352_v10, %v3663_v11 }
 0x10e   : > { %912 = vadd.xlane.f32.xlu0 %v911_v19  ;;  %v775_v19 = vsel %vm647_vm11, %v3645_v14, 0.0  ;;  %vm663_vm11 = vcmp.eq.s32.totalorder %v3359_v13, %v3663_v11 }
 0x10f   : > { %915 = vadd.xlane.f32.xlu1 %v914_v60  ;;  %v776_v60 = vsel %vm648_vm12, %v3652_v1, 0.0  ;;  %v923_v44 = vadd.f32 %v775_v19, %v774_v62  ;;  %v781_v1 = vsel %vm653_vm1, %v3683_v38, 0.0  ;;  %v507_v62 = vpop.permute.xlu1 %506  ;;  %vm664_vm12 = vcmp.eq.s32.totalorder %v3352_v10, %v3677_v15  ;;  %v3778_v15 = vld [vmem:[%s3269_s8 + $0x200] sm:$0xff] }
 0x110   : > { %v926_v54 = vadd.f32 %v777_v53, %v776_v60  ;;  %v3707_v53 = vld [vmem:[%s3269_s8 + $0x1a8] sm:$0xff]  ;;  %v510_v60 = vpop.permute.xlu0 %509  ;;  %v791_v11 = vsel %vm663_vm11, %v3747_v20, 0.0  ;;  %vm667_vm15 = vcmp.eq.s32.totalorder %v3359_v13, %v507_v62 }
 0x111   : > { %5530 = vst [vmem:[#allocation22_spill] sm:$0xff] %v3707_v53  ;;  %v785_v38 = vsel %vm657_vm5, %v3707_v53, 0.0  ;;  %v3744_v53 = vld [vmem:[%s3269_s8 + $0x1d0] sm:$0xff]  ;;  %vm669_vm1 = vcmp.eq.s32.totalorder %v3359_v13, %v510_v60 }
 0x112   : > { %918 = vadd.xlane.f32.xlu0 %v917_v41  ;;  %v778_v41 = vsel %vm650_vm14, %v3668_v12, 0.0  ;;  %v3718_v12 = vld [vmem:[%s3269_s8 + $0x1b0] sm:$0xff]  ;;  %5533 = vst [vmem:[#allocation25_spill] sm:$0xff] %v3744_v53  ;;  %vm666_vm14 = vcmp.eq.s32.totalorder %v3352_v10, %v507_v62 }
 0x113   : > { %921 = vadd.xlane.f32.xlu1 %v920_v61  ;;  %v780_v61 = vsel %vm652_vm0, %v3680_v27, 0.0  ;;  %v929_v19 = vadd.f32 %v779_v52, %v778_v41  ;;  %v784_v27 = vsel %vm656_vm4, %v3704_v55, 0.0  ;;  %v3739_v18 = vpop.permute.xlu1 %512  ;;  %vm668_vm0 = vcmp.eq.s32.totalorder %v3352_v10, %v510_v60 }
 0x114   : > { %v938_v52 = vadd.f32 %v785_v38, %v784_v27  ;;  %5532 = vst [vmem:[#allocation24_spill] sm:$0xff] %v3739_v18  ;;  %v3753_v26 = vpop.permute.xlu0 %515  ;;  %v3756_v27 = vld [vmem:[%s3269_s8 + $0x1e0] sm:$0xff]  ;;  %v3759_v38 = vld [vmem:[%s3269_s8 + $0x1e8] sm:$0xff]  ;;  %v3770_v18 = vld [vmem:[%s3269_s8 + $0x1f0] sm:$0xff]  ;;  %v796_v62 = vsel %vm668_vm0, %v3778_v15, 0.0  ;;  %v1052_v60 = vmax.f32 %v3366_v16, %v3369_v17 }
 0x115   : > { %5535 = vst [vmem:[#allocation27_spill] sm:$0xff] %v3753_v26  ;;  %5536 = vst [vmem:[#allocation28_spill] sm:$0xff] %v3756_v27  ;;  %v793_v26 = vsel %vm665_vm13, %v3759_v38, 0.0 }
 0x116   : > { %924 = vadd.xlane.f32.xlu0 %v923_v44  ;;  %v932_v44 = vadd.f32 %v781_v1, %v780_v61  ;;  %v3731_v1 = vld [vmem:[%s3269_s8 + $0x1c8] sm:$0xff]  ;;  %v786_v61 = vsel %vm658_vm6, %v3718_v12, 0.0  ;;  %5537 = vst [vmem:[#allocation29_spill] sm:$0xff] %v3759_v38 }
 0x117   : > { %927 = vadd.xlane.f32.xlu1 %v926_v54  ;;  %v783_v54 = vsel %vm655_vm3, %v3697_v7, 0.0  ;;  %v789_v55 = vsel %vm661_vm9, %v3731_v1, 0.0 }
 0x118   : > { %v935_v41 = vadd.f32 %v783_v54, %v782_v29 }
 0x11a   : > { %930 = vadd.xlane.f32.xlu0 %v929_v19  ;;  %v787_v19 = vsel %vm659_vm7, %v3721_v63, 0.0 }
 0x11b   : > { %933 = vadd.xlane.f32.xlu1 %v932_v44  ;;  %v788_v44 = vsel %vm660_vm8, %v3728_v42, 0.0  ;;  %v941_v29 = vadd.f32 %v787_v19, %v786_v61  ;;  %v3773_v42 = vld [vmem:[%s3269_s8 + $0x1f8] sm:$0xff]  ;;  %v3785_v61 = vpop.permute.xlu1 %518 }
 0x11c   : > { %v944_v54 = vadd.f32 %v789_v55, %v788_v44  ;;  %v3781_v55 = vld [vmem:[%s3269_s8 + $0x208] sm:$0xff]  ;;  %v3787_v44 = vpop.permute.xlu0 %521  ;;  %v795_v38 = vsel %vm667_vm15, %v3773_v42, 0.0  ;;  %vm675_vm7 = vcmp.eq.s32.totalorder %v3359_v13, %v3785_v61 }
 0x11d   : > { %vm677_vm9 = vcmp.eq.s32.totalorder %v3359_v13, %v3787_v44 }
 0x11e   : > { %936 = vadd.xlane.f32.xlu0 %v935_v41  ;;  %v790_v41 = vsel %vm662_vm10, %v3744_v53, 0.0 }
 0x11f   : > { %939 = vadd.xlane.f32.xlu1 %v938_v52  ;;  %v792_v52 = vsel %vm664_vm12, %v3756_v27, 0.0  ;;  %v947_v19 = vadd.f32 %v791_v11, %v790_v41  ;;  %v794_v27 = vsel %vm666_vm14, %v3770_v18, 0.0  ;;  %v3793_v20 = vpop.permute.xlu1 %524  ;;  %v1058_v11 = vmax.f32 %v3380_v22, %v3383_v23 }
 0x120   : > { %v953_v53 = vadd.f32 %v795_v38, %v794_v27  ;;  %v3797_v41 = vpop.permute.xlu0 %527  ;;  %v1061_v27 = vmax.f32 %v3404_v33, %v3407_v34  ;;  %vm679_vm11 = vcmp.eq.s32.totalorder %v3359_v13, %v3793_v20 }
 0x121   : > { %vm681_vm15 = vcmp.eq.s32.totalorder %v3359_v13, %v3797_v41 }
 0x122   : > { %942 = vadd.xlane.f32.xlu0 %v941_v29  ;;  %v950_v29 = vadd.f32 %v793_v26, %v792_v52  ;;  %v1055_v26 = vmax.f32 %v3388_v24, %v3391_v25  ;;  %v1064_v52 = vmax.f32 %v3412_v35, %v3415_v36 }
 0x123   : > { %945 = vadd.xlane.f32.xlu1 %v944_v54  ;;  %v797_v54 = vsel %vm669_vm1, %v3781_v55, 0.0  ;;  %v3805_v38 = vpop.permute.xlu1 %530 }
 0x124   : > { %v956_v10 = vadd.f32 %v797_v54, %v796_v62  ;;  %v1073_v54 = vmax.f32 %v3454_v56, %v3457_v57  ;;  %vm683_vm13 = vcmp.eq.s32.totalorder %v3359_v13, %v3805_v38 }
 0x126   : > { %948 = vadd.xlane.f32.xlu0 %v947_v19 }
 0x127   : > { %951 = vadd.xlane.f32.xlu1 %v950_v29  ;;  %v3813_v19 = vpop.permute.xlu1 %536  ;;  %v1070_v29 = vmax.f32 %v3438_v47, %v3441_v48 }
 0x128   : > { %vm687_vm1 = vcmp.eq.s32.totalorder %v3359_v13, %v3813_v19 }
 0x12a   : > { %954 = vadd.xlane.f32.xlu0 %v953_v53  ;;  %v3807_v53 = vpop.permute.xlu0 %533 }
 0x12b   : > { %957 = vadd.xlane.f32.xlu1 %v956_v10  ;;  %v1067_v10 = vmax.f32 %v3428_v45, %v3431_v46 }
 0x12e   : > { %1053 = vmax.xlane.f32.xlu0 %v1052_v60  ;;  %v3817_v62 = vpop.permute.xlu0 %539  ;;  %v1076_v60 = vmax.f32 %v3464_v58, %v3467_v59 }
 0x12f   : > { %1056 = vmax.xlane.f32.xlu1 %v1055_v26  ;;  %5538 = vst [vmem:[#allocation30_spill] sm:$0xff] %v3817_v62  ;;  %v1079_v26 = vmax.f32 %v3482_v4, %v3485_v5 }
 0x132   : > { %1059 = vmax.xlane.f32.xlu0 %v1058_v11  ;;  %v3825_v11 = vpop.permute.xlu1 %542 }
 0x133   : > { %1062 = vmax.xlane.f32.xlu1 %v1061_v27  ;;  %5539 = vst [vmem:[#allocation31_spill] sm:$0xff] %v3825_v11  ;;  %v3827_v27 = vpop.permute.xlu0 %545 }
 0x134   : > { %5540 = vst [vmem:[#allocation32_spill] sm:$0xff] %v3827_v27  ;;  %v1091_v27 = vmax.f32 %v3534_v49, %v3537_v50  ;;  %v1103_v50 = vmax.f32 %v3588_v39, %v3591_v40 }
 0x136   : > { %1065 = vmax.xlane.f32.xlu0 %v1064_v52  ;;  %v1082_v52 = vmax.f32 %v3492_v6, %v3495_v8 }
 0x137   : > { %1068 = vmax.xlane.f32.xlu1 %v1067_v10  ;;  %v1085_v10 = vmax.f32 %v3508_v28, %v3511_v31  ;;  %v3837_v62 = vpop.permute.xlu0 %551 }
 0x138   : > { %5542 = vst [vmem:[#allocation34_spill] sm:$0xff] %v3837_v62  ;;  %v1100_v62 = vmax.f32 %v3572_v30, %v3575_v9  ;;  %v5551_v9 = vld [vmem:[#allocation13_spill] sm:$0xff] }
 0x139   : > { %v1115_v39 = vmax.f32 %v5551_v9, %v3645_v14  ;;  %v5562_v14 = vld [vmem:[#allocation20_spill] sm:$0xff] }
 0x13a   : > { %1071 = vmax.xlane.f32.xlu0 %v1070_v29  ;;  %v3833_v29 = vpop.permute.xlu1 %548  ;;  %v1127_v9 = vmax.f32 %v5562_v14, %v3697_v7  ;;  %v5568_v7 = vld [vmem:[#allocation26_spill] sm:$0xff] }
 0x13b   : > { %1074 = vmax.xlane.f32.xlu1 %v1073_v54  ;;  %5541 = vst [vmem:[#allocation33_spill] sm:$0xff] %v3833_v29  ;;  %v1088_v54 = vmax.f32 %v3520_v32, %v3523_v37  ;;  %v3902_v14 = vld [vmem:[%s3269_s8 + $0x210] sm:$0xff] }
 0x13e   : > { %1077 = vmax.xlane.f32.xlu0 %v1076_v60  ;;  %v1094_v60 = vmax.f32 %v3544_v21, %v3547_v51  ;;  %v3845_v11 = vpop.permute.xlu1 %554  ;;  %v5546_v21 = vld [vmem:[#allocation9_spill] sm:$0xff] }
 0x13f   : > { %1080 = vmax.xlane.f32.xlu1 %v1079_v26  ;;  %v1097_v26 = vmax.f32 %v3562_v2, %v3565_v3  ;;  %5543 = vst [vmem:[#allocation35_spill] sm:$0xff] %v3845_v11  ;;  %v1106_v51 = vmax.f32 %v5546_v21, %v3603_v43  ;;  %v5548_v2 = vld [vmem:[#allocation10_spill] sm:$0xff]  ;;  %v5554_v43 = vld [vmem:[#allocation15_spill] sm:$0xff] }
 0x140   : > { %v1109_v3 = vmax.f32 %v5548_v2, %v3617_v0  ;;  %v5559_v2 = vld [vmem:[#allocation19_spill] sm:$0xff]  ;;  %v307_v11 = vld [vmem:[%s3269_s8 + $0x2d0] sm:$0xff] }
 0x142   : > { %1083 = vmax.xlane.f32.xlu0 %v1082_v52  ;;  %v3847_v52 = vpop.permute.xlu0 %557 }
 0x143   : > { %1086 = vmax.xlane.f32.xlu1 %v1085_v10  ;;  %5544 = vst [vmem:[#allocation36_spill] sm:$0xff] %v3847_v52  ;;  %v3853_v10 = vpop.permute.xlu1 %560 }
 0x144   : > { %5545 = vst [vmem:[#allocation37_spill] sm:$0xff] %v3853_v10 }
 0x146   : > { %1089 = vmax.xlane.f32.xlu0 %v1088_v54  ;;  %v5549_v54 = vld [vmem:[#allocation12_spill] sm:$0xff] }
 0x147   : > { %1092 = vmax.xlane.f32.xlu1 %v1091_v27  ;;  %v3857_v27 = vpop.permute.xlu0 %563  ;;  %v3865_v40 = vpop.permute.xlu1 %566 }
 0x148   : > { %5547 = vst [vmem:[#allocation9_spill] sm:$0xff] %v3857_v27  ;;  %5552 = vst [vmem:[#allocation10_spill] sm:$0xff] %v3865_v40  ;;  %v5557_v27 = vld [vmem:[#allocation16_spill] sm:$0xff] }
 0x14a   : > { %1095 = vmax.xlane.f32.xlu0 %v1094_v60  ;;  %v5550_v60 = vld [vmem:[#allocation11_spill] sm:$0xff] }
 0x14b   : > { %1098 = vmax.xlane.f32.xlu1 %v1097_v26  ;;  %v1112_v30 = vmax.f32 %v5550_v60, %v5549_v54  ;;  %v5555_v26 = vld [vmem:[#allocation14_spill] sm:$0xff] }
 0x14c   : > { %v1118_v21 = vmax.f32 %v5555_v26, %v5554_v43 }
 0x14e   : > { %1101 = vmax.xlane.f32.xlu0 %v1100_v62  ;;  %v3867_v62 = vpop.permute.xlu0 %569 }
 0x14f   : > { %1104 = vmax.xlane.f32.xlu1 %v1103_v50  ;;  %5553 = vst [vmem:[#allocation12_spill] sm:$0xff] %v3867_v62  ;;  %v5556_v50 = vld [vmem:[#allocation17_spill] sm:$0xff] }
 0x150   : > { %v1121_v0 = vmax.f32 %v5557_v27, %v5556_v50  ;;  %v5564_v62 = vld [vmem:[#allocation21_spill] sm:$0xff]  ;;  %v1133_v27 = vmax.f32 %v3718_v12, %v3721_v63  ;;  %v5572_v63 = vld [vmem:[#allocation28_spill] sm:$0xff] }
 0x152   : > { %1107 = vmax.xlane.f32.xlu0 %v1106_v51  ;;  %v3873_v51 = vpop.permute.xlu1 %572  ;;  %v3877_v60 = vpop.permute.xlu0 %575 }
 0x153   : > { %1110 = vmax.xlane.f32.xlu1 %v1109_v3  ;;  %5558 = vst [vmem:[#allocation11_spill] sm:$0xff] %v3873_v51  ;;  %v5560_v3 = vld [vmem:[#allocation18_spill] sm:$0xff]  ;;  %5561 = vst [vmem:[#allocation13_spill] sm:$0xff] %v3877_v60 }
 0x154   : > { %v1124_v54 = vmax.f32 %v5560_v3, %v5559_v2  ;;  %v5571_v3 = vld [vmem:[#allocation29_spill] sm:$0xff]  ;;  %v300_v51 = vld [vmem:[%s3269_s8 + $0x298] sm:$0xff] }
 0x155   : > { %v1142_v12 = vmax.f32 %v5572_v63, %v5571_v3  ;;  %v3938_v3 = vld [vmem:[%s3269_s8 + $0x250] sm:$0xff]  ;;  %v3941_v63 = vld [vmem:[%s3269_s8 + $0x258] sm:$0xff] }
 0x156   : > { %1113 = vmax.xlane.f32.xlu0 %v1112_v30  ;;  %v5563_v30 = vld [vmem:[#allocation22_spill] sm:$0xff]  ;;  %v3885_v43 = vpop.permute.xlu1 %578  ;;  %v3887_v26 = vpop.permute.xlu0 %581 }
 0x157   : > { %1116 = vmax.xlane.f32.xlu1 %v1115_v39  ;;  %v1130_v39 = vmax.f32 %v5564_v62, %v5563_v30  ;;  %5565 = vst [vmem:[#allocation15_spill] sm:$0xff] %v3885_v43  ;;  %5566 = vst [vmem:[#allocation14_spill] sm:$0xff] %v3887_v26  ;;  %v1148_v30 = vmax.f32 %v3778_v15, %v3781_v55  ;;  %v297_v26 = vld [vmem:[%s3269_s8 + $0x280] sm:$0xff]  ;;  %v298_v43 = vld [vmem:[%s3269_s8 + $0x288] sm:$0xff] }
 0x158   : > { %v299_v60 = vld [vmem:[%s3269_s8 + $0x290] sm:$0xff]  ;;  %v1172_v40 = vmax.f32 %v297_v26, %v298_v43  ;;  %v305_v26 = vld [vmem:[%s3269_s8 + $0x2c0] sm:$0xff] }
 0x15a   : > { %1119 = vmax.xlane.f32.xlu0 %v1118_v21  ;;  %v5567_v21 = vld [vmem:[#allocation23_spill] sm:$0xff]  ;;  %v3893_v62 = vpop.permute.xlu1 %584 }
 0x15b   : > { %1122 = vmax.xlane.f32.xlu1 %v1121_v0  ;;  %v1136_v50 = vmax.f32 %v5567_v21, %v3731_v1  ;;  %v5569_v0 = vld [vmem:[#allocation25_spill] sm:$0xff]  ;;  %5570 = vst [vmem:[#allocation17_spill] sm:$0xff] %v3893_v62  ;;  %v1145_v1 = vmax.f32 %v3770_v18, %v3773_v42  ;;  %v3914_v21 = vld [vmem:[%s3269_s8 + $0x220] sm:$0xff] }
 0x15c   : > { %v1139_v2 = vmax.f32 %v5569_v0, %v5568_v7  ;;  %v3917_v42 = vld [vmem:[%s3269_s8 + $0x228] sm:$0xff]  ;;  %v3925_v7 = vld [vmem:[%s3269_s8 + $0x238] sm:$0xff]  ;;  %v3932_v0 = vld [vmem:[%s3269_s8 + $0x240] sm:$0xff] }
 0x15d   : > { %v1154_v15 = vmax.f32 %v3914_v21, %v3917_v42  ;;  %v294_v62 = vld [vmem:[%s3269_s8 + $0x268] sm:$0xff] }
 0x15e   : > { %1125 = vmax.xlane.f32.xlu0 %v1124_v54  ;;  %v3897_v54 = vpop.permute.xlu0 %587 }
 0x15f   : > { %1128 = vmax.xlane.f32.xlu1 %v1127_v9  ;;  %5573 = vst [vmem:[#allocation16_spill] sm:$0xff] %v3897_v54  ;;  %v3905_v9 = vld [vmem:[%s3269_s8 + $0x218] sm:$0xff] }
 0x160   : > { %v296_v54 = vld [vmem:[%s3269_s8 + $0x278] sm:$0xff] }
 0x162   : > { %1131 = vmax.xlane.f32.xlu0 %v1130_v39  ;;  %v1151_v39 = vmax.f32 %v3902_v14, %v3905_v9  ;;  %v3919_v18 = vpop.permute.xlu0 %593 }
 0x163   : > { %1134 = vmax.xlane.f32.xlu1 %v1133_v27  ;;  %v3911_v27 = vpop.permute.xlu1 %590  ;;  %5575 = vst [vmem:[#allocation18_spill] sm:$0xff] %v3919_v18  ;;  %v295_v18 = vld [vmem:[%s3269_s8 + $0x270] sm:$0xff] }
 0x164   : > { %5574 = vst [vmem:[#allocation19_spill] sm:$0xff] %v3911_v27  ;;  %v3952_v27 = vld [vmem:[%s3269_s8 + $0x260] sm:$0xff] }
 0x166   : > { %1137 = vmax.xlane.f32.xlu0 %v1136_v50  ;;  %v3922_v50 = vld [vmem:[%s3269_s8 + $0x230] sm:$0xff] }
 0x167   : > { %1140 = vmax.xlane.f32.xlu1 %v1139_v2  ;;  %v1157_v55 = vmax.f32 %v3922_v50, %v3925_v7  ;;  %v3935_v2 = vld [vmem:[%s3269_s8 + $0x248] sm:$0xff] }
 0x16a   : > { %1143 = vmax.xlane.f32.xlu0 %v1142_v12  ;;  %v3943_v12 = vpop.permute.xlu1 %596 }
 0x16b   : > { %1146 = vmax.xlane.f32.xlu1 %v1145_v1  ;;  %5576 = vst [vmem:[#allocation20_spill] sm:$0xff] %v3943_v12  ;;  %v1160_v1 = vmax.f32 %v3932_v0, %v3935_v2 }
 0x16e   : > { %1149 = vmax.xlane.f32.xlu0 %v1148_v30  ;;  %v3947_v30 = vpop.permute.xlu0 %599 }
 0x16f   : > { %1152 = vmax.xlane.f32.xlu1 %v1151_v39  ;;  %5577 = vst [vmem:[#allocation22_spill] sm:$0xff] %v3947_v30  ;;  %v1163_v39 = vmax.f32 %v3938_v3, %v3941_v63  ;;  %v1169_v30 = vmax.f32 %v295_v18, %v296_v54  ;;  %v302_v54 = vld [vmem:[%s3269_s8 + $0x2a8] sm:$0xff]  ;;  %v303_v18 = vld [vmem:[%s3269_s8 + $0x2b0] sm:$0xff] }
 0x172   : > { %1155 = vmax.xlane.f32.xlu0 %v1154_v15  ;;  %v1166_v15 = vmax.f32 %v3952_v27, %v294_v62  ;;  %v1175_v62 = vmax.f32 %v299_v60, %v300_v51 }
 0x173   : > { %1158 = vmax.xlane.f32.xlu1 %v1157_v55  ;;  %v3960_v55 = vpop.permute.xlu1 %602 }
 0x174   : > { %5579 = vst [vmem:[#allocation23_spill] sm:$0xff] %v3960_v55  ;;  %v304_v55 = vld [vmem:[%s3269_s8 + $0x2b8] sm:$0xff] }
 0x176   : > { %1161 = vmax.xlane.f32.xlu0 %v1160_v1 }
 0x177   : > { %v3958_v12 = vpop.xlane.xlu0 %861  ;;  %1164 = vmax.xlane.f32.xlu1 %v1163_v39  ;;  %v301_v39 = vld [vmem:[%s3269_s8 + $0x2a0] sm:$0xff] }
 0x178   : > { %5578 = vst [vmem:[#allocation21_spill] sm:$0xff] %v3958_v12  ;;  %v1178_v52 = vmax.f32 %v301_v39, %v302_v54 }
 0x17a   : > { %1167 = vmax.xlane.f32.xlu0 %v1166_v15  ;;  %v1181_v15 = vmax.f32 %v303_v18, %v304_v55 }
 0x17b   : > { %v3966_v1 = vpop.xlane.xlu0 %867  ;;  %1170 = vmax.xlane.f32.xlu1 %v1169_v30  ;;  %v308_v30 = vld [vmem:[%s3269_s8 + $0x2d8] sm:$0xff] }
 0x17c   : > { %5580 = vst [vmem:[#allocation26_spill] sm:$0xff] %v3966_v1  ;;  %v3968_v12 = vpop.xlane.xlu1 %864  ;;  %v306_v1 = vld [vmem:[%s3269_s8 + $0x2c8] sm:$0xff] }
 0x17d   : > { %5581 = vst [vmem:[#allocation25_spill] sm:$0xff] %v3968_v12  ;;  %v1184_v51 = vmax.f32 %v305_v26, %v306_v1  ;;  %v1187_v12 = vmax.f32 %v307_v11, %v308_v30 }
 0x17e   : > { %1173 = vmax.xlane.f32.xlu0 %v1172_v40 }
 0x17f   : > { %v3974_v10 = vpop.xlane.xlu0 %870  ;;  %1176 = vmax.xlane.f32.xlu1 %v1175_v62 }
 0x180   : > { %v3976_v43 = vpop.xlane.xlu1 %873 }
 0x182   : > { %1179 = vmax.xlane.f32.xlu0 %v1178_v52 }
 0x183   : > { %v3982_v60 = vpop.xlane.xlu0 %876  ;;  %1182 = vmax.xlane.f32.xlu1 %v1181_v15 }
 0x184   : > { %v3984_v29 = vpop.xlane.xlu1 %879 }
 0x186   : > { %1185 = vmax.xlane.f32.xlu0 %v1184_v51 }
 0x187   : > { %v3986_v40 = vpop.xlane.xlu0 %882  ;;  %1188 = vmax.xlane.f32.xlu1 %v1187_v12 }
 0x188   : > { %5582 = vst [vmem:[#allocation29_spill] sm:$0xff] %v3986_v40  ;;  %v3988_v62 = vpop.xlane.xlu1 %885 }
 0x189   : > { %5583 = vst [vmem:[#allocation28_spill] sm:$0xff] %v3988_v62 }
 0x18b   : > { %v3990_v55 = vpop.xlane.xlu0 %888 }
 0x18c   : > { %5584 = vst [vmem:[#allocation38_spill] sm:$0xff] %v3990_v55  ;;  %v3992_v39 = vpop.xlane.xlu1 %891 }
 0x18d   : > { %5585 = vst [vmem:[#allocation39_spill] sm:$0xff] %v3992_v39 }
 0x18f   : > { %v3994_v54 = vpop.xlane.xlu0 %894 }
 0x190   : > { %5586 = vst [vmem:[#allocation40_spill] sm:$0xff] %v3994_v54  ;;  %v3996_v52 = vpop.xlane.xlu1 %897 }
 0x191   : > { %5587 = vst [vmem:[#allocation41_spill] sm:$0xff] %v3996_v52 }
 0x193   : > { %v3998_v1 = vpop.xlane.xlu0 %900 }
 0x194   : > { %5588 = vst [vmem:[#allocation42_spill] sm:$0xff] %v3998_v1  ;;  %v4000_v18 = vpop.xlane.xlu1 %903 }
 0x195   : > { %5589 = vst [vmem:[#allocation43_spill] sm:$0xff] %v4000_v18 }
 0x197   : > { %v4002_v11 = vpop.xlane.xlu0 %906 }
 0x198   : > { %5590 = vst [vmem:[#allocation44_spill] sm:$0xff] %v4002_v11  ;;  %v4004_v15 = vpop.xlane.xlu1 %909 }
 0x199   : > { %5591 = vst [vmem:[#allocation45_spill] sm:$0xff] %v4004_v15 }
 0x19b   : > { %v4006_v26 = vpop.xlane.xlu0 %912 }
 0x19c   : > { %5592 = vst [vmem:[#allocation46_spill] sm:$0xff] %v4006_v26  ;;  %v4008_v12 = vpop.xlane.xlu1 %915 }
 0x19d   : > { %5593 = vst [vmem:[#allocation47_spill] sm:$0xff] %v4008_v12 }
 0x19f   : > { %v4010_v30 = vpop.xlane.xlu0 %918 }
 0x1a0   : > { %5594 = vst [vmem:[#allocation48_spill] sm:$0xff] %v4010_v30  ;;  %v4012_v51 = vpop.xlane.xlu1 %921 }
 0x1a1   : > { %5595 = vst [vmem:[#allocation49_spill] sm:$0xff] %v4012_v51 }
 0x1a3   : > { %v4014_v39 = vpop.xlane.xlu0 %924 }
 0x1a4   : > { %5596 = vst [vmem:[#allocation50_spill] sm:$0xff] %v4014_v39  ;;  %v4016_v54 = vpop.xlane.xlu1 %927 }
 0x1a5   : > { %5597 = vst [vmem:[#allocation51_spill] sm:$0xff] %v4016_v54 }
 0x1a7   : > { %v4018_v52 = vpop.xlane.xlu0 %930 }
 0x1a8   : > { %5598 = vst [vmem:[#allocation52_spill] sm:$0xff] %v4018_v52  ;;  %v4020_v1 = vpop.xlane.xlu1 %933 }
 0x1a9   : > { %5599 = vst [vmem:[#allocation53_spill] sm:$0xff] %v4020_v1 }
 0x1ab   : > { %v4022_v18 = vpop.xlane.xlu0 %936 }
 0x1ac   : > { %5600 = vst [vmem:[#allocation54_spill] sm:$0xff] %v4022_v18  ;;  %v4024_v11 = vpop.xlane.xlu1 %939 }
 0x1ad   : > { %5601 = vst [vmem:[#allocation55_spill] sm:$0xff] %v4024_v11 }
 0x1af   : > { %v4026_v15 = vpop.xlane.xlu0 %942 }
 0x1b0   : > { %5602 = vst [vmem:[#allocation56_spill] sm:$0xff] %v4026_v15  ;;  %v4028_v26 = vpop.xlane.xlu1 %945 }
 0x1b1   : > { %5603 = vst [vmem:[#allocation57_spill] sm:$0xff] %v4028_v26 }
 0x1b3   : > { %v4030_v12 = vpop.xlane.xlu0 %948 }
 0x1b4   : > { %5604 = vst [vmem:[#allocation58_spill] sm:$0xff] %v4030_v12  ;;  %v4032_v30 = vpop.xlane.xlu1 %951 }
 0x1b5   : > { %5605 = vst [vmem:[#allocation59_spill] sm:$0xff] %v4032_v30 }
 0x1b7   : > { %v4034_v51 = vpop.xlane.xlu0 %954 }
 0x1b8   : > { %5606 = vst [vmem:[#allocation60_spill] sm:$0xff] %v4034_v51  ;;  %v4036_v39 = vpop.xlane.xlu1 %957 }
 0x1b9   : > { %5607 = vst [vmem:[#allocation61_spill] sm:$0xff] %v4036_v39 }
 0x1bb   : > { %v4038_v54 = vpop.xlane.xlu0 %1053 }
 0x1bc   : > { %v1244_v1 = vsub.f32 %v3366_v16, %v4038_v54  ;;  %v1245_v11 = vsub.f32 %v3369_v17, %v4038_v54  ;;  %v4044_v18 = vpop.xlane.xlu1 %1056 }
 0x1bd   : > { %v1246_v26 = vsub.f32 %v3388_v24, %v4044_v18  ;;  %v1247_v30 = vsub.f32 %v3391_v25, %v4044_v18 }
 0x1be   : > { %v1372_v12 = vmul.f32 1.442695, %v1244_v1  ;;  %v1374_v51 = vmul.f32 1.442695, %v1245_v11 }
 0x1bf   : > { %v1376_v15 = vmul.f32 1.442695, %v1246_v26  ;;  %v1378_v39 = vmul.f32 1.442695, %v1247_v30  ;;  %v4050_v52 = vpop.xlane.xlu0 %1059 }
 0x1c0   : > { %2564 = vpow2.f32 %v1372_v12  ;;  %v1248_v16 = vsub.f32 %v3380_v22, %v4050_v52  ;;  %v1249_v17 = vsub.f32 %v3383_v23, %v4050_v52  ;;  %v4056_v55 = vpop.xlane.xlu1 %1062 }
 0x1c1   : > { %2566 = vpow2.f32 %v1374_v51  ;;  %v1250_v24 = vsub.f32 %v3404_v33, %v4056_v55  ;;  %v1251_v25 = vsub.f32 %v3407_v34, %v4056_v55 }
 0x1c2   : > { %2568 = vpow2.f32 %v1376_v15  ;;  %v1380_v1 = vmul.f32 1.442695, %v1248_v16  ;;  %v1382_v11 = vmul.f32 1.442695, %v1249_v17 }
 0x1c3   : > { %2570 = vpow2.f32 %v1378_v39  ;;  %v1384_v26 = vmul.f32 1.442695, %v1250_v24  ;;  %v1386_v12 = vmul.f32 1.442695, %v1251_v25  ;;  %v4062_v30 = vpop.xlane.xlu0 %1065 }
 0x1c4   : > { %2572 = vpow2.f32 %v1380_v1  ;;  %v1252_v22 = vsub.f32 %v3412_v35, %v4062_v30  ;;  %v1253_v23 = vsub.f32 %v3415_v36, %v4062_v30  ;;  %v4068_v51 = vpop.xlane.xlu1 %1068 }
 0x1c5   : > { %2574 = vpow2.f32 %v1382_v11  ;;  %v1254_v34 = vsub.f32 %v3428_v45, %v4068_v51  ;;  %v1255_v15 = vsub.f32 %v3431_v46, %v4068_v51 }
 0x1c6   : > { %2576 = vpow2.f32 %v1384_v26  ;;  %v1388_v33 = vmul.f32 1.442695, %v1252_v22  ;;  %v1390_v39 = vmul.f32 1.442695, %v1253_v23  ;;  %v309_v26 = vld [vmem:[%s3269_s8 + $0x2e0] sm:$0xff] }
 0x1c7   : > { %2578 = vpow2.f32 %v1386_v12  ;;  %v4074_v16 = vpop.xlane.xlu0 %1071  ;;  %v1392_v36 = vmul.f32 1.442695, %v1254_v34  ;;  %v1394_v25 = vmul.f32 1.442695, %v1255_v15  ;;  %v310_v12 = vld [vmem:[%s3269_s8 + $0x2e8] sm:$0xff] }
 0x1c8   : > { %2580 = vpow2.f32 %v1388_v33  ;;  %v1256_v17 = vsub.f32 %v3438_v47, %v4074_v16  ;;  %v1257_v45 = vsub.f32 %v3441_v48, %v4074_v16  ;;  %v4080_v1 = vpop.xlane.xlu1 %1074  ;;  %v1190_v23 = vmax.f32 %v309_v26, %v310_v12 }
 0x1c9   : > { %2582 = vpow2.f32 %v1390_v39  ;;  %v1258_v39 = vsub.f32 %v3454_v56, %v4080_v1  ;;  %v1259_v62 = vsub.f32 %v3457_v57, %v4080_v1 }
 0x1ca   : > { %v2565_v35 = vpop.eup %2564  ;;  %2584 = vpow2.f32 %v1392_v36  ;;  %v1396_v34 = vmul.f32 1.442695, %v1256_v17  ;;  %v1398_v48 = vmul.f32 1.442695, %v1257_v45  ;;  %v311_v36 = vld [vmem:[%s3269_s8 + $0x2f0] sm:$0xff] }
 0x1cb   : > { %v2567_v24 = vpop.eup %2566  ;;  %2586 = vpow2.f32 %v1394_v25  ;;  %v4088_v40 = vpop.xlane.xlu0 %1077  ;;  %v1400_v17 = vmul.f32 1.442695, %v1258_v39  ;;  %v1402_v45 = vmul.f32 1.442695, %v1259_v62 }
 0x1cc   : > { %v2569_v11 = vpop.eup %2568  ;;  %v1628_v46 = vadd.f32 %v2567_v24, %v2565_v35  ;;  %2588 = vpow2.f32 %v1396_v34  ;;  %v1260_v25 = vsub.f32 %v3464_v58, %v4088_v40  ;;  %v1261_v57 = vsub.f32 %v3467_v59, %v4088_v40  ;;  %v4096_v12 = vpop.xlane.xlu1 %1080  ;;  %v314_v34 = vld [vmem:[%s3269_s8 + $0x308] sm:$0xff] }
 0x1cd   : > { %v2571_v22 = vpop.eup %2570  ;;  %2590 = vpow2.f32 %v1398_v48  ;;  %5608 = vst [vmem:[#allocation62_spill] sm:$0xff] %v4096_v12  ;;  %v1262_v62 = vsub.f32 %v3482_v4, %v4096_v12 }
 0x1ce   : > { %v2573_v33 = vpop.eup %2572  ;;  %1629 = vadd.xlane.f32.xlu0 %v1628_v46  ;;  %v1631_v47 = vadd.f32 %v2571_v22, %v2569_v11  ;;  %v312_v11 = vld [vmem:[%s3269_s8 + $0x2f8] sm:$0xff]  ;;  %2592 = vpow2.f32 %v1400_v17  ;;  %v1404_v58 = vmul.f32 1.442695, %v1260_v25  ;;  %v1406_v59 = vmul.f32 1.442695, %v1261_v57 }
 0x1cf   : > { %v2575_v15 = vpop.eup %2574  ;;  %v1193_v56 = vmax.f32 %v311_v36, %v312_v11  ;;  %2594 = vpow2.f32 %v1402_v45  ;;  %v315_v36 = vld [vmem:[%s3269_s8 + $0x310] sm:$0xff]  ;;  %v316_v11 = vld [vmem:[%s3269_s8 + $0x318] sm:$0xff]  ;;  %v1408_v4 = vmul.f32 1.442695, %v1262_v62 }
 0x1d0   : > { %v2577_v35 = vpop.eup %2576  ;;  %1632 = vadd.xlane.f32.xlu1 %v1631_v47  ;;  %v1634_v24 = vadd.f32 %v2575_v15, %v2573_v33  ;;  %v313_v47 = vld [vmem:[%s3269_s8 + $0x300] sm:$0xff]  ;;  %v1263_v15 = vsub.f32 %v3485_v5, %v4096_v12  ;;  %v4106_v48 = vpop.xlane.xlu1 %1086  ;;  %2596 = vpow2.f32 %v1404_v58  ;;  %v2966_v12 = vld [vmem:[%s3269_s8 + $0x168] sm:$0xff] }
 0x1d1   : > { %v2579_v26 = vpop.eup %2578  ;;  %v1196_v39 = vmax.f32 %v313_v47, %v314_v34  ;;  %5610 = vst [vmem:[#allocation64_spill] sm:$0xff] %v4106_v48  ;;  %2598 = vpow2.f32 %v1406_v59  ;;  %v317_v47 = vld [vmem:[%s3269_s8 + $0x320] sm:$0xff]  ;;  %v318_v34 = vld [vmem:[%s3269_s8 + $0x328] sm:$0xff]  ;;  %v1266_v62 = vsub.f32 %v3508_v28, %v4106_v48  ;;  %v1267_v59 = vsub.f32 %v3511_v31, %v4106_v48  ;;  %v332_v48 = vld [vmem:[%s3269_s8 + $0x398] sm:$0xff] }
 0x1d2   : > { %1191 = vmax.xlane.f32.xlu0 %v1190_v23  ;;  %v2581_v46 = vpop.eup %2580  ;;  %v1637_v22 = vadd.f32 %v2579_v26, %v2577_v35  ;;  %v4100_v23 = vpop.xlane.xlu0 %1083  ;;  %v1410_v5 = vmul.f32 1.442695, %v1263_v15  ;;  %2600 = vpow2.f32 %v1408_v4 }
 0x1d3   : > { %v2583_v33 = vpop.eup %2582  ;;  %5609 = vst [vmem:[#allocation63_spill] sm:$0xff] %v4100_v23  ;;  %v1264_v25 = vsub.f32 %v3492_v6, %v4100_v23  ;;  %v1265_v45 = vsub.f32 %v3495_v8, %v4100_v23  ;;  %v1416_v28 = vmul.f32 1.442695, %v1266_v62  ;;  %v1418_v31 = vmul.f32 1.442695, %v1267_v59 }
 0x1d4   : > { %1635 = vadd.xlane.f32.xlu1 %v1634_v24  ;;  %v2585_v35 = vpop.eup %2584  ;;  %v1640_v24 = vadd.f32 %v2583_v33, %v2581_v46  ;;  %v4116_v57 = vpop.xlane.xlu1 %1092  ;;  %2602 = vpow2.f32 %v1410_v5 }
 0x1d5   : > { %v2587_v26 = vpop.eup %2586  ;;  %5612 = vst [vmem:[#allocation66_spill] sm:$0xff] %v4116_v57  ;;  %v1412_v6 = vmul.f32 1.442695, %v1264_v25  ;;  %v1414_v8 = vmul.f32 1.442695, %v1265_v45 }
 0x1d6   : > { %1194 = vmax.xlane.f32.xlu0 %v1193_v56  ;;  %v4110_v17 = vpop.xlane.xlu0 %1089  ;;  %v1199_v56 = vmax.f32 %v315_v36, %v316_v11  ;;  %v2589_v46 = vpop.eup %2588  ;;  %v319_v36 = vld [vmem:[%s3269_s8 + $0x330] sm:$0xff]  ;;  %v320_v11 = vld [vmem:[%s3269_s8 + $0x338] sm:$0xff] }
 0x1d7   : > { %5611 = vst [vmem:[#allocation65_spill] sm:$0xff] %v4110_v17  ;;  %v2591_v33 = vpop.eup %2590  ;;  %2604 = vpow2.f32 %v1412_v6  ;;  %v1268_v25 = vsub.f32 %v3520_v32, %v4110_v17  ;;  %v1269_v5 = vsub.f32 %v3523_v37, %v4110_v17  ;;  %v1270_v37 = vsub.f32 %v3534_v49, %v4116_v57  ;;  %v326_v17 = vld [vmem:[%s3269_s8 + $0x368] sm:$0xff] }
 0x1d8   : > { %1638 = vadd.xlane.f32.xlu1 %v1637_v22  ;;  %v1643_v22 = vadd.f32 %v2587_v26, %v2585_v35  ;;  %v4126_v15 = vpop.xlane.xlu1 %1098  ;;  %v2593_v35 = vpop.eup %2592  ;;  %2606 = vpow2.f32 %v1414_v8  ;;  %v2948_v8 = vld [vmem:[%s3269_s8 + $0xd8] sm:$0xff] }
 0x1d9   : > { %5614 = vst [vmem:[#allocation68_spill] sm:$0xff] %v4126_v15  ;;  %v2595_v26 = vpop.eup %2594  ;;  %2608 = vpow2.f32 %v1416_v28  ;;  %v1420_v32 = vmul.f32 1.442695, %v1268_v25  ;;  %v1422_v62 = vmul.f32 1.442695, %v1269_v5  ;;  %v1271_v59 = vsub.f32 %v2948_v8, %v4116_v57  ;;  %v324_v28 = vld [vmem:[%s3269_s8 + $0x358] sm:$0xff] }
 0x1da   : > { %1197 = vmax.xlane.f32.xlu0 %v1196_v39  ;;  %v4120_v58 = vpop.xlane.xlu0 %1095  ;;  %v1202_v39 = vmax.f32 %v317_v47, %v318_v34  ;;  %v321_v47 = vld [vmem:[%s3269_s8 + $0x340] sm:$0xff]  ;;  %v322_v34 = vld [vmem:[%s3269_s8 + $0x348] sm:$0xff]  ;;  %2610 = vpow2.f32 %v1418_v31  ;;  %v1424_v49 = vmul.f32 1.442695, %v1270_v37 }
 0x1db   : > { %5613 = vst [vmem:[#allocation67_spill] sm:$0xff] %v4120_v58  ;;  %2612 = vpow2.f32 %v1420_v32  ;;  %v2949_v31 = vld [vmem:[%s3269_s8 + $0xe0] sm:$0xff] }
 0x1dc   : > { %1641 = vadd.xlane.f32.xlu1 %v1640_v24  ;;  %v1646_v24 = vadd.f32 %v2591_v33, %v2589_v46  ;;  %v4136_v45 = vpop.xlane.xlu1 %1104  ;;  %v2597_v46 = vpop.eup %2596  ;;  %v1272_v5 = vsub.f32 %v2949_v31, %v4120_v58  ;;  %2614 = vpow2.f32 %v1422_v62  ;;  %v325_v57 = vld [vmem:[%s3269_s8 + $0x360] sm:$0xff]  ;;  %v2951_v62 = vld [vmem:[%s3269_s8 + $0xf0] sm:$0xff] }
 0x1dd   : > { %5616 = vst [vmem:[#allocation70_spill] sm:$0xff] %v4136_v45  ;;  %v2599_v33 = vpop.eup %2598  ;;  %2616 = vpow2.f32 %v1424_v49  ;;  %v1214_v37 = vmax.f32 %v325_v57, %v326_v17 }
 0x1de   : > { %1200 = vmax.xlane.f32.xlu0 %v1199_v56  ;;  %v4130_v4 = vpop.xlane.xlu0 %1101  ;;  %v1205_v56 = vmax.f32 %v319_v36, %v320_v11  ;;  %v323_v11 = vld [vmem:[%s3269_s8 + $0x350] sm:$0xff] }
 0x1df   : > { %5615 = vst [vmem:[#allocation69_spill] sm:$0xff] %v4130_v4  ;;  %v1211_v25 = vmax.f32 %v323_v11, %v324_v28  ;;  %v2952_v28 = vld [vmem:[%s3269_s8 + $0xf8] sm:$0xff] }
 0x1e0   : > { %1644 = vadd.xlane.f32.xlu1 %v1643_v22  ;;  %v1649_v22 = vadd.f32 %v2595_v26, %v2593_v35  ;;  %v4146_v35 = vpop.xlane.xlu1 %1110  ;;  %v1652_v26 = vadd.f32 %v2599_v33, %v2597_v46 }
 0x1e1   : > { %5618 = vst [vmem:[#allocation72_spill] sm:$0xff] %v4146_v35 }
 0x1e2   : > { %1203 = vmax.xlane.f32.xlu0 %v1202_v39  ;;  %v4140_v6 = vpop.xlane.xlu0 %1107  ;;  %v1208_v39 = vmax.f32 %v321_v47, %v322_v34  ;;  %v1426_v47 = vmul.f32 1.442695, %v1271_v59  ;;  %v2950_v34 = vld [vmem:[%s3269_s8 + $0xe8] sm:$0xff]  ;;  %v1274_v59 = vsub.f32 %v2951_v62, %v4126_v15 }
 0x1e3   : > { %5617 = vst [vmem:[#allocation71_spill] sm:$0xff] %v4140_v6  ;;  %v1273_v46 = vsub.f32 %v2950_v34, %v4120_v58  ;;  %v327_v34 = vld [vmem:[%s3269_s8 + $0x370] sm:$0xff]  ;;  %v2954_v62 = vld [vmem:[%s3269_s8 + $0x108] sm:$0xff] }
 0x1e4   : > { %1647 = vadd.xlane.f32.xlu1 %v1646_v24  ;;  %v2601_v24 = vpop.eup %2600  ;;  %v4158_v32 = vpop.xlane.xlu1 %1116  ;;  %2618 = vpow2.f32 %v1426_v47  ;;  %v1432_v17 = vmul.f32 1.442695, %v1274_v59  ;;  %v331_v58 = vld [vmem:[%s3269_s8 + $0x390] sm:$0xff] }
 0x1e5   : > { %v2603_v36 = vpop.eup %2602  ;;  %v1430_v11 = vmul.f32 1.442695, %v1273_v46 }
 0x1e6   : > { %1206 = vmax.xlane.f32.xlu0 %v1205_v56  ;;  %v4150_v56 = vpop.xlane.xlu0 %1113  ;;  %v1655_v33 = vadd.f32 %v2603_v36, %v2601_v24  ;;  %v1275_v24 = vsub.f32 %v2952_v28, %v4126_v15  ;;  %v1277_v28 = vsub.f32 %v2954_v62, %v4130_v4  ;;  %v329_v15 = vld [vmem:[%s3269_s8 + $0x380] sm:$0xff]  ;;  %v2956_v62 = vld [vmem:[%s3269_s8 + $0x118] sm:$0xff] }
 0x1e7   : > { %5619 = vst [vmem:[#allocation73_spill] sm:$0xff] %v4150_v56 }
 0x1e8   : > { %1650 = vadd.xlane.f32.xlu1 %v1649_v22  ;;  %v2605_v22 = vpop.eup %2604  ;;  %v1434_v46 = vmul.f32 1.442695, %v1275_v24 }
 0x1e9   : > { %v2607_v8 = vpop.eup %2606 }
 0x1ea   : > { %1209 = vmax.xlane.f32.xlu0 %v1208_v39  ;;  %v1428_v39 = vmul.f32 1.442695, %v1272_v5  ;;  %v2609_v36 = vpop.eup %2608  ;;  %v1658_v31 = vadd.f32 %v2607_v8, %v2605_v22  ;;  %v2953_v5 = vld [vmem:[%s3269_s8 + $0x100] sm:$0xff] }
 0x1eb   : > { %v2611_v49 = vpop.eup %2610  ;;  %v1276_v47 = vsub.f32 %v2953_v5, %v4130_v4  ;;  %v1438_v5 = vmul.f32 1.442695, %v1277_v28 }
 0x1ec   : > { %1653 = vadd.xlane.f32.xlu1 %v1652_v26  ;;  %v4164_v26 = vpop.xlane.xlu0 %1119  ;;  %2620 = vpow2.f32 %v1428_v39  ;;  %v2613_v22 = vpop.eup %2612  ;;  %v1661_v8 = vadd.f32 %v2611_v49, %v2609_v36  ;;  %v1279_v36 = vsub.f32 %v2956_v62, %v4136_v45  ;;  %v333_v62 = vld [vmem:[%s3269_s8 + $0x3a0] sm:$0xff] }
 0x1ed   : > { %5620 = vst [vmem:[#allocation74_spill] sm:$0xff] %v4164_v26  ;;  %2622 = vpow2.f32 %v1430_v11  ;;  %v2615_v39 = vpop.eup %2614  ;;  %v1436_v11 = vmul.f32 1.442695, %v1276_v47  ;;  %v2957_v47 = vld [vmem:[%s3269_s8 + $0x120] sm:$0xff] }
 0x1ee   : > { %1212 = vmax.xlane.f32.xlu0 %v1211_v25  ;;  %v328_v25 = vld [vmem:[%s3269_s8 + $0x378] sm:$0xff]  ;;  %2624 = vpow2.f32 %v1432_v17  ;;  %v1664_v49 = vadd.f32 %v2615_v39, %v2613_v22  ;;  %v1442_v28 = vmul.f32 1.442695, %v1279_v36 }
 0x1ef   : > { %v1217_v57 = vmax.f32 %v327_v34, %v328_v25  ;;  %v2955_v34 = vld [vmem:[%s3269_s8 + $0x110] sm:$0xff]  ;;  %2626 = vpow2.f32 %v1434_v46  ;;  %v1280_v46 = vsub.f32 %v2957_v47, %v4140_v6  ;;  %v2960_v47 = vld [vmem:[%s3269_s8 + $0x138] sm:$0xff] }
 0x1f0   : > { %1656 = vadd.xlane.f32.xlu1 %v1655_v33  ;;  %v4172_v33 = vpop.xlane.xlu1 %1122  ;;  %v4176_v59 = vpop.xlane.xlu0 %1125  ;;  %v1278_v25 = vsub.f32 %v2955_v34, %v4136_v45  ;;  %2628 = vpow2.f32 %v1436_v11 }
 0x1f1   : > { %5621 = vst [vmem:[#allocation75_spill] sm:$0xff] %v4172_v33  ;;  %5622 = vst [vmem:[#allocation76_spill] sm:$0xff] %v4176_v59  ;;  %2630 = vpow2.f32 %v1438_v5 }
 0x1f2   : > { %1215 = vmax.xlane.f32.xlu0 %v1214_v37  ;;  %v330_v37 = vld [vmem:[%s3269_s8 + $0x388] sm:$0xff] }
 0x1f3   : > { %v1220_v24 = vmax.f32 %v329_v15, %v330_v37  ;;  %v1440_v15 = vmul.f32 1.442695, %v1278_v25  ;;  %v2958_v37 = vld [vmem:[%s3269_s8 + $0x128] sm:$0xff]  ;;  %v2959_v25 = vld [vmem:[%s3269_s8 + $0x130] sm:$0xff] }
 0x1f4   : > { %1659 = vadd.xlane.f32.xlu1 %v1658_v31  ;;  %v2617_v31 = vpop.eup %2616  ;;  %v4184_v17 = vpop.xlane.xlu1 %1128  ;;  %v1281_v22 = vsub.f32 %v2958_v37, %v4140_v6  ;;  %v1282_v5 = vsub.f32 %v2959_v25, %v4146_v35  ;;  %v2962_v6 = vld [vmem:[%s3269_s8 + $0x148] sm:$0xff] }
 0x1f5   : > { %v2619_v4 = vpop.eup %2618  ;;  %5623 = vst [vmem:[#allocation77_spill] sm:$0xff] %v4184_v17  ;;  %2632 = vpow2.f32 %v1440_v15 }
 0x1f6   : > { %1218 = vmax.xlane.f32.xlu0 %v1217_v57  ;;  %v1223_v57 = vmax.f32 %v331_v58, %v332_v48  ;;  %v2621_v39 = vpop.eup %2620  ;;  %v1667_v34 = vadd.f32 %v2619_v4, %v2617_v31  ;;  %v1444_v48 = vmul.f32 1.442695, %v1280_v46  ;;  %2634 = vpow2.f32 %v1442_v28 }
 0x1f7   : > { %v2623_v11 = vpop.eup %2622  ;;  %v1446_v36 = vmul.f32 1.442695, %v1281_v22  ;;  %v1285_v28 = vsub.f32 %v2962_v6, %v4150_v56  ;;  %v1448_v25 = vmul.f32 1.442695, %v1282_v5 }
 0x1f8   : > { %1662 = vadd.xlane.f32.xlu1 %v1661_v8  ;;  %v4190_v8 = vpop.xlane.xlu0 %1131  ;;  %v4198_v4 = vpop.xlane.xlu1 %1134  ;;  %v1670_v15 = vadd.f32 %v2623_v11, %v2621_v39  ;;  %2636 = vpow2.f32 %v1444_v48  ;;  %v2963_v39 = vld [vmem:[%s3269_s8 + $0x150] sm:$0xff]  ;;  %v2965_v48 = vld [vmem:[%s3269_s8 + $0x160] sm:$0xff] }
 0x1f9   : > { %5624 = vst [vmem:[#allocation78_spill] sm:$0xff] %v4190_v8  ;;  %5625 = vst [vmem:[#allocation79_spill] sm:$0xff] %v4198_v4  ;;  %v2625_v31 = vpop.eup %2624  ;;  %v1286_v11 = vsub.f32 %v2963_v39, %v4158_v32  ;;  %2638 = vpow2.f32 %v1446_v36  ;;  %v1454_v23 = vmul.f32 1.442695, %v1285_v28  ;;  %v1289_v36 = vsub.f32 %v2966_v12, %v4164_v26 }
 0x1fa   : > { %1221 = vmax.xlane.f32.xlu0 %v1220_v24  ;;  %v334_v24 = vld [vmem:[%s3269_s8 + $0x3a8] sm:$0xff]  ;;  %v2627_v37 = vpop.eup %2626  ;;  %2640 = vpow2.f32 %v1448_v25 }
 0x1fb   : > { %v1226_v58 = vmax.f32 %v333_v62, %v334_v24  ;;  %v335_v62 = vld [vmem:[%s3269_s8 + $0x3b0] sm:$0xff]  ;;  %v336_v24 = vld [vmem:[%s3269_s8 + $0x3b8] sm:$0xff]  ;;  %v2629_v45 = vpop.eup %2628  ;;  %v1673_v6 = vadd.f32 %v2627_v37, %v2625_v31 }
 0x1fc   : > { %1665 = vadd.xlane.f32.xlu1 %v1664_v49  ;;  %v1283_v49 = vsub.f32 %v2960_v47, %v4146_v35  ;;  %v4206_v22 = vpop.xlane.xlu0 %1137  ;;  %v2631_v5 = vpop.eup %2630  ;;  %v2967_v31 = vld [vmem:[%s3269_s8 + $0x170] sm:$0xff] }
 0x1fd   : > { %5626 = vst [vmem:[#allocation80_spill] sm:$0xff] %v4206_v22  ;;  %v1676_v25 = vadd.f32 %v2631_v5, %v2629_v45  ;;  %v2971_v45 = vld [vmem:[%s3269_s8 + $0x190] sm:$0xff] }
 0x1fe   : > { %1224 = vmax.xlane.f32.xlu0 %v1223_v57  ;;  %v2961_v57 = vld [vmem:[%s3269_s8 + $0x140] sm:$0xff]  ;;  %v1450_v47 = vmul.f32 1.442695, %v1283_v49  ;;  %v4218_v49 = vpop.xlane.xlu1 %1140 }
 0x1ff   : > { %v1284_v46 = vsub.f32 %v2961_v57, %v4150_v56  ;;  %v2964_v57 = vld [vmem:[%s3269_s8 + $0x158] sm:$0xff]  ;;  %5627 = vst [vmem:[#allocation81_spill] sm:$0xff] %v4218_v49  ;;  %v2633_v12 = vpop.eup %2632 }
 0x200   : > { %1668 = vadd.xlane.f32.xlu1 %v1667_v34  ;;  %v1229_v34 = vmax.f32 %v335_v62, %v336_v24  ;;  %v1287_v35 = vsub.f32 %v2964_v57, %v4158_v32  ;;  %v337_v62 = vld [vmem:[%s3269_s8 + $0x3c0] sm:$0xff]  ;;  %v338_v24 = vld [vmem:[%s3269_s8 + $0x3c8] sm:$0xff]  ;;  %2642 = vpow2.f32 %v1450_v47  ;;  %v2968_v57 = vld [vmem:[%s3269_s8 + $0x178] sm:$0xff] }
 0x201   : > { %v1452_v56 = vmul.f32 1.442695, %v1284_v46  ;;  %v1232_v39 = vmax.f32 %v337_v62, %v338_v24  ;;  %v1290_v46 = vsub.f32 %v2967_v31, %v4172_v33  ;;  %v1291_v28 = vsub.f32 %v2968_v57, %v4172_v33  ;;  %v2635_v24 = vpop.eup %2634  ;;  %v339_v31 = vld [vmem:[%s3269_s8 + $0x3d0] sm:$0xff]  ;;  %v340_v47 = vld [vmem:[%s3269_s8 + $0x3d8] sm:$0xff] }
 0x202   : > { %1227 = vmax.xlane.f32.xlu0 %v1226_v58  ;;  %v1288_v58 = vsub.f32 %v2965_v48, %v4164_v26  ;;  %v1458_v37 = vmul.f32 1.442695, %v1287_v35  ;;  %v4224_v48 = vpop.xlane.xlu0 %1143  ;;  %v1462_v35 = vmul.f32 1.442695, %v1289_v36  ;;  %v2970_v26 = vld [vmem:[%s3269_s8 + $0x188] sm:$0xff]  ;;  %v4236_v36 = vpop.xlane.xlu1 %1146 }
 0x203   : > { %5628 = vst [vmem:[#allocation82_spill] sm:$0xff] %v4224_v48  ;;  %2644 = vpow2.f32 %v1452_v56  ;;  %v1293_v57 = vsub.f32 %v2970_v26, %v4176_v59  ;;  %v1235_v56 = vmax.f32 %v339_v31, %v340_v47  ;;  %v1466_v5 = vmul.f32 1.442695, %v1291_v28  ;;  %5629 = vst [vmem:[#allocation83_spill] sm:$0xff] %v4236_v36  ;;  %v2637_v33 = vpop.eup %2636  ;;  %v341_v47 = vld [vmem:[%s3269_s8 + $0x3e0] sm:$0xff] }
 0x204   : > { %1671 = vadd.xlane.f32.xlu1 %v1670_v15  ;;  %v1456_v15 = vmul.f32 1.442695, %v1286_v11  ;;  %v2969_v11 = vld [vmem:[%s3269_s8 + $0x180] sm:$0xff]  ;;  %2646 = vpow2.f32 %v1454_v23  ;;  %v1679_v26 = vadd.f32 %v2635_v24, %v2633_v12  ;;  %v2639_v31 = vpop.eup %2638 }
 0x205   : > { %v1292_v62 = vsub.f32 %v2969_v11, %v4176_v59  ;;  %v2972_v11 = vld [vmem:[%s3269_s8 + $0x198] sm:$0xff]  ;;  %v1470_v28 = vmul.f32 1.442695, %v1293_v57 }
 0x206   : > { %1230 = vmax.xlane.f32.xlu0 %v1229_v34  ;;  %v1460_v34 = vmul.f32 1.442695, %v1288_v58  ;;  %2648 = vpow2.f32 %v1456_v15  ;;  %v1294_v58 = vsub.f32 %v2971_v45, %v4184_v17  ;;  %v1295_v23 = vsub.f32 %v2972_v11, %v4184_v17  ;;  %v2974_v45 = vld [vmem:[%s3269_s8 + $0x1a8] sm:$0xff]  ;;  %v4244_v17 = vpop.xlane.xlu0 %1149  ;;  %v4256_v59 = vpop.xlane.xlu1 %1152 }
 0x207   : > { %2650 = vpow2.f32 %v1458_v37  ;;  %v1468_v15 = vmul.f32 1.442695, %v1292_v62  ;;  %v342_v37 = vld [vmem:[%s3269_s8 + $0x3e8] sm:$0xff]  ;;  %v1297_v11 = vsub.f32 %v2974_v45, %v4190_v8  ;;  %v1682_v45 = vadd.f32 %v2639_v31, %v2637_v33 }
 0x208   : > { %1674 = vadd.xlane.f32.xlu1 %v1673_v6  ;;  %v1464_v6 = vmul.f32 1.442695, %v1290_v46  ;;  %2652 = vpow2.f32 %v1460_v34  ;;  %v1472_v12 = vmul.f32 1.442695, %v1294_v58  ;;  %v2975_v34 = vld [vmem:[%s3269_s8 + $0x1b0] sm:$0xff] }
 0x209   : > { %2654 = vpow2.f32 %v1462_v35  ;;  %v1298_v62 = vsub.f32 %v2975_v34, %v4198_v4  ;;  %v1474_v24 = vmul.f32 1.442695, %v1295_v23  ;;  %v2976_v35 = vld [vmem:[%s3269_s8 + $0x1b8] sm:$0xff]  ;;  %v2978_v34 = vld [vmem:[%s3269_s8 + $0x1c8] sm:$0xff] }
 0x20a   : > { %1233 = vmax.xlane.f32.xlu0 %v1232_v39  ;;  %v2973_v39 = vld [vmem:[%s3269_s8 + $0x1a0] sm:$0xff]  ;;  %2656 = vpow2.f32 %v1464_v6  ;;  %v1299_v57 = vsub.f32 %v2976_v35, %v4198_v4  ;;  %v1301_v23 = vsub.f32 %v2978_v34, %v4206_v22  ;;  %v4262_v4 = vpop.xlane.xlu0 %1155 }
 0x20b   : > { %v1296_v46 = vsub.f32 %v2973_v39, %v4190_v8  ;;  %2658 = vpow2.f32 %v1466_v5  ;;  %v2641_v39 = vpop.eup %2640  ;;  %v2977_v6 = vld [vmem:[%s3269_s8 + $0x1c0] sm:$0xff]  ;;  %v1478_v5 = vmul.f32 1.442695, %v1297_v11  ;;  %v1480_v33 = vmul.f32 1.442695, %v1298_v62 }
 0x20c   : > { %1677 = vadd.xlane.f32.xlu1 %v1676_v25  ;;  %v1238_v25 = vmax.f32 %v341_v47, %v342_v37  ;;  %2660 = vpow2.f32 %v1468_v15  ;;  %v2643_v58 = vpop.eup %2642  ;;  %v343_v47 = vld [vmem:[%s3269_s8 + $0x3f0] sm:$0xff]  ;;  %v344_v37 = vld [vmem:[%s3269_s8 + $0x3f8] sm:$0xff]  ;;  %v2981_v62 = vld [vmem:[%s3269_s8 + $0x1e0] sm:$0xff] }
 0x20d   : > { %v1476_v8 = vmul.f32 1.442695, %v1296_v46  ;;  %2662 = vpow2.f32 %v1470_v28  ;;  %v2645_v35 = vpop.eup %2644  ;;  %v2979_v15 = vld [vmem:[%s3269_s8 + $0x1d0] sm:$0xff]  ;;  %v2980_v28 = vld [vmem:[%s3269_s8 + $0x1d8] sm:$0xff] }
 0x20e   : > { %1236 = vmax.xlane.f32.xlu0 %v1235_v56  ;;  %v1300_v56 = vsub.f32 %v2977_v6, %v4206_v22  ;;  %2664 = vpow2.f32 %v1472_v12  ;;  %v1302_v46 = vsub.f32 %v2979_v15, %v4218_v49  ;;  %v2647_v31 = vpop.eup %2646  ;;  %v1482_v6 = vmul.f32 1.442695, %v1299_v57 }
 0x20f   : > { %2666 = vpow2.f32 %v1474_v24  ;;  %v1303_v11 = vsub.f32 %v2980_v28, %v4218_v49  ;;  %v1685_v12 = vadd.f32 %v2643_v58, %v2641_v39  ;;  %v1486_v15 = vmul.f32 1.442695, %v1301_v23  ;;  %v2982_v24 = vld [vmem:[%s3269_s8 + $0x1e8] sm:$0xff]  ;;  %v2983_v49 = vld [vmem:[%s3269_s8 + $0x1f0] sm:$0xff]  ;;  %v2984_v58 = vld [vmem:[%s3269_s8 + $0x1f8] sm:$0xff]  ;;  %v4272_v23 = vpop.xlane.xlu1 %1158 }
 0x210   : > { %1680 = vadd.xlane.f32.xlu1 %v1679_v26  ;;  %v1241_v26 = vmax.f32 %v343_v47, %v344_v37  ;;  %v2649_v34 = vpop.eup %2648  ;;  %2668 = vpow2.f32 %v1476_v8  ;;  %v1304_v47 = vsub.f32 %v2981_v62, %v4224_v48  ;;  %v1305_v57 = vsub.f32 %v2982_v24, %v4224_v48  ;;  %v2985_v24 = vld [vmem:[%s3269_s8 + $0x200] sm:$0xff] }
 0x211   : > { %v2651_v37 = vpop.eup %2650  ;;  %2670 = vpow2.f32 %v1478_v5  ;;  %v1488_v28 = vmul.f32 1.442695, %v1302_v46  ;;  %v1306_v8 = vsub.f32 %v2983_v49, %v4236_v36  ;;  %v1307_v5 = vsub.f32 %v2984_v58, %v4236_v36 }
 0x212   : > { %1239 = vmax.xlane.f32.xlu0 %v1238_v25  ;;  %v1484_v25 = vmul.f32 1.442695, %v1300_v56  ;;  %v2653_v22 = vpop.eup %2652  ;;  %2672 = vpow2.f32 %v1480_v33  ;;  %v1490_v56 = vmul.f32 1.442695, %v1303_v11  ;;  %v1691_v33 = vadd.f32 %v2651_v37, %v2649_v34  ;;  %v4278_v11 = vpop.xlane.xlu0 %1161 }
 0x213   : > { %v2655_v39 = vpop.eup %2654  ;;  %2674 = vpow2.f32 %v1482_v6  ;;  %v1494_v49 = vmul.f32 1.442695, %v1305_v57  ;;  %v1496_v58 = vmul.f32 1.442695, %v1306_v8  ;;  %v1310_v34 = vsub.f32 %v3902_v14, %v4256_v59  ;;  %v4288_v8 = vpop.xlane.xlu1 %1164 }
 0x214   : > { %1683 = vadd.xlane.f32.xlu1 %v1682_v45  ;;  %v1688_v45 = vadd.f32 %v2647_v31, %v2645_v35  ;;  %v2657_v62 = vpop.eup %2656  ;;  %2676 = vpow2.f32 %v1484_v25  ;;  %v1308_v35 = vsub.f32 %v2985_v24, %v4244_v17  ;;  %v2986_v31 = vld [vmem:[%s3269_s8 + $0x208] sm:$0xff]  ;;  %v1694_v36 = vadd.f32 %v2655_v39, %v2653_v22  ;;  %5630 = vst [vmem:[#allocation84_spill] sm:$0xff] %v4288_v8 }
 0x215   : > { %v2659_v46 = vpop.eup %2658  ;;  %2678 = vpow2.f32 %v1486_v15  ;;  %v1309_v6 = vsub.f32 %v2986_v31, %v4244_v17  ;;  %v1498_v25 = vmul.f32 1.442695, %v1307_v5  ;;  %v1313_v14 = vsub.f32 %v3917_v42, %v4262_v4 }
 0x216   : > { %1242 = vmax.xlane.f32.xlu0 %v1241_v26  ;;  %v1492_v26 = vmul.f32 1.442695, %v1304_v47  ;;  %v2661_v48 = vpop.eup %2660  ;;  %2680 = vpow2.f32 %v1488_v28  ;;  %v1311_v47 = vsub.f32 %v3905_v9, %v4256_v59  ;;  %v1697_v15 = vadd.f32 %v2659_v46, %v2657_v62 }
 0x217   : > { %2682 = vpow2.f32 %v1490_v56  ;;  %v1500_v57 = vmul.f32 1.442695, %v1308_v35  ;;  %v1312_v28 = vsub.f32 %v3914_v21, %v4262_v4  ;;  %v1502_v22 = vmul.f32 1.442695, %v1309_v6 }
 0x218   : > { %1686 = vadd.xlane.f32.xlu1 %v1685_v12  ;;  %v2663_v12 = vpop.eup %2662  ;;  %2684 = vpow2.f32 %v1492_v26  ;;  %v1504_v9 = vmul.f32 1.442695, %v1310_v34  ;;  %v1314_v5 = vsub.f32 %v3922_v50, %v4272_v23  ;;  %v1315_v21 = vsub.f32 %v3925_v7, %v4272_v23  ;;  %v4294_v26 = vpop.xlane.xlu0 %1167 }
 0x219   : > { %v2665_v37 = vpop.eup %2664  ;;  %2686 = vpow2.f32 %v1494_v49  ;;  %v1700_v56 = vadd.f32 %v2663_v12, %v2661_v48  ;;  %5631 = vst [vmem:[#allocation85_spill] sm:$0xff] %v4294_v26  ;;  %v1508_v35 = vmul.f32 1.442695, %v1312_v28  ;;  %v1510_v46 = vmul.f32 1.442695, %v1313_v14  ;;  %v4304_v12 = vpop.xlane.xlu1 %1170 }
 0x21a   : > { %1689 = vadd.xlane.f32.xlu0 %v1688_v45  ;;  %v2667_v45 = vpop.eup %2666  ;;  %2688 = vpow2.f32 %v1496_v58  ;;  %v1317_v50 = vsub.f32 %v3935_v2, %v4278_v11  ;;  %v1512_v7 = vmul.f32 1.442695, %v1314_v5  ;;  %v1318_v6 = vsub.f32 %v3938_v3, %v4288_v8  ;;  %5632 = vst [vmem:[#allocation86_spill] sm:$0xff] %v4304_v12  ;;  %v4321_v5 = vld [vmem:[%s3269_s8 + $0x278] sm:$0xff] }
 0x21b   : > { %v2669_v39 = vpop.eup %2668  ;;  %2690 = vpow2.f32 %v1498_v25  ;;  %v1703_v42 = vadd.f32 %v2667_v45, %v2665_v37  ;;  %v1514_v34 = vmul.f32 1.442695, %v1315_v21  ;;  %v1320_v37 = vsub.f32 %v3952_v27, %v4294_v26 }
 0x21c   : > { %1692 = vadd.xlane.f32.xlu1 %v1691_v33  ;;  %v2671_v62 = vpop.eup %2670  ;;  %v1506_v33 = vmul.f32 1.442695, %v1311_v47  ;;  %2692 = vpow2.f32 %v1500_v57  ;;  %v1518_v3 = vmul.f32 1.442695, %v1317_v50  ;;  %v4309_v57 = vld [vmem:[%s3269_s8 + $0x268] sm:$0xff]  ;;  %v4313_v28 = vpop.xlane.xlu0 %1173 }
 0x21d   : > { %v2673_v24 = vpop.eup %2672  ;;  %2694 = vpow2.f32 %v1502_v22  ;;  %v1706_v31 = vadd.f32 %v2671_v62, %v2669_v39  ;;  %5633 = vst [vmem:[#allocation87_spill] sm:$0xff] %v4313_v28  ;;  %v1520_v22 = vmul.f32 1.442695, %v1318_v6  ;;  %v4316_v39 = vld [vmem:[%s3269_s8 + $0x270] sm:$0xff]  ;;  %v1323_v62 = vsub.f32 %v4321_v5, %v4304_v12 }
 0x21e   : > { %1695 = vadd.xlane.f32.xlu0 %v1694_v36  ;;  %v1316_v36 = vsub.f32 %v3932_v0, %v4278_v11  ;;  %v2675_v48 = vpop.eup %2674  ;;  %2696 = vpow2.f32 %v1504_v9  ;;  %v1319_v0 = vsub.f32 %v3941_v63, %v4288_v8  ;;  %v1321_v63 = vsub.f32 %v4309_v57, %v4294_v26  ;;  %v3002_v26 = vld [vmem:[%s3269_s8 + $0x210] sm:$0xff] }
 0x21f   : > { %v2677_v49 = vpop.eup %2676  ;;  %2698 = vpow2.f32 %v1506_v33  ;;  %v1709_v2 = vadd.f32 %v2675_v48, %v2673_v24  ;;  %v1322_v27 = vsub.f32 %v4316_v39, %v4304_v12  ;;  %v1524_v24 = vmul.f32 1.442695, %v1320_v37 }
 0x220   : > { %1698 = vadd.xlane.f32.xlu1 %v1697_v15  ;;  %v2679_v58 = vpop.eup %2678  ;;  %2700 = vpow2.f32 %v1508_v35  ;;  %v1516_v47 = vmul.f32 1.442695, %v1316_v36  ;;  %v1526_v48 = vmul.f32 1.442695, %v1321_v63  ;;  %v4343_v63 = vld [vmem:[%s3269_s8 + $0x298] sm:$0xff] }
 0x221   : > { %v2681_v25 = vpop.eup %2680  ;;  %2702 = vpow2.f32 %v1510_v46  ;;  %v1712_v14 = vadd.f32 %v2679_v58, %v2677_v49  ;;  %v4331_v46 = vld [vmem:[%s3269_s8 + $0x288] sm:$0xff]  ;;  %v4335_v49 = vpop.xlane.xlu1 %1176 }
 0x222   : > { %1701 = vadd.xlane.f32.xlu0 %v1700_v56  ;;  %v2683_v15 = vpop.eup %2682  ;;  %2704 = vpow2.f32 %v1512_v7  ;;  %v1522_v56 = vmul.f32 1.442695, %v1319_v0  ;;  %v1325_v50 = vsub.f32 %v4331_v46, %v4313_v28  ;;  %5634 = vst [vmem:[#allocation88_spill] sm:$0xff] %v4335_v49 }
 0x223   : > { %v2685_v45 = vpop.eup %2684  ;;  %2706 = vpow2.f32 %v1514_v34  ;;  %v1715_v21 = vadd.f32 %v2683_v15, %v2681_v25  ;;  %v1530_v34 = vmul.f32 1.442695, %v1323_v62 }
 0x224   : > { %1704 = vadd.xlane.f32.xlu1 %v1703_v42  ;;  %v2687_v9 = vpop.eup %2686  ;;  %2708 = vpow2.f32 %v1516_v47  ;;  %v4326_v42 = vld [vmem:[%s3269_s8 + $0x280] sm:$0xff]  ;;  %v4338_v47 = vld [vmem:[%s3269_s8 + $0x290] sm:$0xff] }
 0x225   : > { %v2689_v33 = vpop.eup %2688  ;;  %v1324_v35 = vsub.f32 %v4326_v42, %v4313_v28  ;;  %2710 = vpow2.f32 %v1518_v3  ;;  %v1718_v6 = vadd.f32 %v2687_v9, %v2685_v45  ;;  %v1326_v37 = vsub.f32 %v4338_v47, %v4335_v49 }
 0x226   : > { %1707 = vadd.xlane.f32.xlu0 %v1706_v31  ;;  %v2691_v36 = vpop.eup %2690  ;;  %2712 = vpow2.f32 %v1520_v22  ;;  %v1528_v31 = vmul.f32 1.442695, %v1322_v27  ;;  %v1534_v3 = vmul.f32 1.442695, %v1325_v50  ;;  %v1327_v45 = vsub.f32 %v4343_v63, %v4335_v49  ;;  %v4347_v22 = vpop.xlane.xlu0 %1179  ;;  %v4379_v49 = vld [vmem:[%s3269_s8 + $0x2c8] sm:$0xff] }
 0x227   : > { %v2693_v7 = vpop.eup %2692  ;;  %2714 = vpow2.f32 %v1522_v56  ;;  %v1721_v25 = vadd.f32 %v2691_v36, %v2689_v33  ;;  %5635 = vst [vmem:[#allocation89_spill] sm:$0xff] %v4347_v22  ;;  %v1536_v33 = vmul.f32 1.442695, %v1326_v37 }
 0x228   : > { %1710 = vadd.xlane.f32.xlu1 %v1709_v2  ;;  %v2695_v58 = vpop.eup %2694  ;;  %2716 = vpow2.f32 %v1524_v24  ;;  %v1532_v2 = vmul.f32 1.442695, %v1324_v35  ;;  %v1538_v36 = vmul.f32 1.442695, %v1327_v45  ;;  %v4367_v45 = vld [vmem:[%s3269_s8 + $0x2b8] sm:$0xff] }
 0x229   : > { %v2697_v0 = vpop.eup %2696  ;;  %2718 = vpow2.f32 %v1526_v48  ;;  %v1724_v27 = vadd.f32 %v2695_v58, %v2693_v7  ;;  %v4355_v48 = vld [vmem:[%s3269_s8 + $0x2a8] sm:$0xff]  ;;  %v4359_v7 = vpop.xlane.xlu1 %1182 }
 0x22a   : > { %1713 = vadd.xlane.f32.xlu0 %v1712_v14  ;;  %v2699_v15 = vpop.eup %2698  ;;  %2720 = vpow2.f32 %v1528_v31  ;;  %v1329_v50 = vsub.f32 %v4355_v48, %v4347_v22  ;;  %5636 = vst [vmem:[#allocation90_spill] sm:$0xff] %v4359_v7 }
 0x22b   : > { %v2701_v14 = vpop.eup %2700  ;;  %2722 = vpow2.f32 %v1530_v34  ;;  %v1727_v62 = vadd.f32 %v2699_v15, %v2697_v0 }
 0x22c   : > { %1716 = vadd.xlane.f32.xlu1 %v1715_v21  ;;  %v2703_v9 = vpop.eup %2702  ;;  %2724 = vpow2.f32 %v1532_v2  ;;  %v4350_v21 = vld [vmem:[%s3269_s8 + $0x2a0] sm:$0xff]  ;;  %v4362_v2 = vld [vmem:[%s3269_s8 + $0x2b0] sm:$0xff] }
 0x22d   : > { %v2705_v56 = vpop.eup %2704  ;;  %v1328_v24 = vsub.f32 %v4350_v21, %v4347_v22  ;;  %2726 = vpow2.f32 %v1534_v3  ;;  %v1330_v37 = vsub.f32 %v4362_v2, %v4359_v7  ;;  %v1542_v3 = vmul.f32 1.442695, %v1329_v50  ;;  %v4374_v22 = vld [vmem:[%s3269_s8 + $0x2c0] sm:$0xff] }
 0x22e   : > { %1719 = vadd.xlane.f32.xlu0 %v1718_v6  ;;  %v2707_v35 = vpop.eup %2706  ;;  %v1730_v6 = vadd.f32 %v2703_v9, %v2701_v14  ;;  %2728 = vpow2.f32 %v1536_v33  ;;  %v1331_v14 = vsub.f32 %v4367_v45, %v4359_v7 }
 0x22f   : > { %v2709_v31 = vpop.eup %2708  ;;  %v1733_v0 = vadd.f32 %v2707_v35, %v2705_v56  ;;  %2730 = vpow2.f32 %v1538_v36  ;;  %v1544_v35 = vmul.f32 1.442695, %v1330_v37  ;;  %v5640_v37 = vld [vmem:[#allocation8_spill] sm:$0xff] }
 0x230   : > { %1722 = vadd.xlane.f32.xlu1 %v1721_v25  ;;  %v2711_v58 = vpop.eup %2710  ;;  %v1540_v25 = vmul.f32 1.442695, %v1328_v24  ;;  %v1546_v7 = vmul.f32 1.442695, %v1331_v14  ;;  %v4390_v14 = vld [vmem:[%s3269_s8 + $0x2d0] sm:$0xff]  ;;  %vm674_vm6 = vcmp.eq.s32.totalorder %v5640_v37, %v3785_v61  ;;  %vm676_vm8 = vcmp.eq.s32.totalorder %v5640_v37, %v3787_v44 }
 0x231   : > { %v2713_v34 = vpop.eup %2712  ;;  %v1736_v56 = vadd.f32 %v2711_v58, %v2709_v31  ;;  %vm678_vm10 = vcmp.eq.s32.totalorder %v5640_v37, %v3793_v20  ;;  %vm682_vm12 = vcmp.eq.s32.totalorder %v5640_v37, %v3805_v38  ;;  %vm680_vm14 = vcmp.eq.s32.totalorder %v5640_v37, %v3797_v41  ;;  %v3010_v20 = vld [vmem:[%s3269_s8 + $0x250] sm:$0xff]  ;;  %v3012_v38 = vld [vmem:[%s3269_s8 + $0x260] sm:$0xff] }
 0x232   : > { %1725 = vadd.xlane.f32.xlu0 %v1724_v27  ;;  %v2715_v15 = vpop.eup %2714  ;;  %v4371_v27 = vpop.xlane.xlu0 %1185  ;;  %2732 = vpow2.f32 %v1540_v25  ;;  %v5639_v25 = vld [vmem:[#allocation24_spill] sm:$0xff]  ;;  %vm686_vm0 = vcmp.eq.s32.totalorder %v5640_v37, %v3813_v19  ;;  %v5643_v19 = vld [vmem:[#allocation30_spill] sm:$0xff] }
 0x233   : > { %5637 = vst [vmem:[#allocation91_spill] sm:$0xff] %v4371_v27  ;;  %v2717_v9 = vpop.eup %2716  ;;  %v1739_v24 = vadd.f32 %v2715_v15, %v2713_v34  ;;  %v1332_v36 = vsub.f32 %v4374_v22, %v4371_v27  ;;  %2734 = vpow2.f32 %v1542_v3  ;;  %v1333_v31 = vsub.f32 %v4379_v49, %v4371_v27 }
 0x234   : > { %1728 = vadd.xlane.f32.xlu1 %v1727_v62  ;;  %v2719_v62 = vpop.eup %2718  ;;  %vm670_vm2 = vcmp.eq.s32.totalorder %v5640_v37, %v5639_v25  ;;  %vm671_vm3 = vcmp.eq.s32.totalorder %v3359_v13, %v5639_v25  ;;  %2736 = vpow2.f32 %v1544_v35  ;;  %v3003_v35 = vld [vmem:[%s3269_s8 + $0x218] sm:$0xff]  ;;  %v3004_v25 = vld [vmem:[%s3269_s8 + $0x220] sm:$0xff] }
 0x235   : > { %v2721_v33 = vpop.eup %2720  ;;  %v1742_v34 = vadd.f32 %v2719_v62, %v2717_v9  ;;  %v1548_v3 = vmul.f32 1.442695, %v1332_v36  ;;  %2738 = vpow2.f32 %v1546_v7  ;;  %v1550_v9 = vmul.f32 1.442695, %v1333_v31  ;;  %v5641_v36 = vld [vmem:[#allocation27_spill] sm:$0xff] }
 0x236   : > { %1731 = vadd.xlane.f32.xlu0 %v1730_v6  ;;  %v2723_v50 = vpop.eup %2722  ;;  %v4383_v6 = vpop.xlane.xlu1 %1188  ;;  %v799_v7 = vsel %vm671_vm3, %v3003_v35, 0.0  ;;  %vm672_vm4 = vcmp.eq.s32.totalorder %v5640_v37, %v5641_v36  ;;  %vm673_vm5 = vcmp.eq.s32.totalorder %v3359_v13, %v5641_v36  ;;  %vm685_vm3 = vcmp.eq.s32.totalorder %v3359_v13, %v3807_v53 }
 0x237   : > { %5638 = vst [vmem:[#allocation92_spill] sm:$0xff] %v4383_v6  ;;  %v2725_v58 = vpop.eup %2724  ;;  %v1745_v15 = vadd.f32 %v2723_v50, %v2721_v33  ;;  %v1334_v27 = vsub.f32 %v4390_v14, %v4383_v6  ;;  %v798_v33 = vsel %vm670_vm2, %v3002_v26, 0.0  ;;  %2740 = vpow2.f32 %v1548_v3  ;;  %v3006_v3 = vld [vmem:[%s3269_s8 + $0x230] sm:$0xff] }
 0x238   : > { %1734 = vadd.xlane.f32.xlu1 %v1733_v0  ;;  %v2727_v0 = vpop.eup %2726  ;;  %2742 = vpow2.f32 %v1550_v9  ;;  %v959_v26 = vadd.f32 %v799_v7, %v798_v33  ;;  %v800_v35 = vsel %vm672_vm4, %v3004_v25, 0.0  ;;  %v802_v9 = vsel %vm674_vm6, %v3006_v3, 0.0  ;;  %v3011_v25 = vld [vmem:[%s3269_s8 + $0x258] sm:$0xff] }
 0x239   : > { %v2729_v28 = vpop.eup %2728  ;;  %v1748_v12 = vadd.f32 %v2727_v0, %v2725_v58  ;;  %v1552_v50 = vmul.f32 1.442695, %v1334_v27  ;;  %vm684_vm2 = vcmp.eq.s32.totalorder %v5640_v37, %v3807_v53  ;;  %vm688_vm6 = vcmp.eq.s32.totalorder %v5640_v37, %v5643_v19 }
 0x23a   : > { %1737 = vadd.xlane.f32.xlu0 %v1736_v56  ;;  %v4395_v56 = vld [vmem:[%s3269_s8 + $0x2d8] sm:$0xff]  ;;  %v812_v53 = vsel %vm684_vm2, %v4326_v42, 0.0 }
 0x23b   : > { %v1335_v62 = vsub.f32 %v4395_v56, %v4383_v6  ;;  %v3005_v6 = vld [vmem:[%s3269_s8 + $0x228] sm:$0xff]  ;;  %2744 = vpow2.f32 %v1552_v50 }
 0x23c   : > { %1740 = vadd.xlane.f32.xlu1 %v1739_v24  ;;  %v2731_v24 = vpop.eup %2730  ;;  %v801_v8 = vsel %vm673_vm5, %v3005_v6, 0.0  ;;  %v3009_v50 = vld [vmem:[%s3269_s8 + $0x248] sm:$0xff] }
 0x23d   : > { %v1554_v31 = vmul.f32 1.442695, %v1335_v62  ;;  %v2733_v58 = vpop.eup %2732  ;;  %v3007_v62 = vld [vmem:[%s3269_s8 + $0x238] sm:$0xff] }
 0x23e   : > { %1743 = vadd.xlane.f32.xlu0 %v1742_v34  ;;  %v1751_v34 = vadd.f32 %v2731_v24, %v2729_v28  ;;  %v2735_v0 = vpop.eup %2734  ;;  %v803_v6 = vsel %vm675_vm7, %v3007_v62, 0.0  ;;  %v5642_v62 = vld [vmem:[#allocation31_spill] sm:$0xff]  ;;  %vm689_vm7 = vcmp.eq.s32.totalorder %v3359_v13, %v5643_v19 }
 0x23f   : > { %2746 = vpow2.f32 %v1554_v31  ;;  %v2737_v27 = vpop.eup %2736  ;;  %v1754_v28 = vadd.f32 %v2735_v0, %v2733_v58  ;;  %v965_v24 = vadd.f32 %v803_v6, %v802_v9  ;;  %v805_v31 = vsel %vm677_vm9, %v3009_v50, 0.0  ;;  %v5645_v6 = vld [vmem:[#allocation32_spill] sm:$0xff] }
 0x240   : > { %1746 = vadd.xlane.f32.xlu1 %v1745_v15  ;;  %v2739_v15 = vpop.eup %2738  ;;  %v806_v0 = vsel %vm678_vm10, %v3010_v20, 0.0  ;;  %vm690_vm4 = vcmp.eq.s32.totalorder %v5640_v37, %v5642_v62  ;;  %vm691_vm5 = vcmp.eq.s32.totalorder %v3359_v13, %v5642_v62  ;;  %vm692_vm10 = vcmp.eq.s32.totalorder %v5640_v37, %v5645_v6  ;;  %v3016_v20 = vld [vmem:[%s3269_s8 + $0x2f8] sm:$0xff] }
 0x241   : > { %v2741_v61 = vpop.eup %2740  ;;  %v1757_v33 = vadd.f32 %v2739_v15, %v2737_v27  ;;  %v810_v27 = vsel %vm682_vm12, %v4316_v39, 0.0  ;;  %v809_v15 = vsel %vm681_vm15, %v4309_v57, 0.0  ;;  %v814_v39 = vsel %vm686_vm0, %v4338_v47, 0.0 }
 0x242   : > { %1749 = vadd.xlane.f32.xlu0 %v1748_v12  ;;  %v962_v12 = vadd.f32 %v801_v8, %v800_v35  ;;  %v2743_v7 = vpop.eup %2742  ;;  %v3008_v8 = vld [vmem:[%s3269_s8 + $0x240] sm:$0xff]  ;;  %v807_v35 = vsel %vm679_vm11, %v3011_v25, 0.0  ;;  %v813_v47 = vsel %vm685_vm3, %v4331_v46, 0.0  ;;  %vm693_vm11 = vcmp.eq.s32.totalorder %v3359_v13, %v5645_v6  ;;  %v5648_v25 = vld [vmem:[#allocation37_spill] sm:$0xff] }
 0x243   : > { %v804_v36 = vsel %vm676_vm8, %v3008_v8, 0.0  ;;  %v971_v41 = vadd.f32 %v807_v35, %v806_v0  ;;  %v818_v42 = vsel %vm690_vm4, %v4362_v2, 0.0  ;;  %v819_v46 = vsel %vm691_vm5, %v4367_v45, 0.0 }
 0x244   : > { %960 = vadd.xlane.f32.xlu1 %v959_v26  ;;  %v968_v58 = vadd.f32 %v805_v31, %v804_v36  ;;  %v1760_v26 = vadd.f32 %v2743_v7, %v2741_v61  ;;  %v5646_v61 = vld [vmem:[#allocation34_spill] sm:$0xff]  ;;  %v5647_v36 = vld [vmem:[#allocation35_spill] sm:$0xff]  ;;  %v820_v2 = vsel %vm692_vm10, %v4374_v22, 0.0  ;;  %v821_v45 = vsel %vm693_vm11, %v4379_v49, 0.0 }
 0x245   : > { %v2745_v44 = vpop.eup %2744  ;;  %vm696_vm12 = vcmp.eq.s32.totalorder %v5640_v37, %v5646_v61  ;;  %vm699_vm15 = vcmp.eq.s32.totalorder %v3359_v13, %v5647_v36  ;;  %vm702_vm0 = vcmp.eq.s32.totalorder %v5640_v37, %v5648_v25  ;;  %v4495_v22 = vadd.f32 %v819_v46, %v818_v42 }
 0x246   : > { %1752 = vadd.xlane.f32.xlu0 %v1751_v34  ;;  %v827_v0 = vsel %vm699_vm15, %v3016_v20, 0.0  ;;  %v4497_v35 = vadd.f32 %v821_v45, %v820_v2  ;;  %v4556_v2 = vld [vmem:[%s3269_s8 + $0x338] sm:$0xff] }
 0x248   : > { %963 = vadd.xlane.f32.xlu1 %v962_v12  ;;  %v811_v12 = vsel %vm683_vm13, %v4321_v5, 0.0  ;;  %v815_v5 = vsel %vm687_vm1, %v4343_v63, 0.0  ;;  %v5644_v63 = vld [vmem:[#allocation33_spill] sm:$0xff]  ;;  %vm697_vm13 = vcmp.eq.s32.totalorder %v3359_v13, %v5646_v61  ;;  %vm703_vm1 = vcmp.eq.s32.totalorder %v3359_v13, %v5648_v25 }
 0x249   : > { %v2747_v34 = vpop.eup %2746  ;;  %v977_v9 = vadd.f32 %v811_v12, %v810_v27  ;;  %vm694_vm8 = vcmp.eq.s32.totalorder %v5640_v37, %v5644_v63  ;;  %vm695_vm9 = vcmp.eq.s32.totalorder %v3359_v13, %v5644_v63  ;;  %v3019_v63 = vld [vmem:[%s3269_s8 + $0x300] sm:$0xff]  ;;  %v3020_v61 = vld [vmem:[%s3269_s8 + $0x308] sm:$0xff] }
 0x24a   : > { %1755 = vadd.xlane.f32.xlu0 %v1754_v28  ;;  %v808_v28 = vsel %vm680_vm14, %v3012_v38, 0.0  ;;  %v1763_v3 = vadd.f32 %v2747_v34, %v2745_v44  ;;  %v822_v7 = vsel %vm694_vm8, %v4390_v14, 0.0  ;;  %v823_v8 = vsel %vm695_vm9, %v4395_v56, 0.0  ;;  %v3015_v56 = vld [vmem:[%s3269_s8 + $0x2f0] sm:$0xff]  ;;  %v5649_v38 = vld [vmem:[#allocation36_spill] sm:$0xff] }
 0x24b   : > { %v974_v57 = vadd.f32 %v809_v15, %v808_v28  ;;  %vm698_vm14 = vcmp.eq.s32.totalorder %v5640_v37, %v5647_v36  ;;  %v983_v14 = vadd.f32 %v815_v5, %v814_v39  ;;  %v4499_v27 = vadd.f32 %v823_v8, %v822_v7  ;;  %v4510_v28 = vld [vmem:[%s3269_s8 + $0x310] sm:$0xff] }
 0x24c   : > { %966 = vadd.xlane.f32.xlu1 %v965_v24  ;;  %v816_v24 = vsel %vm688_vm6, %v4350_v21, 0.0  ;;  %v3013_v21 = vld [vmem:[%s3269_s8 + $0x2e0] sm:$0xff]  ;;  %v826_v34 = vsel %vm698_vm14, %v3015_v56, 0.0  ;;  %vm700_vm2 = vcmp.eq.s32.totalorder %v5640_v37, %v5649_v38  ;;  %vm701_vm3 = vcmp.eq.s32.totalorder %v3359_v13, %v5649_v38  ;;  %v4549_v8 = vld [vmem:[%s3269_s8 + $0x330] sm:$0xff] }
 0x24d   : > { %v824_v50 = vsel %vm696_vm12, %v3013_v21, 0.0  ;;  %v830_v15 = vsel %vm702_vm0, %v4510_v28, 0.0  ;;  %v828_v6 = vsel %vm700_vm2, %v3019_v63, 0.0  ;;  %v829_v42 = vsel %vm701_vm3, %v3020_v61, 0.0 }
 0x24e   : > { %1758 = vadd.xlane.f32.xlu0 %v1757_v33  ;;  %v817_v33 = vsel %vm689_vm7, %v4355_v48, 0.0  ;;  %v3014_v48 = vld [vmem:[%s3269_s8 + $0x2e8] sm:$0xff]  ;;  %v4580_v38 = vadd.f32 %v829_v42, %v828_v6  ;;  %v5653_v6 = vld [vmem:[#allocation11_spill] sm:$0xff] }
 0x24f   : > { %v825_v31 = vsel %vm697_vm13, %v3014_v48, 0.0  ;;  %vm710_vm8 = vcmp.eq.s32.totalorder %v5640_v37, %v5653_v6  ;;  %vm711_vm14 = vcmp.eq.s32.totalorder %v3359_v13, %v5653_v6 }
 0x250   : > { %969 = vadd.xlane.f32.xlu1 %v968_v58  ;;  %v980_v58 = vadd.f32 %v813_v47, %v812_v53  ;;  %v4501_v12 = vadd.f32 %v825_v31, %v824_v50  ;;  %v4530_v53 = vld [vmem:[%s3269_s8 + $0x318] sm:$0xff] }
 0x251   : > { %v831_v47 = vsel %vm703_vm1, %v4530_v53, 0.0 }
 0x252   : > { %1761 = vadd.xlane.f32.xlu0 %v1760_v26  ;;  %v4489_v26 = vadd.f32 %v817_v33, %v816_v24  ;;  %v4546_v24 = vstv %s2512_s19 }
 0x254   : > { %972 = vadd.xlane.f32.xlu1 %v971_v41  ;;  %v5650_v41 = vld [vmem:[#allocation10_spill] sm:$0xff] }
 0x255   : > { %vm706_vm4 = vcmp.eq.s32.totalorder %v5640_v37, %v5650_v41  ;;  %vm707_vm5 = vcmp.eq.s32.totalorder %v3359_v13, %v5650_v41  ;;  %v4582_v41 = vadd.f32 %v831_v47, %v830_v15 }
 0x256   : > { %1764 = vadd.xlane.f32.xlu0 %v1763_v3  ;;  %v5651_v3 = vlaneseq  ;;  %v834_v36 = vsel %vm706_vm4, %v4549_v8, 0.0  ;;  %v835_v45 = vsel %vm707_vm5, %v4556_v2, 0.0 }
 0x258   : > { %975 = vadd.xlane.f32.xlu1 %v974_v57  ;;  %v4517_v39 = vshrl.u32 %v5651_v3, 7  ;;  %v4521_v57 = vadd.f32 %v827_v0, %v826_v34 }
 0x25a   : > { %v2143_v25 = vadd.s32 %v4546_v24, %v4517_v39 }
 0x25b   : > { %v1630_v44 = vpop.xlane.xlu0 %1629 }
 0x25c   : > { %978 = vadd.xlane.f32.xlu1 %v977_v9  ;;  %2748 = vlog2.f32 %v1630_v44  ;;  %v5652_v9 = vld [vmem:[#allocation9_spill] sm:$0xff]  ;;  %vm2207_vm9 = vcmp.lt.s32.totalorder %v2143_v25, 1000 }
 0x25d   : > { %v1633_v49 = vpop.xlane.xlu1 %1632  ;;  %vm704_vm6 = vcmp.eq.s32.totalorder %v5640_v37, %v5652_v9  ;;  %vm705_vm7 = vcmp.eq.s32.totalorder %v3359_v13, %v5652_v9  ;;  %v4573_v44 = vld [vmem:[%s3269_s8 + $0x328] sm:$0xff]  ;;  %v2080_v9 = vadd.s32 16, %v4517_v39 }
 0x25e   : > { %2750 = vlog2.f32 %v1633_v49 }
 0x25f   : > { %v4519_v5 = vpop.xlane.xlu0 %1191 }
 0x260   : > { %981 = vadd.xlane.f32.xlu1 %v980_v58  ;;  %v1336_v62 = vsub.f32 %v3013_v21, %v4519_v5  ;;  %v1337_v19 = vsub.f32 %v3014_v48, %v4519_v5  ;;  %v4563_v21 = vld [vmem:[%s3269_s8 + $0x320] sm:$0xff]  ;;  %v2079_v48 = vadd.s32 8, %v4517_v39  ;;  %v833_v58 = vsel %vm705_vm7, %v4573_v44, 0.0 }
 0x261   : > { %v1636_v46 = vpop.xlane.xlu1 %1635  ;;  %v832_v50 = vsel %vm704_vm6, %v4563_v21, 0.0 }
 0x262   : > { %v1556_v33 = vmul.f32 1.442695, %v1336_v62  ;;  %v1558_v7 = vmul.f32 1.442695, %v1337_v19  ;;  %2752 = vlog2.f32 %v1636_v46 }
 0x263   : > { %v4570_v31 = vpop.xlane.xlu0 %1194 }
 0x264   : > { %2754 = vpow2.f32 %v1556_v33  ;;  %984 = vadd.xlane.f32.xlu1 %v983_v14  ;;  %v1338_v34 = vsub.f32 %v3015_v56, %v4570_v31  ;;  %v1339_v0 = vsub.f32 %v3016_v20, %v4570_v31  ;;  %v2144_v56 = vadd.s32 %v4546_v24, %v2079_v48 }
 0x265   : > { %2756 = vpow2.f32 %v1558_v7  ;;  %v1639_v49 = vpop.xlane.xlu1 %1638  ;;  %v4588_v20 = vadd.f32 %v833_v58, %v832_v50  ;;  %v4590_v33 = vadd.f32 %v835_v45, %v834_v36  ;;  %v2145_v36 = vadd.s32 %v4546_v24, %v2080_v9 }
 0x266   : > { %v2749_v3 = vpop.eup %2748  ;;  %v1560_v62 = vmul.f32 1.442695, %v1338_v34  ;;  %v1562_v19 = vmul.f32 1.442695, %v1339_v0  ;;  %2758 = vlog2.f32 %v1639_v49  ;;  %v5654_v34 = vld [vmem:[#allocation21_spill] sm:$0xff]  ;;  %vm2208_vm10 = vcmp.lt.s32.totalorder %v2144_v56, 1000 }
 0x267   : > { %v1821_v14 = vmul.f32 0.6931472, %v2749_v3  ;;  %v4586_v46 = vpop.xlane.xlu0 %1197  ;;  %vm2209_vm11 = vcmp.lt.s32.totalorder %v2145_v36, 1000  ;;  %v5656_v56 = vld [vmem:[#allocation26_spill] sm:$0xff] }
 0x268   : > { %v2751_v7 = vpop.eup %2750  ;;  %2760 = vpow2.f32 %v1560_v62  ;;  %987 = vadd.xlane.f32.xlu1 %v4489_v26  ;;  %v1340_v15 = vsub.f32 %v3019_v63, %v4586_v46  ;;  %v1341_v47 = vsub.f32 %v3020_v61, %v4586_v46  ;;  %v2081_v63 = vadd.s32 24, %v4517_v39  ;;  %v4611_v62 = vld [vmem:[%s3269_s8 + $0x350] sm:$0xff] }
 0x269   : > { %v1948_v42 = vadd.f32 %v1821_v14, %v4038_v54  ;;  %v1823_v48 = vmul.f32 0.6931472, %v2751_v7  ;;  %2762 = vpow2.f32 %v1562_v19  ;;  %v1642_v50 = vpop.xlane.xlu1 %1641  ;;  %v2082_v54 = vadd.s32 32, %v4517_v39  ;;  %v5655_v19 = vld [vmem:[#allocation25_spill] sm:$0xff] }
 0x26a   : > { %v1564_v45 = vmul.f32 1.442695, %v1340_v15  ;;  %v1566_v58 = vmul.f32 1.442695, %v1341_v47  ;;  %2764 = vlog2.f32 %v1642_v50 }
 0x26b   : > { %v2012_v0 = vsub.f32 %v1948_v42, %v5654_v34  ;;  %v1949_v26 = vadd.f32 %v1823_v48, %v4044_v18  ;;  %v4602_v61 = vpop.xlane.xlu0 %1200  ;;  %v4617_v18 = vsel %vm710_vm8, %v4611_v62, 0.0 }
 0x26c   : > { %v2753_v49 = vpop.eup %2752  ;;  %2766 = vpow2.f32 %v1564_v45  ;;  %990 = vadd.xlane.f32.xlu1 %v4495_v22  ;;  %v1342_v3 = vsub.f32 %v4510_v28, %v4602_v61  ;;  %v1343_v9 = vsub.f32 %v4530_v53, %v4602_v61  ;;  %v2146_v45 = vadd.s32 %v4546_v24, %v2081_v63 }
 0x26d   : > { %v2013_v14 = vsub.f32 %v1949_v26, %v5655_v19  ;;  %v1825_v7 = vmul.f32 0.6931472, %v2753_v49  ;;  %2768 = vpow2.f32 %v1566_v58  ;;  %v1645_v15 = vpop.xlane.xlu1 %1644  ;;  %v2271_v53 = vsel %vm2207_vm9, %v2012_v0, 0.0 }
 0x26e   : > { %v2755_v22 = vpop.eup %2754  ;;  %v1568_v47 = vmul.f32 1.442695, %v1342_v3  ;;  %v1570_v28 = vmul.f32 1.442695, %v1343_v9  ;;  %2770 = vlog2.f32 %v1645_v15  ;;  %v4627_v58 = vadd.s32 %v4546_v24, %v2082_v54 }
 0x26f   : > { %v2757_v42 = vpop.eup %2756  ;;  %v2272_v48 = vsel %vm2208_vm10, %v2013_v14, 0.0  ;;  %v1950_v50 = vadd.f32 %v1825_v7, %v4050_v52  ;;  %v4624_v34 = vpop.xlane.xlu0 %1203  ;;  %vm2210_vm12 = vcmp.lt.s32.totalorder %v2146_v45, 1000  ;;  %v2083_v15 = vadd.s32 40, %v4517_v39 }
 0x270   : > { %v2759_v26 = vpop.eup %2758  ;;  %2772 = vpow2.f32 %v1568_v47  ;;  %993 = vadd.xlane.f32.xlu1 %v4497_v35  ;;  %v1344_v49 = vsub.f32 %v4563_v21, %v4624_v34  ;;  %v1345_v25 = vsub.f32 %v4573_v44, %v4624_v34  ;;  %v1766_v3 = vadd.f32 %v2757_v42, %v2755_v22 }
 0x271   : > { %v2014_v0 = vsub.f32 %v1950_v50, %v5656_v56  ;;  %v1827_v52 = vmul.f32 0.6931472, %v2759_v26  ;;  %2774 = vpow2.f32 %v1570_v28  ;;  %v1648_v63 = vpop.xlane.xlu1 %1647  ;;  %v2335_v19 = vadd.f32 %v2272_v48, %v2271_v53 }
 0x272   : > { %v2761_v9 = vpop.eup %2760  ;;  %v1572_v14 = vmul.f32 1.442695, %v1344_v49  ;;  %v1574_v54 = vmul.f32 1.442695, %v1345_v25  ;;  %2776 = vlog2.f32 %v1648_v63  ;;  %1767 = vadd.xlane.f32.xlu0 %v1766_v3  ;;  %vm2211_vm13 = vcmp.lt.s32.totalorder %v4627_v58, 1000  ;;  %v4655_v63 = vld [vmem:[%s3269_s8 + $0x340] sm:$0xff] }
 0x273   : > { %v2763_v7 = vpop.eup %2762  ;;  %v2273_v35 = vsel %vm2209_vm11, %v2014_v0, 0.0  ;;  %v1951_v21 = vadd.f32 %v1827_v52, %v4056_v55  ;;  %v4638_v44 = vpop.xlane.xlu0 %1206  ;;  %v4660_v3 = vld [vmem:[%s3269_s8 + $0x348] sm:$0xff] }
 0x274   : > { %v2765_v47 = vpop.eup %2764  ;;  %v2336_v28 = vadd.f32 %v2335_v19, %v2273_v35  ;;  %2778 = vpow2.f32 %v1572_v14  ;;  %996 = vadd.xlane.f32.xlu1 %v4499_v27  ;;  %v1346_v22 = vsub.f32 %v4549_v8, %v4638_v44  ;;  %v1347_v36 = vsub.f32 %v4556_v2, %v4638_v44 }
 0x275   : > { %v2015_v42 = vsub.f32 %v1951_v21, %v3974_v10  ;;  %v1829_v53 = vmul.f32 0.6931472, %v2765_v47  ;;  %2780 = vpow2.f32 %v1574_v54  ;;  %v1651_v55 = vpop.xlane.xlu1 %1650  ;;  %v1769_v48 = vadd.f32 %v2763_v7, %v2761_v9 }
 0x276   : > { %v2767_v50 = vpop.eup %2766  ;;  %v1576_v26 = vmul.f32 1.442695, %v1346_v22  ;;  %v1578_v49 = vmul.f32 1.442695, %v1347_v36  ;;  %2782 = vlog2.f32 %v1651_v55  ;;  %v2148_v2 = vadd.s32 %v4546_v24, %v2083_v15  ;;  %v3028_v55 = vld [vmem:[%s3269_s8 + $0x358] sm:$0xff] }
 0x277   : > { %v2769_v27 = vpop.eup %2768  ;;  %v2274_v8 = vsel %vm2210_vm12, %v2015_v42, 0.0  ;;  %v1952_v25 = vadd.f32 %v1829_v53, %v4062_v30  ;;  %v2084_v10 = vadd.s32 48, %v4517_v39  ;;  %1770 = vadd.xlane.f32.xlu0 %v1769_v48  ;;  %v4651_v56 = vpop.xlane.xlu0 %1209  ;;  %v2085_v35 = vadd.s32 56, %v4517_v39 }
 0x278   : > { %v2771_v0 = vpop.eup %2770  ;;  %v2337_v52 = vadd.f32 %v2336_v28, %v2274_v8  ;;  %2784 = vpow2.f32 %v1576_v26  ;;  %999 = vadd.xlane.f32.xlu1 %v4501_v12  ;;  %v1348_v45 = vsub.f32 %v4655_v63, %v4651_v56  ;;  %v1349_v30 = vsub.f32 %v4660_v3, %v4651_v56 }
 0x279   : > { %v2016_v9 = vsub.f32 %v1952_v25, %v3976_v43  ;;  %v1831_v19 = vmul.f32 0.6931472, %v2771_v0  ;;  %2786 = vpow2.f32 %v1578_v49  ;;  %v1654_v14 = vpop.xlane.xlu1 %1653  ;;  %v1772_v54 = vadd.f32 %v2769_v27, %v2767_v50 }
 0x27a   : > { %v2773_v7 = vpop.eup %2772  ;;  %v1580_v12 = vmul.f32 1.442695, %v1348_v45  ;;  %v1582_v21 = vmul.f32 1.442695, %v1349_v30  ;;  %2788 = vlog2.f32 %v1654_v14  ;;  %vm2212_vm15 = vcmp.lt.s32.totalorder %v2148_v2, 1000  ;;  %v4697_v2 = vld [vmem:[%s3269_s8 + $0x368] sm:$0xff] }
 0x27b   : > { %v2775_v15 = vpop.eup %2774  ;;  %v2275_v47 = vsel %vm2211_vm13, %v2016_v9, 0.0  ;;  %v1953_v43 = vadd.f32 %v1831_v19, %v4068_v51  ;;  %v2149_v28 = vadd.s32 %v4546_v24, %v2084_v10  ;;  %1773 = vadd.xlane.f32.xlu0 %v1772_v54  ;;  %v4672_v22 = vpop.xlane.xlu0 %1212  ;;  %v2150_v27 = vadd.s32 %v4546_v24, %v2085_v35  ;;  %v5657_v10 = vld [vmem:[#allocation12_spill] sm:$0xff] }
 0x27c   : > { %v2777_v36 = vpop.eup %2776  ;;  %v2338_v42 = vadd.f32 %v2337_v52, %v2275_v47  ;;  %2790 = vpow2.f32 %v1580_v12  ;;  %1002 = vadd.xlane.f32.xlu1 %v4521_v57  ;;  %v1350_v53 = vsub.f32 %v4611_v62, %v4672_v22  ;;  %v1351_v58 = vsub.f32 %v3028_v55, %v4672_v22  ;;  %v4692_v9 = vld [vmem:[%s3269_s8 + $0x360] sm:$0xff] }
 0x27d   : > { %v2017_v48 = vsub.f32 %v1953_v43, %v3982_v60  ;;  %v1833_v50 = vmul.f32 0.6931472, %v2777_v36  ;;  %2792 = vpow2.f32 %v1582_v21  ;;  %v1657_v51 = vpop.xlane.xlu1 %1656  ;;  %v1775_v26 = vadd.f32 %v2775_v15, %v2773_v7 }
 0x27e   : > { %v2779_v49 = vpop.eup %2778  ;;  %v1584_v8 = vmul.f32 1.442695, %v1350_v53  ;;  %v1586_v25 = vmul.f32 1.442695, %v1351_v58  ;;  %2794 = vlog2.f32 %v1657_v51  ;;  %vm708_vm0 = vcmp.eq.s32.totalorder %v5640_v37, %v5657_v10  ;;  %v5660_v51 = vld [vmem:[#allocation29_spill] sm:$0xff] }
 0x27f   : > { %v2781_v57 = vpop.eup %2780  ;;  %vm709_vm1 = vcmp.eq.s32.totalorder %v3359_v13, %v5657_v10  ;;  %v2276_v60 = vsel %vm2212_vm15, %v2017_v48, 0.0  ;;  %vm2213_vm2 = vcmp.lt.s32.totalorder %v2149_v28, 1000  ;;  %v1954_v62 = vadd.f32 %v1833_v50, %v4074_v16  ;;  %1776 = vadd.xlane.f32.xlu0 %v1775_v26  ;;  %v4688_v52 = vpop.xlane.xlu0 %1215  ;;  %v4710_v48 = vld [vmem:[%s3269_s8 + $0x370] sm:$0xff]  ;;  %v4715_v50 = vld [vmem:[%s3269_s8 + $0x378] sm:$0xff] }
 0x280   : > { %v2086_v0 = vadd.s32 64, %v4517_v39  ;;  %5658 = vst [vmem:[#allocation24_spill] sm:$0xff] %v4688_v52  ;;  %v2783_v45 = vpop.eup %2782  ;;  %v2339_v30 = vadd.f32 %v2338_v42, %v2276_v60  ;;  %2796 = vpow2.f32 %v1584_v8  ;;  %1005 = vadd.xlane.f32.xlu1 %v4580_v38  ;;  %v1352_v19 = vsub.f32 %v4692_v9, %v4688_v52 }
 0x281   : > { %v1353_v16 = vsub.f32 %v4697_v2, %v4688_v52  ;;  %v2018_v14 = vsub.f32 %v1954_v62, %v3984_v29  ;;  %v1835_v54 = vmul.f32 0.6931472, %v2783_v45  ;;  %2798 = vpow2.f32 %v1586_v25  ;;  %v1660_v7 = vpop.xlane.xlu1 %1659 }
 0x282   : > { %v1778_v35 = vadd.f32 %v2781_v57, %v2779_v49  ;;  %v2785_v12 = vpop.eup %2784  ;;  %vm2214_vm3 = vcmp.lt.s32.totalorder %v2150_v27, 1000  ;;  %v1588_v38 = vmul.f32 1.442695, %v1352_v19  ;;  %2800 = vlog2.f32 %v1660_v7  ;;  %v4740_v27 = vld [vmem:[%s3269_s8 + $0x388] sm:$0xff] }
 0x283   : > { %v1590_v21 = vmul.f32 1.442695, %v1353_v16  ;;  %v2787_v15 = vpop.eup %2786  ;;  %v2277_v47 = vsel %vm2213_vm2, %v2018_v14, 0.0  ;;  %v1955_v43 = vadd.f32 %v1835_v54, %v4080_v1  ;;  %v2151_v36 = vadd.s32 %v4546_v24, %v2086_v0  ;;  %v4706_v42 = vpop.xlane.xlu0 %1218 }
 0x284   : > { %v2087_v29 = vadd.s32 72, %v4517_v39  ;;  %1779 = vadd.xlane.f32.xlu0 %v1778_v35  ;;  %5659 = vst [vmem:[#allocation8_spill] sm:$0xff] %v4706_v42  ;;  %v2789_v53 = vpop.eup %2788  ;;  %v2340_v58 = vadd.f32 %v2339_v30, %v2277_v47  ;;  %2802 = vpow2.f32 %v1588_v38  ;;  %1008 = vadd.xlane.f32.xlu1 %v4582_v41  ;;  %v1354_v28 = vsub.f32 %v4710_v48, %v4706_v42  ;;  %v5662_v35 = vld [vmem:[#allocation28_spill] sm:$0xff] }
 0x285   : > { %v1355_v1 = vsub.f32 %v4715_v50, %v4706_v42  ;;  %v2019_v26 = vsub.f32 %v1955_v43, %v5660_v51  ;;  %v1837_v49 = vmul.f32 0.6931472, %v2789_v53  ;;  %2804 = vpow2.f32 %v1590_v21  ;;  %v4720_v8 = vpop.xlane.xlu1 %1662 }
 0x286   : > { %v1781_v25 = vadd.f32 %v2787_v15, %v2785_v12  ;;  %v2791_v57 = vpop.eup %2790  ;;  %v4725_v41 = vsel %vm711_vm14, %v3028_v55, 0.0  ;;  %v2088_v60 = vadd.s32 80, %v4517_v39  ;;  %v1592_v62 = vmul.f32 1.442695, %v1354_v28  ;;  %v4735_v55 = vld [vmem:[%s3269_s8 + $0x380] sm:$0xff] }
 0x287   : > { %v1594_v0 = vmul.f32 1.442695, %v1355_v1  ;;  %v2793_v45 = vpop.eup %2792  ;;  %v2278_v30 = vsel %vm2214_vm3, %v2019_v26, 0.0  ;;  %vm2215_vm4 = vcmp.lt.s32.totalorder %v2151_v36, 1000  ;;  %v1956_v19 = vadd.f32 %v1837_v49, %v4088_v40  ;;  %v4731_v14 = vpop.xlane.xlu0 %1221  ;;  %v5663_v1 = vld [vmem:[#allocation62_spill] sm:$0xff] }
 0x288   : > { %v2152_v16 = vadd.s32 %v4546_v24, %v2087_v29  ;;  %1782 = vadd.xlane.f32.xlu0 %v1781_v25  ;;  %5661 = vst [vmem:[#allocation27_spill] sm:$0xff] %v4731_v14  ;;  %v2795_v6 = vpop.eup %2794  ;;  %v2341_v54 = vadd.f32 %v2340_v58, %v2278_v30  ;;  %2806 = vpow2.f32 %v1592_v62  ;;  %1011 = vadd.xlane.f32.xlu1 %v4588_v20  ;;  %v836_v20 = vsel %vm708_vm0, %v4655_v63, 0.0  ;;  %v4767_v36 = vld [vmem:[%s3269_s8 + $0x398] sm:$0xff] }
 0x289   : > { %v1356_v7 = vsub.f32 %v4735_v55, %v4731_v14  ;;  %v1357_v40 = vsub.f32 %v4740_v27, %v4731_v14  ;;  %v2020_v12 = vsub.f32 %v1956_v19, %v5662_v35  ;;  %v1839_v38 = vmul.f32 0.6931472, %v2795_v6  ;;  %v4745_v21 = vpop.xlane.xlu1 %1665  ;;  %v5665_v62 = vld [vmem:[#allocation38_spill] sm:$0xff] }
 0x28a   : > { %2808 = vpow2.f32 %v1594_v0  ;;  %v1784_v15 = vadd.f32 %v2793_v45, %v2791_v57  ;;  %v2797_v47 = vpop.eup %2796  ;;  %v837_v43 = vsel %vm709_vm1, %v4660_v3, 0.0  ;;  %vm2216_vm5 = vcmp.lt.s32.totalorder %v2152_v16, 1000  ;;  %v4762_v3 = vld [vmem:[%s3269_s8 + $0x390] sm:$0xff] }
 0x28b   : > { %v1596_v29 = vmul.f32 1.442695, %v1356_v7  ;;  %v1598_v53 = vmul.f32 1.442695, %v1357_v40  ;;  %v2799_v58 = vpop.eup %2798  ;;  %v2279_v28 = vsel %vm2215_vm4, %v2020_v12, 0.0  ;;  %v1957_v51 = vadd.f32 %v1839_v38, %v5663_v1  ;;  %v4758_v49 = vpop.xlane.xlu0 %1224  ;;  %v5667_v12 = vld [vmem:[#allocation63_spill] sm:$0xff] }
 0x28c   : > { %v2153_v26 = vadd.s32 %v4546_v24, %v2088_v60  ;;  %1785 = vadd.xlane.f32.xlu0 %v1784_v15  ;;  %5664 = vst [vmem:[#allocation31_spill] sm:$0xff] %v4758_v49  ;;  %v2801_v63 = vpop.eup %2800  ;;  %v2342_v25 = vadd.f32 %v2341_v54, %v2279_v28  ;;  %1014 = vadd.xlane.f32.xlu1 %v4590_v33  ;;  %v5666_v33 = vld [vmem:[#allocation13_spill] sm:$0xff] }
 0x28d   : > { %2810 = vpow2.f32 %v1596_v29  ;;  %v1358_v10 = vsub.f32 %v4762_v3, %v4758_v49  ;;  %v1359_v57 = vsub.f32 %v4767_v36, %v4758_v49  ;;  %v2021_v60 = vsub.f32 %v1957_v51, %v5665_v62  ;;  %v4772_v45 = vpop.xlane.xlu1 %1668  ;;  %v4783_v29 = vld [vmem:[%s3269_s8 + $0x3a0] sm:$0xff] }
 0x28e   : > { %v1841_v0 = vmul.f32 0.6931472, %v2801_v63  ;;  %2812 = vpow2.f32 %v1598_v53  ;;  %v1787_v30 = vadd.f32 %v2799_v58, %v2797_v47  ;;  %v2803_v19 = vpop.eup %2802  ;;  %vm712_vm6 = vcmp.eq.s32.totalorder %v5640_v37, %v5666_v33  ;;  %v5669_v53 = vld [vmem:[#allocation39_spill] sm:$0xff] }
 0x28f   : > { %v1600_v6 = vmul.f32 1.442695, %v1358_v10  ;;  %v1602_v54 = vmul.f32 1.442695, %v1359_v57  ;;  %v1016_v7 = vadd.f32 %v837_v43, %v836_v20  ;;  %v2805_v40 = vpop.eup %2804  ;;  %vm713_vm7 = vcmp.eq.s32.totalorder %v3359_v13, %v5666_v33  ;;  %v4780_v15 = vpop.xlane.xlu0 %1227  ;;  %v4788_v43 = vld [vmem:[%s3269_s8 + $0x3a8] sm:$0xff]  ;;  %v5670_v63 = vld [vmem:[#allocation15_spill] sm:$0xff] }
 0x290   : > { %v2280_v35 = vsel %vm2216_vm5, %v2021_v60, 0.0  ;;  %vm2217_vm8 = vcmp.lt.s32.totalorder %v2153_v26, 1000  ;;  %v1958_v38 = vadd.f32 %v1841_v0, %v5667_v12  ;;  %1788 = vadd.xlane.f32.xlu0 %v1787_v30  ;;  %5668 = vst [vmem:[#allocation30_spill] sm:$0xff] %v4780_v15  ;;  %v1360_v20 = vsub.f32 %v4783_v29, %v4780_v15 }
 0x291   : > { %v2343_v47 = vadd.f32 %v2342_v25, %v2280_v35  ;;  %2814 = vpow2.f32 %v1600_v6  ;;  %1017 = vadd.xlane.f32.xlu1 %v1016_v7  ;;  %v1361_v16 = vsub.f32 %v4788_v43, %v4780_v15  ;;  %v4793_v28 = vpop.xlane.xlu1 %1671  ;;  %v1790_v1 = vadd.f32 %v2805_v40, %v2803_v19  ;;  %v5695_v15 = vld [vmem:[#allocation70_spill] sm:$0xff] }
 0x292   : > { %v2022_v58 = vsub.f32 %v1958_v38, %v5669_v53  ;;  %2816 = vpow2.f32 %v1602_v54  ;;  %v2807_v51 = vpop.eup %2806  ;;  %vm714_vm9 = vcmp.eq.s32.totalorder %v5640_v37, %v5670_v63  ;;  %v1604_v25 = vmul.f32 1.442695, %v1360_v20  ;;  %v5672_v20 = vld [vmem:[#allocation14_spill] sm:$0xff]  ;;  %v3041_v53 = vld [vmem:[%s3269_s8 + $0x3c0] sm:$0xff] }
 0x293   : > { %v1606_v10 = vmul.f32 1.442695, %v1361_v16  ;;  %v1019_v57 = vadd.f32 %v4725_v41, %v4617_v18  ;;  %vm715_vm10 = vcmp.eq.s32.totalorder %v3359_v13, %v5670_v63  ;;  %v840_v60 = vsel %vm712_vm6, %v4692_v9, 0.0  ;;  %v4810_v19 = vpop.xlane.xlu0 %1230  ;;  %v4815_v41 = vld [vmem:[%s3269_s8 + $0x3b0] sm:$0xff]  ;;  %v4820_v9 = vld [vmem:[%s3269_s8 + $0x3b8] sm:$0xff] }
 0x294   : > { %v2809_v62 = vpop.eup %2808  ;;  %v841_v0 = vsel %vm713_vm7, %v4697_v2, 0.0  ;;  %v2281_v30 = vsel %vm2217_vm8, %v2022_v58, 0.0  ;;  %1791 = vadd.xlane.f32.xlu0 %v1790_v1  ;;  %5671 = vst [vmem:[#allocation33_spill] sm:$0xff] %v4810_v19  ;;  %2818 = vpow2.f32 %v1604_v25  ;;  %v1362_v6 = vsub.f32 %v4815_v41, %v4810_v19 }
 0x295   : > { %v4812_v18 = vadd.f32 %v2343_v47, %v2281_v30  ;;  %1020 = vadd.xlane.f32.xlu1 %v1019_v57  ;;  %v1363_v33 = vsub.f32 %v4820_v9, %v4810_v19  ;;  %2820 = vpow2.f32 %v1606_v10  ;;  %v4824_v2 = vpop.xlane.xlu1 %1674  ;;  %v1793_v26 = vadd.f32 %v2809_v62, %v2807_v51  ;;  %v5674_v30 = vld [vmem:[#allocation16_spill] sm:$0xff] }
 0x296   : > { %v1608_v7 = vmul.f32 1.442695, %v1362_v6  ;;  %v1022_v35 = vadd.f32 %v841_v0, %v840_v60  ;;  %v842_v38 = vsel %vm714_vm9, %v4710_v48, 0.0  ;;  %v843_v47 = vsel %vm715_vm10, %v4715_v50, 0.0  ;;  %v3042_v48 = vld [vmem:[%s3269_s8 + $0x3c8] sm:$0xff] }
 0x297   : > { %v2811_v54 = vpop.eup %2810  ;;  %v1610_v40 = vmul.f32 1.442695, %v1363_v33  ;;  %vm716_vm11 = vcmp.eq.s32.totalorder %v5640_v37, %v5672_v20  ;;  %v4836_v16 = vpop.xlane.xlu0 %1233  ;;  %vm717_vm12 = vcmp.eq.s32.totalorder %v3359_v13, %v5672_v20  ;;  %v1025_v57 = vadd.f32 %v843_v47, %v842_v38  ;;  %v4861_v33 = vld [vmem:[%s3269_s8 + $0x3d0] sm:$0xff] }
 0x298   : > { %v2813_v12 = vpop.eup %2812  ;;  %1794 = vadd.xlane.f32.xlu0 %v1793_v26  ;;  %5673 = vst [vmem:[#allocation32_spill] sm:$0xff] %v4836_v16  ;;  %2822 = vpow2.f32 %v1608_v7  ;;  %v1364_v58 = vsub.f32 %v3041_v53, %v4836_v16  ;;  %v1365_v1 = vsub.f32 %v3042_v48, %v4836_v16  ;;  %v844_v60 = vsel %vm716_vm11, %v4735_v55, 0.0  ;;  %v4866_v26 = vld [vmem:[%s3269_s8 + $0x3d8] sm:$0xff] }
 0x299   : > { %1023 = vadd.xlane.f32.xlu1 %v1022_v35  ;;  %2824 = vpow2.f32 %v1610_v40  ;;  %v4844_v50 = vpop.xlane.xlu1 %1677  ;;  %v1796_v51 = vadd.f32 %v2813_v12, %v2811_v54  ;;  %v845_v0 = vsel %vm717_vm12, %v4740_v27, 0.0  ;;  %vm720_vm13 = vcmp.eq.s32.totalorder %v5640_v37, %v5674_v30 }
 0x29a   : > { %v1612_v25 = vmul.f32 1.442695, %v1364_v58  ;;  %v1614_v10 = vmul.f32 1.442695, %v1365_v1  ;;  %vm721_vm14 = vcmp.eq.s32.totalorder %v3359_v13, %v5674_v30  ;;  %v1028_v38 = vadd.f32 %v845_v0, %v844_v60  ;;  %v5676_v1 = vld [vmem:[#allocation18_spill] sm:$0xff] }
 0x29b   : > { %v2815_v63 = vpop.eup %2814  ;;  %v4856_v6 = vpop.xlane.xlu0 %1236  ;;  %v848_v20 = vsel %vm720_vm13, %v4783_v29, 0.0  ;;  %v849_v58 = vsel %vm721_vm14, %v4788_v43, 0.0  ;;  %vm724_vm15 = vcmp.eq.s32.totalorder %v5640_v37, %v5676_v1  ;;  %vm725_vm0 = vcmp.eq.s32.totalorder %v3359_v13, %v5676_v1  ;;  %v3046_v29 = vld [vmem:[%s3269_s8 + $0x3e8] sm:$0xff] }
 0x29c   : > { %v2817_v62 = vpop.eup %2816  ;;  %1797 = vadd.xlane.f32.xlu0 %v1796_v51  ;;  %5675 = vst [vmem:[#allocation34_spill] sm:$0xff] %v4856_v6  ;;  %2826 = vpow2.f32 %v1612_v25  ;;  %v1366_v55 = vsub.f32 %v4861_v33, %v4856_v6  ;;  %v1367_v27 = vsub.f32 %v4866_v26, %v4856_v6  ;;  %v1034_v30 = vadd.f32 %v849_v58, %v848_v20 }
 0x29d   : > { %1026 = vadd.xlane.f32.xlu1 %v1025_v57  ;;  %2828 = vpow2.f32 %v1614_v10  ;;  %v4870_v54 = vpop.xlane.xlu1 %1680  ;;  %v1799_v7 = vadd.f32 %v2817_v62, %v2815_v63  ;;  %v3045_v63 = vld [vmem:[%s3269_s8 + $0x3e0] sm:$0xff] }
 0x29e   : > { %v2819_v40 = vpop.eup %2818  ;;  %v1616_v35 = vmul.f32 1.442695, %v1366_v55  ;;  %v1618_v12 = vmul.f32 1.442695, %v1367_v27  ;;  %v852_v27 = vsel %vm724_vm15, %v3041_v53, 0.0 }
 0x29f   : > { %v2821_v47 = vpop.eup %2820  ;;  %v4882_v51 = vpop.xlane.xlu0 %1239 }
 0x2a0   : > { %1800 = vadd.xlane.f32.xlu0 %v1799_v7  ;;  %5677 = vst [vmem:[#allocation35_spill] sm:$0xff] %v4882_v51  ;;  %2830 = vpow2.f32 %v1616_v35  ;;  %v1368_v25 = vsub.f32 %v3045_v63, %v4882_v51  ;;  %v1369_v10 = vsub.f32 %v3046_v29, %v4882_v51  ;;  %v1802_v57 = vadd.f32 %v2821_v47, %v2819_v40  ;;  %v5678_v35 = vld [vmem:[#allocation22_spill] sm:$0xff] }
 0x2a1   : > { %1029 = vadd.xlane.f32.xlu1 %v1028_v38  ;;  %2832 = vpow2.f32 %v1618_v12  ;;  %v4890_v43 = vpop.xlane.xlu1 %1683  ;;  %v853_v7 = vsel %vm725_vm0, %v3042_v48, 0.0  ;;  %vm728_vm1 = vcmp.eq.s32.totalorder %v5640_v37, %v5678_v35  ;;  %vm729_vm2 = vcmp.eq.s32.totalorder %v3359_v13, %v5678_v35  ;;  %v4905_v40 = vld [vmem:[%s3269_s8 + $0x3f0] sm:$0xff]  ;;  %v4910_v38 = vld [vmem:[%s3269_s8 + $0x3f8] sm:$0xff] }
 0x2a2   : > { %v2823_v62 = vpop.eup %2822  ;;  %v1620_v60 = vmul.f32 1.442695, %v1368_v25  ;;  %v1622_v0 = vmul.f32 1.442695, %v1369_v10  ;;  %v1040_v10 = vadd.f32 %v853_v7, %v852_v27 }
 0x2a3   : > { %v2825_v55 = vpop.eup %2824  ;;  %v4900_v12 = vpop.xlane.xlu0 %1242 }
 0x2a4   : > { %1803 = vadd.xlane.f32.xlu0 %v1802_v57  ;;  %5679 = vst [vmem:[#allocation37_spill] sm:$0xff] %v4900_v12  ;;  %2834 = vpow2.f32 %v1620_v60  ;;  %v1370_v53 = vsub.f32 %v4905_v40, %v4900_v12  ;;  %v1371_v48 = vsub.f32 %v4910_v38, %v4900_v12  ;;  %v1805_v20 = vadd.f32 %v2825_v55, %v2823_v62 }
 0x2a5   : > { %1035 = vadd.xlane.f32.xlu1 %v1034_v30  ;;  %2836 = vpow2.f32 %v1622_v0  ;;  %v4914_v47 = vpop.xlane.xlu1 %1686  ;;  %v856_v60 = vsel %vm728_vm1, %v3045_v63, 0.0  ;;  %v857_v30 = vsel %vm729_vm2, %v3046_v29, 0.0 }
 0x2a6   : > { %v2827_v58 = vpop.eup %2826  ;;  %v1624_v1 = vmul.f32 1.442695, %v1370_v53  ;;  %v1626_v25 = vmul.f32 1.442695, %v1371_v48  ;;  %v1046_v27 = vadd.f32 %v857_v30, %v856_v60 }
 0x2a7   : > { %v2829_v57 = vpop.eup %2828  ;;  %v4922_v6 = vpop.xlane.xlu0 %1689 }
 0x2a8   : > { %1806 = vadd.xlane.f32.xlu0 %v1805_v20  ;;  %2838 = vpow2.f32 %v1624_v1  ;;  %v1808_v0 = vadd.f32 %v2829_v57, %v2827_v58  ;;  %v5680_v57 = vld [vmem:[#allocation17_spill] sm:$0xff] }
 0x2a9   : > { %1041 = vadd.xlane.f32.xlu1 %v1040_v10  ;;  %2840 = vpow2.f32 %v1626_v25  ;;  %v4924_v62 = vpop.xlane.xlu1 %1692  ;;  %vm718_vm3 = vcmp.eq.s32.totalorder %v5640_v37, %v5680_v57  ;;  %vm719_vm4 = vcmp.eq.s32.totalorder %v3359_v13, %v5680_v57 }
 0x2aa   : > { %v2831_v55 = vpop.eup %2830  ;;  %2842 = vlog2.f32 %v4720_v8 }
 0x2ab   : > { %v2833_v7 = vpop.eup %2832  ;;  %v4926_v53 = vpop.xlane.xlu0 %1695  ;;  %2844 = vlog2.f32 %v4745_v21  ;;  %v5683_v21 = vld [vmem:[#allocation23_spill] sm:$0xff] }
 0x2ac   : > { %1809 = vadd.xlane.f32.xlu0 %v1808_v0  ;;  %v1811_v63 = vadd.f32 %v2833_v7, %v2831_v55  ;;  %v846_v55 = vsel %vm718_vm3, %v4762_v3, 0.0  ;;  %v5681_v7 = vld [vmem:[#allocation19_spill] sm:$0xff]  ;;  %2846 = vlog2.f32 %v4772_v45  ;;  %vm730_vm9 = vcmp.eq.s32.totalorder %v5640_v37, %v5683_v21 }
 0x2ad   : > { %1047 = vadd.xlane.f32.xlu1 %v1046_v27  ;;  %v4928_v48 = vpop.xlane.xlu1 %1698  ;;  %v847_v27 = vsel %vm719_vm4, %v4767_v36, 0.0  ;;  %vm722_vm5 = vcmp.eq.s32.totalorder %v5640_v37, %v5681_v7  ;;  %vm723_vm6 = vcmp.eq.s32.totalorder %v3359_v13, %v5681_v7  ;;  %v5682_v36 = vld [vmem:[#allocation20_spill] sm:$0xff]  ;;  %2848 = vlog2.f32 %v4793_v28 }
 0x2ae   : > { %v2835_v29 = vpop.eup %2834  ;;  %vm726_vm7 = vcmp.eq.s32.totalorder %v5640_v37, %v5682_v36  ;;  %vm727_vm8 = vcmp.eq.s32.totalorder %v3359_v13, %v5682_v36  ;;  %vm731_vm10 = vcmp.eq.s32.totalorder %v3359_v13, %v5683_v21  ;;  %2850 = vlog2.f32 %v4824_v2 }
 0x2af   : > { %v2837_v35 = vpop.eup %2836  ;;  %v4930_v20 = vpop.xlane.xlu0 %1701  ;;  %2852 = vlog2.f32 %v4844_v50  ;;  %v2090_v50 = vadd.s32 96, %v4517_v39 }
 0x2b0   : > { %1812 = vadd.xlane.f32.xlu0 %v1811_v63  ;;  %v1814_v1 = vadd.f32 %v2837_v35, %v2835_v29  ;;  %v1031_v29 = vadd.f32 %v847_v27, %v846_v55  ;;  %v850_v35 = vsel %vm722_vm5, %v4815_v41, 0.0  ;;  %v854_v41 = vsel %vm726_vm7, %v4861_v33, 0.0 }
 0x2b1   : > { %v4932_v58 = vpop.xlane.xlu1 %1704  ;;  %v858_v33 = vsel %vm730_vm9, %v4905_v40, 0.0  ;;  %2854 = vlog2.f32 %v4870_v54  ;;  %v2089_v27 = vadd.s32 88, %v4517_v39 }
 0x2b2   : > { %v2839_v25 = vpop.eup %2838  ;;  %2856 = vlog2.f32 %v4890_v43  ;;  %v2092_v43 = vadd.s32 112, %v4517_v39 }
 0x2b3   : > { %v2841_v10 = vpop.eup %2840  ;;  %v4938_v60 = vpop.xlane.xlu0 %1707  ;;  %2858 = vlog2.f32 %v4914_v47 }
 0x2b4   : > { %1815 = vadd.xlane.f32.xlu0 %v1814_v1  ;;  %v1817_v30 = vadd.f32 %v2841_v10, %v2839_v25  ;;  %v851_v1 = vsel %vm723_vm6, %v4820_v9, 0.0  ;;  %v855_v9 = vsel %vm727_vm8, %v4866_v26, 0.0  ;;  %v859_v26 = vsel %vm731_vm10, %v4910_v38, 0.0 }
 0x2b5   : > { %v4940_v0 = vpop.xlane.xlu1 %1710  ;;  %v1037_v25 = vadd.f32 %v851_v1, %v850_v35  ;;  %v1043_v57 = vadd.f32 %v855_v9, %v854_v41  ;;  %v1049_v2 = vadd.f32 %v859_v26, %v858_v33  ;;  %v2091_v41 = vadd.s32 104, %v4517_v39  ;;  %v5685_v9 = vld [vmem:[#allocation65_spill] sm:$0xff]  ;;  %v5686_v26 = vld [vmem:[#allocation40_spill] sm:$0xff] }
 0x2b6   : > { %v2155_v33 = vadd.s32 %v4546_v24, %v2090_v50  ;;  %2860 = vlog2.f32 %v4922_v6  ;;  %v5688_v50 = vld [vmem:[#allocation41_spill] sm:$0xff]  ;;  %v5689_v6 = vld [vmem:[#allocation67_spill] sm:$0xff] }
 0x2b7   : > { %v4954_v3 = vpop.xlane.xlu0 %1713  ;;  %v2156_v12 = vadd.s32 %v4546_v24, %v2091_v41  ;;  %2862 = vlog2.f32 %v4924_v62 }
 0x2b8   : > { %1818 = vadd.xlane.f32.xlu0 %v1817_v30  ;;  %v2843_v30 = vpop.eup %2842  ;;  %vm2219_vm12 = vcmp.lt.s32.totalorder %v2155_v33, 1000  ;;  %2864 = vlog2.f32 %v4926_v53  ;;  %v5697_v53 = vld [vmem:[#allocation71_spill] sm:$0xff] }
 0x2b9   : > { %v4949_v63 = vpop.xlane.xlu1 %1716  ;;  %v2845_v37 = vpop.eup %2844  ;;  %v1843_v13 = vmul.f32 0.6931472, %v2843_v30  ;;  %vm2220_vm13 = vcmp.lt.s32.totalorder %v2156_v12, 1000  ;;  %2866 = vlog2.f32 %v4928_v48 }
 0x2ba   : > { %v2847_v55 = vpop.eup %2846  ;;  %v1845_v40 = vmul.f32 0.6931472, %v2845_v37  ;;  %2868 = vlog2.f32 %v4930_v20 }
 0x2bb   : > { %v4971_v10 = vpop.xlane.xlu0 %1719  ;;  %v2849_v38 = vpop.eup %2848  ;;  %v1847_v35 = vmul.f32 0.6931472, %v2847_v55  ;;  %2870 = vlog2.f32 %v4932_v58 }
 0x2bc   : > { %1032 = vadd.xlane.f32.xlu0 %v1031_v29  ;;  %v5684_v29 = vld [vmem:[#allocation64_spill] sm:$0xff]  ;;  %v2851_v36 = vpop.eup %2850  ;;  %v1960_v21 = vadd.f32 %v1845_v40, %v5685_v9  ;;  %v2157_v40 = vadd.s32 %v4546_v24, %v2092_v43  ;;  %2872 = vlog2.f32 %v4938_v60 }
 0x2bd   : > { %v4961_v8 = vpop.xlane.xlu1 %1722  ;;  %v1959_v54 = vadd.f32 %v1843_v13, %v5684_v29  ;;  %v2853_v30 = vpop.eup %2852  ;;  %v5687_v13 = vld [vmem:[#allocation66_spill] sm:$0xff]  ;;  %v1851_v55 = vmul.f32 0.6931472, %v2851_v36  ;;  %2874 = vlog2.f32 %v4940_v0 }
 0x2be   : > { %v2855_v29 = vpop.eup %2854  ;;  %v2024_v9 = vsub.f32 %v1960_v21, %v5688_v50  ;;  %v1853_v19 = vmul.f32 0.6931472, %v2853_v30  ;;  %v5690_v36 = vld [vmem:[#allocation42_spill] sm:$0xff]  ;;  %vm2221_vm14 = vcmp.lt.s32.totalorder %v2157_v40, 1000  ;;  %v5692_v50 = vld [vmem:[#allocation43_spill] sm:$0xff]  ;;  %2876 = vlog2.f32 %v4954_v3 }
 0x2bf   : > { %v4983_v7 = vpop.xlane.xlu0 %1725  ;;  %v2023_v37 = vsub.f32 %v1959_v54, %v5686_v26  ;;  %v2857_v16 = vpop.eup %2856  ;;  %v2094_v54 = vadd.s32 128, %v4517_v39  ;;  %v5691_v26 = vld [vmem:[#allocation68_spill] sm:$0xff]  ;;  %2878 = vlog2.f32 %v4949_v63 }
 0x2c0   : > { %1038 = vadd.xlane.f32.xlu0 %v1037_v25  ;;  %v2154_v25 = vadd.s32 %v4546_v24, %v2089_v27  ;;  %v1963_v41 = vadd.f32 %v1851_v55, %v5691_v26  ;;  %v2859_v49 = vpop.eup %2858  ;;  %v2283_v33 = vsel %vm2219_vm12, %v2024_v9, 0.0  ;;  %2880 = vlog2.f32 %v4971_v10 }
 0x2c1   : > { %v4973_v45 = vpop.xlane.xlu1 %1728  ;;  %v1859_v42 = vmul.f32 0.6931472, %v2859_v49  ;;  %2882 = vlog2.f32 %v4961_v8 }
 0x2c2   : > { %vm2218_vm11 = vcmp.lt.s32.totalorder %v2154_v25, 1000  ;;  %2884 = vlog2.f32 %v4983_v7 }
 0x2c3   : > { %v4996_v47 = vpop.xlane.xlu0 %1731  ;;  %2886 = vlog2.f32 %v4973_v45 }
 0x2c4   : > { %1044 = vadd.xlane.f32.xlu0 %v1043_v57  ;;  %v1849_v57 = vmul.f32 0.6931472, %v2849_v38  ;;  %v2093_v38 = vadd.s32 120, %v4517_v39  ;;  %2888 = vlog2.f32 %v4996_v47  ;;  %v2110_v47 = vadd.s32 256, %v4517_v39 }
 0x2c5   : > { %v4979_v28 = vpop.xlane.xlu1 %1734 }
 0x2c6   : > { %v1962_v51 = vadd.f32 %v1849_v57, %v5689_v6  ;;  %v2158_v21 = vadd.s32 %v4546_v24, %v2093_v38  ;;  %v2095_v57 = vadd.s32 136, %v4517_v39  ;;  %v5694_v38 = vld [vmem:[#allocation44_spill] sm:$0xff]  ;;  %2890 = vlog2.f32 %v4979_v28 }
 0x2c7   : > { %v5015_v30 = vpop.xlane.xlu0 %1737  ;;  %v2027_v26 = vsub.f32 %v1963_v41, %v5694_v38 }
 0x2c8   : > { %1050 = vadd.xlane.f32.xlu0 %v1049_v2  ;;  %v1961_v2 = vadd.f32 %v1847_v35, %v5687_v13  ;;  %v2282_v35 = vsel %vm2218_vm11, %v2023_v37, 0.0  ;;  %v1855_v13 = vmul.f32 0.6931472, %v2855_v29  ;;  %v2026_v62 = vsub.f32 %v1962_v51, %v5692_v50  ;;  %v5693_v37 = vld [vmem:[#allocation69_spill] sm:$0xff]  ;;  %v2861_v51 = vpop.eup %2860 }
 0x2c9   : > { %v4988_v1 = vpop.xlane.xlu1 %1740  ;;  %v1964_v6 = vadd.f32 %v1853_v19, %v5693_v37  ;;  %v2345_v55 = vadd.f32 %v4812_v18, %v2282_v35  ;;  %v2159_v29 = vadd.s32 %v4546_v24, %v2094_v54  ;;  %vm2222_vm15 = vcmp.lt.s32.totalorder %v2158_v21, 1000  ;;  %v5696_v54 = vld [vmem:[#allocation45_spill] sm:$0xff] }
 0x2ca   : > { %v2025_v25 = vsub.f32 %v1961_v2, %v5690_v36  ;;  %v1857_v2 = vmul.f32 0.6931472, %v2857_v16  ;;  %v2096_v36 = vadd.s32 144, %v4517_v39  ;;  %v1965_v14 = vadd.f32 %v1855_v13, %v5695_v15  ;;  %v5698_v13 = vld [vmem:[#allocation46_spill] sm:$0xff] }
 0x2cb   : > { %v2346_v50 = vadd.f32 %v2345_v55, %v2283_v33  ;;  %v2160_v19 = vadd.s32 %v4546_v24, %v2095_v57  ;;  %v2097_v18 = vadd.s32 152, %v4517_v39  ;;  %v2285_v16 = vsel %vm2221_vm14, %v2026_v62, 0.0  ;;  %v5034_v49 = vpop.xlane.xlu0 %1743  ;;  %v5699_v57 = vld [vmem:[#allocation72_spill] sm:$0xff]  ;;  %v2863_v62 = vpop.eup %2862 }
 0x2cc   : > { %v2284_v12 = vsel %vm2220_vm13, %v2025_v25, 0.0  ;;  %v2028_v35 = vsub.f32 %v1964_v6, %v5696_v54  ;;  %v1966_v25 = vadd.f32 %v1857_v2, %v5697_v53  ;;  %vm2223_vm0 = vcmp.lt.s32.totalorder %v2159_v29, 1000 }
 0x2cd   : > { %v5000_v27 = vpop.xlane.xlu1 %1746  ;;  %v2347_v37 = vadd.f32 %v2346_v50, %v2284_v12  ;;  %v2161_v15 = vadd.s32 %v4546_v24, %v2096_v36  ;;  %v2286_v41 = vsel %vm2222_vm15, %v2027_v26, 0.0  ;;  %v2029_v21 = vsub.f32 %v1965_v14, %v5698_v13  ;;  %v5700_v12 = vld [vmem:[#allocation47_spill] sm:$0xff]  ;;  %v5701_v26 = vld [vmem:[#allocation48_spill] sm:$0xff] }
 0x2ce   : > { %v1967_v33 = vadd.f32 %v1859_v42, %v5699_v57  ;;  %v1861_v55 = vmul.f32 0.6931472, %v2861_v51  ;;  %vm2224_vm1 = vcmp.lt.s32.totalorder %v2160_v19, 1000  ;;  %v2162_v2 = vadd.s32 %v4546_v24, %v2097_v18  ;;  %v5702_v51 = vld [vmem:[#allocation73_spill] sm:$0xff]  ;;  %v2865_v19 = vpop.eup %2864 }
 0x2cf   : > { %v2348_v6 = vadd.f32 %v2347_v37, %v2285_v16  ;;  %v2098_v29 = vadd.s32 160, %v4517_v39  ;;  %v2287_v36 = vsel %vm2223_vm0, %v2028_v35, 0.0  ;;  %v2030_v48 = vsub.f32 %v1966_v25, %v5700_v12  ;;  %v5050_v25 = vpop.xlane.xlu0 %1749  ;;  %v5704_v12 = vld [vmem:[#allocation50_spill] sm:$0xff] }
 0x2d0   : > { %vm2225_vm2 = vcmp.lt.s32.totalorder %v2161_v15, 1000  ;;  %v2288_v14 = vsel %vm2224_vm1, %v2029_v21, 0.0  ;;  %v2031_v42 = vsub.f32 %v1967_v33, %v5701_v26  ;;  %v1968_v50 = vadd.f32 %v1861_v55, %v5702_v51  ;;  %v2867_v55 = vpop.eup %2866 }
 0x2d1   : > { %v5011_v43 = vpop.xlane.xlu1 %960  ;;  %v2349_v38 = vadd.f32 %v2348_v6, %v2286_v41  ;;  %v1863_v54 = vmul.f32 0.6931472, %v2863_v62  ;;  %vm2226_vm3 = vcmp.lt.s32.totalorder %v2162_v2, 1000  ;;  %v2163_v18 = vadd.s32 %v4546_v24, %v2098_v29  ;;  %v5703_v41 = vld [vmem:[#allocation49_spill] sm:$0xff] }
 0x2d2   : > { %v2099_v35 = vadd.s32 168, %v4517_v39  ;;  %v2289_v37 = vsel %vm2225_vm2, %v2030_v48, 0.0  ;;  %v2290_v20 = vsel %vm2226_vm3, %v2031_v42, 0.0  ;;  %v2032_v13 = vsub.f32 %v1968_v50, %v5703_v41  ;;  %v2869_v42 = vpop.eup %2868 }
 0x2d3   : > { %v2350_v16 = vadd.f32 %v2349_v38, %v2287_v36  ;;  %v1969_v21 = vadd.f32 %v1863_v54, %v4158_v32  ;;  %v1865_v57 = vmul.f32 0.6931472, %v2865_v19  ;;  %vm2227_vm4 = vcmp.lt.s32.totalorder %v2163_v18, 1000  ;;  %v5060_v36 = vpop.xlane.xlu0 %1752  ;;  %v5705_v38 = vld [vmem:[#allocation74_spill] sm:$0xff]  ;;  %v5706_v19 = vld [vmem:[#allocation51_spill] sm:$0xff] }
 0x2d4   : > { %v2164_v6 = vadd.s32 %v4546_v24, %v2099_v35  ;;  %v2100_v2 = vadd.s32 176, %v4517_v39  ;;  %v2291_v58 = vsel %vm2227_vm4, %v2032_v13, 0.0  ;;  %v2101_v50 = vadd.s32 184, %v4517_v39  ;;  %v5707_v18 = vld [vmem:[#allocation75_spill] sm:$0xff] }
 0x2d5   : > { %v5025_v9 = vpop.xlane.xlu1 %963  ;;  %v2351_v15 = vadd.f32 %v2350_v16, %v2288_v14  ;;  %v2033_v48 = vsub.f32 %v1969_v21, %v5704_v12  ;;  %v1970_v32 = vadd.f32 %v1865_v57, %v5705_v38  ;;  %v1867_v14 = vmul.f32 0.6931472, %v2867_v55  ;;  %v5708_v55 = vld [vmem:[#allocation52_spill] sm:$0xff] }
 0x2d6   : > { %vm2228_vm5 = vcmp.lt.s32.totalorder %v2164_v6, 1000  ;;  %v2165_v51 = vadd.s32 %v4546_v24, %v2100_v2  ;;  %v2166_v41 = vadd.s32 %v4546_v24, %v2101_v50  ;;  %v2102_v13 = vadd.s32 192, %v4517_v39  ;;  %v5709_v6 = vld [vmem:[#allocation76_spill] sm:$0xff]  ;;  %v5711_v50 = vld [vmem:[#allocation77_spill] sm:$0xff] }
 0x2d7   : > { %v2352_v62 = vadd.f32 %v2351_v15, %v2289_v37  ;;  %v2292_v60 = vsel %vm2228_vm5, %v2033_v48, 0.0  ;;  %v2034_v16 = vsub.f32 %v1970_v32, %v5706_v19  ;;  %v1971_v35 = vadd.f32 %v1867_v14, %v5707_v18  ;;  %v5075_v21 = vpop.xlane.xlu0 %1755 }
 0x2d8   : > { %v1869_v37 = vmul.f32 0.6931472, %v2869_v42  ;;  %vm2229_vm6 = vcmp.lt.s32.totalorder %v2165_v51, 1000  ;;  %vm2230_vm7 = vcmp.lt.s32.totalorder %v2166_v41, 1000  ;;  %v2167_v48 = vadd.s32 %v4546_v24, %v2102_v13  ;;  %v5710_v42 = vld [vmem:[#allocation53_spill] sm:$0xff]  ;;  %v5713_v13 = vld [vmem:[#allocation78_spill] sm:$0xff] }
 0x2d9   : > { %v5038_v40 = vpop.xlane.xlu1 %966  ;;  %v2353_v29 = vadd.f32 %v2352_v62, %v2290_v20  ;;  %v2871_v20 = vpop.eup %2870  ;;  %v2293_v0 = vsel %vm2229_vm6, %v2034_v16, 0.0  ;;  %v2035_v62 = vsub.f32 %v1971_v35, %v5708_v55  ;;  %v2103_v38 = vadd.s32 200, %v4517_v39 }
 0x2da   : > { %v1972_v2 = vadd.f32 %v1869_v37, %v5709_v6  ;;  %v2873_v12 = vpop.eup %2872  ;;  %vm2231_vm8 = vcmp.lt.s32.totalorder %v2167_v48, 1000  ;;  %v2104_v35 = vadd.s32 208, %v4517_v39  ;;  %v5714_v48 = vld [vmem:[#allocation55_spill] sm:$0xff]  ;;  %2892 = vlog2.f32 %v5015_v30 }
 0x2db   : > { %v2354_v54 = vadd.f32 %v2353_v29, %v2291_v58  ;;  %v1871_v29 = vmul.f32 0.6931472, %v2871_v20  ;;  %v5085_v14 = vpop.xlane.xlu0 %1758  ;;  %v2294_v3 = vsel %vm2230_vm7, %v2035_v62, 0.0  ;;  %v2875_v16 = vpop.eup %2874  ;;  %v2168_v18 = vadd.s32 %v4546_v24, %v2103_v38  ;;  %v5712_v20 = vld [vmem:[#allocation54_spill] sm:$0xff] }
 0x2dc   : > { %v2036_v51 = vsub.f32 %v1972_v2, %v5710_v42  ;;  %v2877_v62 = vpop.eup %2876  ;;  %v2169_v6 = vadd.s32 %v4546_v24, %v2104_v35  ;;  %v2105_v2 = vadd.s32 216, %v4517_v39  ;;  %v5716_v35 = vld [vmem:[#allocation56_spill] sm:$0xff]  ;;  %2894 = vlog2.f32 %v4988_v1 }
 0x2dd   : > { %v5046_v53 = vpop.xlane.xlu1 %969  ;;  %v2355_v57 = vadd.f32 %v2354_v54, %v2292_v60  ;;  %v1973_v54 = vadd.f32 %v1871_v29, %v5711_v50  ;;  %v1873_v60 = vmul.f32 0.6931472, %v2873_v12  ;;  %vm2232_vm9 = vcmp.lt.s32.totalorder %v2168_v18, 1000  ;;  %v2879_v50 = vpop.eup %2878  ;;  %v5724_v1 = vld [vmem:[#allocation60_spill] sm:$0xff] }
 0x2de   : > { %v2295_v63 = vsel %vm2231_vm8, %v2036_v51, 0.0  ;;  %v1877_v42 = vmul.f32 0.6931472, %v2877_v62  ;;  %vm2233_vm10 = vcmp.lt.s32.totalorder %v2169_v6, 1000  ;;  %v2107_v62 = vadd.s32 232, %v4517_v39 }
 0x2df   : > { %v2356_v32 = vadd.f32 %v2355_v57, %v2293_v0  ;;  %v2037_v41 = vsub.f32 %v1973_v54, %v5712_v20  ;;  %v1974_v57 = vadd.f32 %v1873_v60, %v5713_v13  ;;  %v1875_v0 = vmul.f32 0.6931472, %v2875_v16  ;;  %v5100_v29 = vpop.xlane.xlu0 %1761 }
 0x2e0   : > { %v2170_v54 = vadd.s32 %v4546_v24, %v2105_v2  ;;  %v2106_v60 = vadd.s32 224, %v4517_v39  ;;  %v2175_v30 = vadd.s32 %v4546_v24, %v2110_v47  ;;  %2896 = vlog2.f32 %v5034_v49 }
 0x2e1   : > { %v5055_v33 = vpop.xlane.xlu1 %972  ;;  %v2357_v37 = vadd.f32 %v2356_v32, %v2294_v3  ;;  %v2296_v10 = vsel %vm2232_vm9, %v2037_v41, 0.0  ;;  %v2038_v38 = vsub.f32 %v1974_v57, %v5714_v48  ;;  %v5715_v32 = vld [vmem:[#allocation79_spill] sm:$0xff]  ;;  %v1879_v41 = vmul.f32 0.6931472, %v2879_v50  ;;  %v2881_v57 = vpop.eup %2880  ;;  %v5719_v48 = vld [vmem:[#allocation81_spill] sm:$0xff] }
 0x2e2   : > { %v1975_v3 = vadd.f32 %v1875_v0, %v5715_v32  ;;  %vm2234_vm11 = vcmp.lt.s32.totalorder %v2170_v54, 1000  ;;  %v2171_v0 = vadd.s32 %v4546_v24, %v2106_v60  ;;  %v1881_v32 = vmul.f32 0.6931472, %v2881_v57 }
 0x2e3   : > { %v2358_v12 = vadd.f32 %v2357_v37, %v2295_v63  ;;  %v5110_v18 = vpop.xlane.xlu0 %1764  ;;  %v2297_v8 = vsel %vm2233_vm10, %v2038_v38, 0.0  ;;  %v5717_v63 = vld [vmem:[#allocation80_spill] sm:$0xff]  ;;  %v1977_v38 = vadd.f32 %v1879_v41, %v5719_v48  ;;  %v2172_v50 = vadd.s32 %v4546_v24, %v2107_v62  ;;  %v5722_v48 = vld [vmem:[#allocation59_spill] sm:$0xff] }
 0x2e4   : > { %v2039_v37 = vsub.f32 %v1975_v3, %v5716_v35  ;;  %v1976_v20 = vadd.f32 %v1877_v42, %v5717_v63  ;;  %v2883_v42 = vpop.eup %2882  ;;  %vm2235_vm12 = vcmp.lt.s32.totalorder %v2171_v0, 1000  ;;  %v2108_v54 = vadd.s32 240, %v4517_v39 }
 0x2e5   : > { %v5064_v26 = vpop.xlane.xlu1 %975  ;;  %v2359_v16 = vadd.f32 %v2358_v12, %v2296_v10  ;;  %v5718_v12 = vld [vmem:[#allocation57_spill] sm:$0xff]  ;;  %v2885_v57 = vpop.eup %2884  ;;  %vm2236_vm13 = vcmp.lt.s32.totalorder %v2172_v50, 1000  ;;  %v2109_v62 = vadd.s32 248, %v4517_v39  ;;  %2898 = vlog2.f32 %v5000_v27 }
 0x2e6   : > { %v2298_v2 = vsel %vm2234_vm11, %v2039_v37, 0.0  ;;  %v2040_v10 = vsub.f32 %v1976_v20, %v5718_v12  ;;  %v5721_v37 = vld [vmem:[#allocation82_spill] sm:$0xff]  ;;  %v1883_v20 = vmul.f32 0.6931472, %v2883_v42  ;;  %v2173_v0 = vadd.s32 %v4546_v24, %v2108_v54  ;;  %v2887_v12 = vpop.eup %2886 }
 0x2e7   : > { %v2360_v6 = vadd.f32 %v2359_v16, %v2297_v8  ;;  %v5720_v8 = vld [vmem:[#allocation58_spill] sm:$0xff]  ;;  %v1978_v63 = vadd.f32 %v1881_v32, %v5721_v37  ;;  %v5723_v32 = vld [vmem:[#allocation83_spill] sm:$0xff]  ;;  %v1885_v50 = vmul.f32 0.6931472, %v2885_v57  ;;  %v2174_v28 = vadd.s32 %v4546_v24, %v2109_v62  ;;  %v2889_v47 = vpop.eup %2888 }
 0x2e8   : > { %v2299_v16 = vsel %vm2235_vm12, %v2040_v10, 0.0  ;;  %v2041_v35 = vsub.f32 %v1977_v38, %v5720_v8  ;;  %v1979_v42 = vadd.f32 %v1883_v20, %v5723_v32  ;;  %vm2237_vm14 = vcmp.lt.s32.totalorder %v2173_v0, 1000 }
 0x2e9   : > { %v5071_v15 = vpop.xlane.xlu1 %978  ;;  %v2361_v60 = vadd.f32 %v2360_v6, %v2298_v2  ;;  %v2042_v38 = vsub.f32 %v1978_v63, %v5722_v48  ;;  %v2111_v54 = vadd.s32 264, %v4517_v39  ;;  %v1887_v37 = vmul.f32 0.6931472, %v2887_v12 }
 0x2ea   : > { %v2300_v10 = vsel %vm2236_vm13, %v2041_v35, 0.0  ;;  %v2114_v63 = vadd.s32 288, %v4517_v39  ;;  %v2043_v0 = vsub.f32 %v1979_v42, %v5724_v1  ;;  %v1980_v62 = vadd.f32 %v1885_v50, %v4244_v17  ;;  %v5725_v50 = vld [vmem:[#allocation61_spill] sm:$0xff] }
 0x2eb   : > { %v2362_v6 = vadd.f32 %v2361_v60, %v2299_v16  ;;  %v2112_v60 = vadd.s32 272, %v4517_v39  ;;  %v2113_v16 = vadd.s32 280, %v4517_v39  ;;  %v2301_v57 = vsel %vm2237_vm14, %v2042_v38, 0.0 }
 0x2ec   : > { %vm2238_vm15 = vcmp.lt.s32.totalorder %v2174_v28, 1000  ;;  %v2115_v48 = vadd.s32 296, %v4517_v39  ;;  %vm2239_vm0 = vcmp.lt.s32.totalorder %v2175_v30, 1000  ;;  %2900 = vlog2.f32 %v5050_v25 }
 0x2ed   : > { %v5080_v58 = vpop.xlane.xlu1 %981  ;;  %v2363_v35 = vadd.f32 %v2362_v6, %v2300_v10  ;;  %v2176_v6 = vadd.s32 %v4546_v24, %v2111_v54  ;;  %v2177_v49 = vadd.s32 %v4546_v24, %v2112_v60  ;;  %v5164_v12 = vadd.s32 %v4546_v24, %v2113_v16  ;;  %v2891_v10 = vpop.eup %2890 }
 0x2ee   : > { %v1981_v17 = vadd.f32 %v1887_v37, %v4256_v59  ;;  %v2116_v38 = vadd.s32 304, %v4517_v39  ;;  %v2044_v28 = vsub.f32 %v1980_v62, %v5725_v50  ;;  %v1889_v1 = vmul.f32 0.6931472, %v2889_v47  ;;  %v2893_v60 = vpop.eup %2892 }
 0x2ef   : > { %v2364_v27 = vadd.f32 %v2363_v35, %v2301_v57  ;;  %v2302_v54 = vsel %vm2238_vm15, %v2043_v0, 0.0  ;;  %v5173_v52 = vadd.s32 %v4546_v24, %v2114_v63  ;;  %2902 = vlog2.f32 %v5060_v36  ;;  %v2895_v37 = vpop.eup %2894 }
 0x2f0   : > { %v5177_v16 = vadd.s32 %v4546_v24, %v2115_v48  ;;  %v2117_v59 = vadd.s32 312, %v4517_v39  ;;  %v2118_v25 = vadd.s32 320, %v4517_v39  ;;  %v1891_v35 = vmul.f32 0.6931472, %v2891_v10  ;;  %v2897_v50 = vpop.eup %2896 }
 0x2f1   : > { %v5089_v19 = vpop.xlane.xlu1 %984  ;;  %vm2240_vm1 = vcmp.lt.s32.totalorder %v2176_v6, 1000  ;;  %vm2241_vm2 = vcmp.lt.s32.totalorder %v2177_v49, 1000  ;;  %vm2242_vm3 = vcmp.lt.s32.totalorder %v5164_v12, 1000  ;;  %v2045_v57 = vsub.f32 %v1981_v17, %v5011_v43 }
 0x2f2   : > { %v2365_v63 = vadd.f32 %v2364_v27, %v2302_v54  ;;  %2904 = vlog2.f32 %v5075_v21  ;;  %v5185_v36 = vadd.s32 %v4546_v24, %v2116_v38  ;;  %v1893_v47 = vmul.f32 0.6931472, %v2893_v60  ;;  %v2899_v27 = vpop.eup %2898 }
 0x2f3   : > { %v2303_v48 = vsel %vm2239_vm0, %v2044_v28, 0.0  ;;  %v1982_v10 = vadd.f32 %v1889_v1, %v4262_v4  ;;  %vm2243_vm4 = vcmp.lt.s32.totalorder %v5173_v52, 1000  ;;  %2906 = vlog2.f32 %v5085_v14 }
 0x2f4   : > { %vm2244_vm5 = vcmp.lt.s32.totalorder %v5177_v16, 1000  ;;  %v5197_v43 = vadd.s32 %v4546_v24, %v2117_v59  ;;  %v5200_v21 = vadd.s32 %v4546_v24, %v2118_v25  ;;  %v2119_v17 = vadd.s32 328, %v4517_v39 }
 0x2f5   : > { %v5096_v55 = vpop.xlane.xlu1 %987  ;;  %v1895_v30 = vmul.f32 0.6931472, %v2895_v37  ;;  %v2046_v38 = vsub.f32 %v1982_v10, %v5025_v9  ;;  %v1983_v4 = vadd.f32 %v1891_v35, %v4272_v23  ;;  %v2120_v28 = vadd.s32 336, %v4517_v39 }
 0x2f6   : > { %v2304_v14 = vsel %vm2240_vm1, %v2045_v57, 0.0  ;;  %v2366_v1 = vadd.f32 %v2365_v63, %v2303_v48  ;;  %2908 = vlog2.f32 %v5100_v29  ;;  %vm2245_vm6 = vcmp.lt.s32.totalorder %v5185_v36, 1000  ;;  %v2901_v23 = vpop.eup %2900 }
 0x2f7   : > { %v2121_v54 = vadd.s32 344, %v4517_v39  ;;  %v1897_v59 = vmul.f32 0.6931472, %v2897_v50  ;;  %v2047_v25 = vsub.f32 %v1983_v4, %v5038_v40  ;;  %v1984_v9 = vadd.f32 %v1893_v47, %v4278_v11  ;;  %v5726_v40 = vld [vmem:[#allocation84_spill] sm:$0xff]  ;;  %v5728_v4 = vld [vmem:[#allocation86_spill] sm:$0xff] }
 0x2f8   : > { %2910 = vlog2.f32 %v5110_v18  ;;  %v1899_v35 = vmul.f32 0.6931472, %v2899_v27  ;;  %vm2246_vm7 = vcmp.lt.s32.totalorder %v5197_v43, 1000  ;;  %v5217_v6 = vadd.s32 %v4546_v24, %v2119_v17  ;;  %v5727_v17 = vld [vmem:[#allocation85_spill] sm:$0xff] }
 0x2f9   : > { %v5105_v51 = vpop.xlane.xlu1 %990  ;;  %v2305_v37 = vsel %vm2241_vm2, %v2046_v38, 0.0  ;;  %v2048_v57 = vsub.f32 %v1984_v9, %v5046_v53  ;;  %v1985_v63 = vadd.f32 %v1895_v30, %v5726_v40  ;;  %v5226_v11 = vadd.s32 %v4546_v24, %v2120_v28  ;;  %v2903_v18 = vpop.eup %2902 }
 0x2fa   : > { %v2367_v47 = vadd.f32 %v2366_v1, %v2304_v14  ;;  %vm2247_vm8 = vcmp.lt.s32.totalorder %v5200_v21, 1000  ;;  %v5230_v48 = vadd.s32 %v4546_v24, %v2121_v54  ;;  %v1901_v10 = vmul.f32 0.6931472, %v2901_v23  ;;  %v5729_v23 = vld [vmem:[#allocation87_spill] sm:$0xff] }
 0x2fb   : > { %v2306_v53 = vsel %vm2242_vm3, %v2047_v25, 0.0  ;;  %v2049_v50 = vsub.f32 %v1985_v63, %v5055_v33  ;;  %v1986_v27 = vadd.f32 %v1897_v59, %v5727_v17  ;;  %v1987_v28 = vadd.f32 %v1899_v35, %v5728_v4 }
 0x2fc   : > { %v2905_v30 = vpop.eup %2904  ;;  %v2368_v38 = vadd.f32 %v2367_v47, %v2305_v37  ;;  %v2123_v14 = vadd.s32 360, %v4517_v39  ;;  %v1903_v1 = vmul.f32 0.6931472, %v2903_v18  ;;  %vm2248_vm9 = vcmp.lt.s32.totalorder %v5217_v6, 1000  ;;  %v5730_v47 = vld [vmem:[#allocation88_spill] sm:$0xff] }
 0x2fd   : > { %v5114_v13 = vpop.xlane.xlu1 %993  ;;  %v2050_v54 = vsub.f32 %v1986_v27, %v5064_v26  ;;  %v2907_v12 = vpop.eup %2906  ;;  %vm2249_vm10 = vcmp.lt.s32.totalorder %v5226_v11, 1000  ;;  %v1905_v9 = vmul.f32 0.6931472, %v2905_v30  ;;  %v2308_v52 = vsel %vm2244_vm5, %v2049_v50, 0.0  ;;  %v5731_v30 = vld [vmem:[#allocation89_spill] sm:$0xff] }
 0x2fe   : > { %v2369_v33 = vadd.f32 %v2368_v38, %v2306_v53  ;;  %v2051_v26 = vsub.f32 %v1987_v28, %v5071_v15  ;;  %vm2250_vm11 = vcmp.lt.s32.totalorder %v5230_v48, 1000  ;;  %v2124_v40 = vadd.s32 368, %v4517_v39 }
 0x2ff   : > { %v5119_v7 = vpop.xlane.xlu0 %1767  ;;  %v1907_v18 = vmul.f32 0.6931472, %v2907_v12  ;;  %v2309_v16 = vsel %vm2245_vm6, %v2050_v54, 0.0  ;;  %v2125_v50 = vadd.s32 376, %v4517_v39  ;;  %v1990_v38 = vadd.f32 %v1905_v9, %v5731_v30 }
 0x300   : > { %2912 = vlog2.f32 %v5119_v7  ;;  %v2122_v7 = vadd.s32 352, %v4517_v39  ;;  %v2909_v35 = vpop.eup %2908  ;;  %v2129_v30 = vadd.s32 408, %v4517_v39 }
 0x301   : > { %v5123_v3 = vpop.xlane.xlu1 %996  ;;  %v1909_v27 = vmul.f32 0.6931472, %v2909_v35  ;;  %v5285_v9 = vadd.s32 %v4546_v24, %v2125_v50 }
 0x302   : > { %v5248_v59 = vadd.s32 %v4546_v24, %v2122_v7  ;;  %v2911_v63 = vpop.eup %2910  ;;  %v1989_v7 = vadd.f32 %v1903_v1, %v5730_v47  ;;  %v2054_v1 = vsub.f32 %v1990_v38, %v5096_v55 }
 0x303   : > { %v1911_v4 = vmul.f32 0.6931472, %v2911_v63  ;;  %vm2254_vm15 = vcmp.lt.s32.totalorder %v5285_v9, 1000 }
 0x304   : > { %v5128_v45 = vpop.xlane.xlu0 %1770  ;;  %vm2251_vm12 = vcmp.lt.s32.totalorder %v5248_v59, 1000  ;;  %v2053_v36 = vsub.f32 %v1989_v7, %v5089_v19  ;;  %v5732_v19 = vld [vmem:[#allocation90_spill] sm:$0xff] }
 0x305   : > { %v5132_v41 = vpop.xlane.xlu1 %999  ;;  %2914 = vlog2.f32 %v5128_v45  ;;  %v2307_v45 = vsel %vm2243_vm4, %v2048_v57, 0.0  ;;  %v5258_v57 = vadd.s32 %v4546_v24, %v2123_v14  ;;  %v5275_v14 = vadd.s32 %v4546_v24, %v2124_v40  ;;  %v5734_v40 = vld [vmem:[#allocation92_spill] sm:$0xff] }
 0x306   : > { %v2370_v37 = vadd.f32 %v2369_v33, %v2307_v45  ;;  %v1991_v45 = vadd.f32 %v1907_v18, %v5732_v19  ;;  %v1993_v63 = vadd.f32 %v1911_v4, %v5734_v40  ;;  %v2127_v18 = vadd.s32 392, %v4517_v39 }
 0x307   : > { %vm2252_vm13 = vcmp.lt.s32.totalorder %v5258_v57, 1000  ;;  %vm2253_vm14 = vcmp.lt.s32.totalorder %v5275_v14, 1000 }
 0x308   : > { %v5139_v2 = vpop.xlane.xlu0 %1773  ;;  %v2371_v53 = vadd.f32 %v2370_v37, %v2308_v52  ;;  %v2126_v52 = vadd.s32 384, %v4517_v39  ;;  %v2055_v21 = vsub.f32 %v1991_v45, %v5105_v51  ;;  %v2057_v11 = vsub.f32 %v1993_v63, %v5123_v3 }
 0x309   : > { %v5143_v8 = vpop.xlane.xlu1 %1002  ;;  %2916 = vlog2.f32 %v5139_v2  ;;  %v2194_v45 = vadd.s32 %v4546_v24, %v2129_v30  ;;  %v5736_v30 = vld [vmem:[#allocation8_spill] sm:$0xff] }
 0x30a   : > { %v2372_v28 = vadd.f32 %v2371_v53, %v2309_v16  ;;  %v2313_v16 = vsel %vm2249_vm10, %v2054_v1, 0.0 }
 0x30b   : > { %vm2258_vm3 = vcmp.lt.s32.totalorder %v2194_v45, 1000 }
 0x30c   : > { %v5153_v20 = vpop.xlane.xlu0 %1776 }
 0x30d   : > { %v5159_v32 = vpop.xlane.xlu1 %1005  ;;  %2918 = vlog2.f32 %v5153_v20  ;;  %v1988_v20 = vadd.f32 %v1901_v10, %v5729_v23  ;;  %v2913_v10 = vpop.eup %2912  ;;  %v2312_v23 = vsel %vm2248_vm9, %v2053_v36, 0.0  ;;  %v2192_v36 = vadd.s32 %v4546_v24, %v2127_v18 }
 0x30e   : > { %v1913_v54 = vmul.f32 0.6931472, %v2913_v10  ;;  %v2191_v10 = vadd.s32 %v4546_v24, %v2126_v52 }
 0x30f   : > { %v2052_v15 = vsub.f32 %v1988_v20, %v5080_v58  ;;  %v2915_v58 = vpop.eup %2914  ;;  %v5733_v20 = vld [vmem:[#allocation91_spill] sm:$0xff]  ;;  %vm2256_vm1 = vcmp.lt.s32.totalorder %v2192_v36, 1000 }
 0x310   : > { %v1992_v55 = vadd.f32 %v1909_v27, %v5733_v20  ;;  %v1915_v35 = vmul.f32 0.6931472, %v2915_v58  ;;  %vm2255_vm0 = vcmp.lt.s32.totalorder %v2191_v10, 1000 }
 0x311   : > { %v5169_v42 = vpop.xlane.xlu0 %1779  ;;  %v5187_v0 = vpop.xlane.xlu1 %1008  ;;  %v2311_v43 = vsel %vm2247_vm8, %v2052_v15, 0.0  ;;  %v1994_v15 = vadd.f32 %v1913_v54, %v4519_v5 }
 0x312   : > { %2920 = vlog2.f32 %v5169_v42  ;;  %v2310_v42 = vsel %vm2246_vm7, %v2051_v26, 0.0  ;;  %v1995_v27 = vadd.f32 %v1915_v35, %v4570_v31 }
 0x313   : > { %v2917_v12 = vpop.eup %2916  ;;  %v2373_v33 = vadd.f32 %v2372_v28, %v2310_v42  ;;  %v2058_v38 = vsub.f32 %v1994_v15, %v5132_v41 }
 0x314   : > { %v1917_v6 = vmul.f32 0.6931472, %v2917_v12  ;;  %v2059_v59 = vsub.f32 %v1995_v27, %v5143_v8 }
 0x315   : > { %v5189_v62 = vpop.xlane.xlu0 %1782  ;;  %v5220_v29 = vpop.xlane.xlu1 %1011  ;;  %v2374_v37 = vadd.f32 %v2373_v33, %v2311_v43  ;;  %v2316_v43 = vsel %vm2252_vm13, %v2057_v11, 0.0  ;;  %v2317_v54 = vsel %vm2253_vm14, %v2058_v38, 0.0 }
 0x316   : > { %2922 = vlog2.f32 %v5189_v62  ;;  %v1996_v48 = vadd.f32 %v1917_v6, %v4586_v46 }
 0x317   : > { %v2375_v7 = vadd.f32 %v2374_v37, %v2312_v23  ;;  %v2318_v23 = vsel %vm2254_vm15, %v2059_v59, 0.0 }
 0x319   : > { %v5210_v60 = vpop.xlane.xlu0 %1785  ;;  %v5250_v25 = vpop.xlane.xlu1 %1014  ;;  %v2376_v42 = vadd.f32 %v2375_v7, %v2313_v16  ;;  %v2132_v16 = vadd.s32 432, %v4517_v39 }
 0x31a   : > { %2924 = vlog2.f32 %v5210_v60  ;;  %v2919_v60 = vpop.eup %2918 }
 0x31b   : > { %v1919_v51 = vmul.f32 0.6931472, %v2919_v60 }
 0x31c   : > { %v2921_v47 = vpop.eup %2920 }
 0x31d   : > { %v1789_v49 = vpop.xlane.xlu0 %1788  ;;  %v1921_v58 = vmul.f32 0.6931472, %v2921_v47  ;;  %v1997_v31 = vadd.f32 %v1919_v51, %v4602_v61  ;;  %v2060_v61 = vsub.f32 %v1996_v48, %v5159_v32  ;;  %v2133_v51 = vadd.s32 440, %v4517_v39 }
 0x31e   : > { %v5278_v62 = vpop.xlane.xlu1 %1017  ;;  %2926 = vlog2.f32 %v1789_v49  ;;  %v2056_v49 = vsub.f32 %v1992_v55, %v5114_v13  ;;  %v2128_v13 = vadd.s32 400, %v4517_v39 }
 0x31f   : > { %v1998_v12 = vadd.f32 %v1921_v58, %v4624_v34  ;;  %v2061_v8 = vsub.f32 %v1997_v31, %v5187_v0  ;;  %v2131_v34 = vadd.s32 424, %v4517_v39  ;;  %v2319_v35 = vsel %vm2255_vm0, %v2060_v61, 0.0  ;;  %v5737_v31 = vld [vmem:[#allocation27_spill] sm:$0xff] }
 0x320   : > { %v2923_v5 = vpop.eup %2922  ;;  %v2193_v41 = vadd.s32 %v4546_v24, %v2128_v13  ;;  %v2136_v61 = vadd.s32 464, %v4517_v39 }
 0x321   : > { %v1792_v2 = vpop.xlane.xlu0 %1791  ;;  %v1923_v1 = vmul.f32 0.6931472, %v2923_v5  ;;  %v2062_v0 = vsub.f32 %v1998_v12, %v5220_v29  ;;  %v2320_v18 = vsel %vm2256_vm1, %v2061_v8, 0.0 }
 0x322   : > { %2928 = vlog2.f32 %v1792_v2  ;;  %v5299_v53 = vpop.xlane.xlu1 %1020  ;;  %v2314_v2 = vsel %vm2250_vm11, %v2055_v21, 0.0  ;;  %vm2257_vm2 = vcmp.lt.s32.totalorder %v2193_v41, 1000  ;;  %v2135_v41 = vadd.s32 456, %v4517_v39 }
 0x323   : > { %v2377_v4 = vadd.f32 %v2376_v42, %v2314_v2  ;;  %v1999_v21 = vadd.f32 %v1923_v1, %v4638_v44  ;;  %v2321_v10 = vsel %vm2257_vm2, %v2062_v0, 0.0  ;;  %v5735_v2 = vld [vmem:[#allocation24_spill] sm:$0xff]  ;;  %v2201_v0 = vadd.s32 %v4546_v24, %v2136_v61 }
 0x324   : > { %v2925_v3 = vpop.eup %2924 }
 0x325   : > { %v1795_v17 = vpop.xlane.xlu0 %1794  ;;  %v1925_v57 = vmul.f32 0.6931472, %v2925_v3  ;;  %v2063_v6 = vsub.f32 %v1999_v21, %v5250_v25  ;;  %v2197_v25 = vadd.s32 %v4546_v24, %v2132_v16  ;;  %v2200_v21 = vadd.s32 %v4546_v24, %v2135_v41 }
 0x326   : > { %2930 = vlog2.f32 %v1795_v17  ;;  %v2315_v17 = vsel %vm2251_vm12, %v2056_v49, 0.0  ;;  %v5320_v14 = vpop.xlane.xlu1 %1023  ;;  %vm2265_vm10 = vcmp.lt.s32.totalorder %v2201_v0, 1000 }
 0x327   : > { %v2378_v46 = vadd.f32 %v2377_v4, %v2315_v17  ;;  %v2000_v37 = vadd.f32 %v1925_v57, %v4651_v56  ;;  %v2196_v56 = vadd.s32 %v4546_v24, %v2131_v34  ;;  %v2322_v42 = vsel %vm2258_vm3, %v2063_v6, 0.0 }
 0x328   : > { %v2927_v19 = vpop.eup %2926  ;;  %vm2261_vm6 = vcmp.lt.s32.totalorder %v2197_v25, 1000  ;;  %vm2264_vm9 = vcmp.lt.s32.totalorder %v2200_v21, 1000  ;;  %v2139_v6 = vadd.s32 488, %v4517_v39  ;;  %v5741_v25 = vld [vmem:[#allocation33_spill] sm:$0xff] }
 0x329   : > { %v1798_v26 = vpop.xlane.xlu0 %1797  ;;  %v2379_v52 = vadd.f32 %v2378_v46, %v2316_v43  ;;  %v1927_v20 = vmul.f32 0.6931472, %v2927_v19  ;;  %vm2260_vm5 = vcmp.lt.s32.totalorder %v2196_v56, 1000 }
 0x32a   : > { %2932 = vlog2.f32 %v1798_v26  ;;  %v2130_v26 = vadd.s32 416, %v4517_v39  ;;  %v1027_v49 = vpop.xlane.xlu1 %1026 }
 0x32b   : > { %v2380_v32 = vadd.f32 %v2379_v52, %v2317_v54  ;;  %v2001_v47 = vadd.f32 %v1927_v20, %v4672_v22  ;;  %v2134_v22 = vadd.s32 448, %v4517_v39  ;;  %v2137_v52 = vadd.s32 472, %v4517_v39 }
 0x32c   : > { %v2929_v33 = vpop.eup %2928  ;;  %v2195_v44 = vadd.s32 %v4546_v24, %v2130_v26 }
 0x32d   : > { %v1801_v50 = vpop.xlane.xlu0 %1800  ;;  %v1929_v40 = vmul.f32 0.6931472, %v2929_v33  ;;  %v2381_v9 = vadd.f32 %v2380_v32, %v2318_v23  ;;  %v2065_v36 = vsub.f32 %v2001_v47, %v5299_v53  ;;  %v2199_v1 = vadd.s32 %v4546_v24, %v2134_v22 }
 0x32e   : > { %vm2259_vm4 = vcmp.lt.s32.totalorder %v2195_v44, 1000  ;;  %v1030_v58 = vpop.xlane.xlu1 %1029  ;;  %v2202_v44 = vadd.s32 %v4546_v24, %v2137_v52 }
 0x32f   : > { %v2382_v29 = vadd.f32 %v2381_v9, %v2319_v35  ;;  %v2002_v11 = vadd.f32 %v1929_v40, %v5735_v2  ;;  %v2324_v19 = vsel %vm2260_vm5, %v2065_v36, 0.0  ;;  %vm2263_vm8 = vcmp.lt.s32.totalorder %v2199_v1, 1000  ;;  %v5739_v9 = vld [vmem:[#allocation31_spill] sm:$0xff] }
 0x330   : > { %v2931_v55 = vpop.eup %2930  ;;  %v2140_v2 = vadd.s32 496, %v4517_v39  ;;  %vm2266_vm11 = vcmp.lt.s32.totalorder %v2202_v44, 1000 }
 0x331   : > { %v1804_v28 = vpop.xlane.xlu0 %1803  ;;  %v1931_v7 = vmul.f32 0.6931472, %v2931_v55  ;;  %v2383_v13 = vadd.f32 %v2382_v29, %v2320_v18  ;;  %v2066_v4 = vsub.f32 %v2002_v11, %v5320_v14  ;;  %v5738_v55 = vld [vmem:[#allocation30_spill] sm:$0xff] }
 0x332   : > { %2934 = vlog2.f32 %v1804_v28 }
 0x333   : > { %2936 = vlog2.f32 %v1801_v50  ;;  %v2064_v50 = vsub.f32 %v2000_v37, %v5278_v62  ;;  %v2003_v17 = vadd.f32 %v1931_v7, %v5736_v30  ;;  %v2384_v48 = vadd.f32 %v2383_v13, %v2321_v10  ;;  %v5740_v7 = vld [vmem:[#allocation32_spill] sm:$0xff] }
 0x334   : > { %v2933_v63 = vpop.eup %2932  ;;  %v2198_v62 = vadd.s32 %v4546_v24, %v2133_v51  ;;  %v2325_v14 = vsel %vm2261_vm6, %v2066_v4, 0.0  ;;  %v2138_v37 = vadd.s32 480, %v4517_v39  ;;  %v2204_v30 = vadd.s32 %v4546_v24, %v2139_v6 }
 0x335   : > { %v1807_v60 = vpop.xlane.xlu0 %1806  ;;  %v1933_v27 = vmul.f32 0.6931472, %v2933_v63  ;;  %v2323_v3 = vsel %vm2259_vm4, %v2064_v50, 0.0  ;;  %v2385_v59 = vadd.f32 %v2384_v48, %v2322_v42  ;;  %v2067_v46 = vsub.f32 %v2003_v17, %v1027_v49 }
 0x336   : > { %vm2262_vm7 = vcmp.lt.s32.totalorder %v2198_v62, 1000  ;;  %v2203_v50 = vadd.s32 %v4546_v24, %v2138_v37  ;;  %v2141_v17 = vadd.s32 504, %v4517_v39  ;;  %vm2268_vm13 = vcmp.lt.s32.totalorder %v2204_v30, 1000 }
 0x337   : > { %v2004_v28 = vadd.f32 %v1933_v27, %v5737_v31  ;;  %v2386_v54 = vadd.f32 %v2385_v59, %v2323_v3  ;;  %v2326_v20 = vsel %vm2262_vm7, %v2067_v46, 0.0  ;;  %v2205_v31 = vadd.s32 %v4546_v24, %v2140_v2  ;;  %v5743_v59 = vld [vmem:[#allocation34_spill] sm:$0xff] }
 0x338   : > { %vm2267_vm12 = vcmp.lt.s32.totalorder %v2203_v50, 1000  ;;  %v2206_v39 = vadd.s32 %v4546_v24, %v2141_v17 }
 0x339   : > { %v1810_v15 = vpop.xlane.xlu0 %1809  ;;  %v2068_v33 = vsub.f32 %v2004_v28, %v1030_v58  ;;  %v2387_v26 = vadd.f32 %v2386_v54, %v2324_v19  ;;  %v5742_v58 = vld [vmem:[#allocation35_spill] sm:$0xff]  ;;  %vm2269_vm14 = vcmp.lt.s32.totalorder %v2205_v31, 1000 }
 0x33a   : > { %2938 = vlog2.f32 %v1810_v15  ;;  %vm2270_vm15 = vcmp.lt.s32.totalorder %v2206_v39, 1000 }
 0x33b   : > { %2940 = vlog2.f32 %v1807_v60  ;;  %v1036_v60 = vpop.xlane.xlu1 %1035  ;;  %v2388_v35 = vadd.f32 %v2387_v26, %v2325_v14  ;;  %v2327_v40 = vsel %vm2263_vm8, %v2068_v33, 0.0  ;;  %v5744_v14 = vld [vmem:[#allocation37_spill] sm:$0xff] }
 0x33c   : > { %v2935_v38 = vpop.eup %2934 }
 0x33d   : > { %v1813_v5 = vpop.xlane.xlu0 %1812  ;;  %v2937_v43 = vpop.eup %2936  ;;  %v1937_v45 = vmul.f32 0.6931472, %v2935_v38  ;;  %v2389_v49 = vadd.f32 %v2388_v35, %v2326_v20 }
 0x33e   : > { %2942 = vlog2.f32 %v1813_v5  ;;  %v1935_v57 = vmul.f32 0.6931472, %v2937_v43 }
 0x33f   : > { %v2006_v32 = vadd.f32 %v1937_v45, %v5738_v55  ;;  %v2390_v51 = vadd.f32 %v2389_v49, %v2327_v40  ;;  %v1042_v10 = vpop.xlane.xlu1 %1041 }
 0x340   : > { %v2005_v18 = vadd.f32 %v1935_v57, %v5739_v9 }
 0x341   : > { %v1816_v53 = vpop.xlane.xlu0 %1815  ;;  %v2070_v47 = vsub.f32 %v2006_v32, %v1036_v60 }
 0x342   : > { %2944 = vlog2.f32 %v1816_v53 }
 0x343   : > { %v2329_v38 = vsel %vm2265_vm10, %v2070_v47, 0.0  ;;  %v1048_v53 = vpop.xlane.xlu1 %1047 }
 0x344   : > { %v2939_v12 = vpop.eup %2938 }
 0x345   : > { %v2941_v8 = vpop.eup %2940  ;;  %v1819_v23 = vpop.xlane.xlu0 %1818  ;;  %v1941_v34 = vmul.f32 0.6931472, %v2939_v12 }
 0x346   : > { %2946 = vlog2.f32 %v1819_v23  ;;  %v1939_v63 = vmul.f32 0.6931472, %v2941_v8 }
 0x347   : > { %v2008_v29 = vadd.f32 %v1941_v34, %v5740_v7 }
 0x348   : > { %v2943_v16 = vpop.eup %2942  ;;  %v2007_v22 = vadd.f32 %v1939_v63, %v5741_v25 }
 0x349   : > { %v1033_v15 = vpop.xlane.xlu0 %1032  ;;  %v1943_v27 = vmul.f32 0.6931472, %v2943_v16  ;;  %v2072_v48 = vsub.f32 %v2008_v29, %v1042_v10 }
 0x34a   : > { %v2069_v56 = vsub.f32 %v2005_v18, %v1033_v15 }
 0x34b   : > { %v2009_v1 = vadd.f32 %v1943_v27, %v5743_v59  ;;  %v2331_v54 = vsel %vm2267_vm12, %v2072_v48, 0.0 }
 0x34c   : > { %v2945_v11 = vpop.eup %2944  ;;  %v2328_v13 = vsel %vm2264_vm9, %v2069_v56, 0.0 }
 0x34d   : > { %v1945_v5 = vmul.f32 0.6931472, %v2945_v11  ;;  %v2391_v42 = vadd.f32 %v2390_v51, %v2328_v13  ;;  %v1039_v36 = vpop.xlane.xlu0 %1038 }
 0x34e   : > { %v2071_v62 = vsub.f32 %v2007_v22, %v1039_v36 }
 0x34f   : > { %v2010_v3 = vadd.f32 %v1945_v5, %v5742_v58  ;;  %v2392_v4 = vadd.f32 %v2391_v42, %v2329_v38 }
 0x350   : > { %v2947_v28 = vpop.eup %2946  ;;  %v2330_v43 = vsel %vm2266_vm11, %v2071_v62, 0.0 }
 0x351   : > { %v1947_v41 = vmul.f32 0.6931472, %v2947_v28  ;;  %v2393_v19 = vadd.f32 %v2392_v4, %v2330_v43  ;;  %v1045_v46 = vpop.xlane.xlu0 %1044  ;;  %v2074_v45 = vsub.f32 %v2010_v3, %v1048_v53 }
 0x352   : > { %v2073_v61 = vsub.f32 %v2009_v1, %v1045_v46 }
 0x353   : > { %v2394_v12 = vadd.f32 %v2393_v19, %v2331_v54  ;;  %v2011_v57 = vadd.f32 %v1947_v41, %v5744_v14  ;;  %v2333_v26 = vsel %vm2269_vm14, %v2074_v45, 0.0 }
 0x354   : > { %v2332_v33 = vsel %vm2268_vm13, %v2073_v61, 0.0 }
 0x355   : > { %v2395_v52 = vadd.f32 %v2394_v12, %v2332_v33  ;;  %v1051_v8 = vpop.xlane.xlu0 %1050 }
 0x356   : > { %v2075_v60 = vsub.f32 %v2011_v57, %v1051_v8 }
 0x357   : > { %v2396_v23 = vadd.f32 %v2395_v52, %v2333_v26 }
 0x358   : > { %v2334_v21 = vsel %vm2270_vm15, %v2075_v60, 0.0 }
 0x359   : > { %v2397_v20 = vadd.f32 %v2396_v23, %v2334_v21 }
 0x35b   : > { %v2398_v24 = vrot.slane %v2397_v20, 4 }
 0x35d   : > { %v2399_v55 = vadd.f32 %v2398_v24, %v2397_v20 }
 0x35f   : > { %v2400_v32 = vrot.slane %v2399_v55, 2 }
 0x361   : > { %v2401_v34 = vadd.f32 %v2400_v32, %v2399_v55 }
 0x363   : > { %v2402_v35 = vrot.slane %v2401_v34, 1 }
 0x365   : > { %v2403_v0 = vadd.f32 %v2402_v35, %v2401_v34 }
 0x367   : > { %2404 = vst [vmem:[%s196_s17] sm:$0x1] %v2403_v0 }
 0x368   : > { %3090 = shalt.err (!%p3087_p3)
}
 0x369   : > { %s3091_s3 = scalar_lea.hbm %s5378_s25, 16  ;;  %s3095_s26 = scalar_lea.hbm %s5424_s2, 32 }
 0x36a   : > { %p3092_p4 = scmp.ne.s32.totalorder %s5378_s25, %s3091_s3  ;;  %p3096_p7 = scmp.lt.u32.totalorder %s5378_s25, %s5424_s2 }
 0x36b   : > { %p3097_p8 = scmp.lt.u32.totalorder %s3095_s26, %s3091_s3  ;;  %p3099_p6 = scmp.lt.u32.totalorder %s3091_s3, %s5378_s25 }
 0x36c   : > { %p3093_p5 = pnand %p3092_p4, %p3209_p9 }
 0x36d   : > { %p3098_p10 = por %p3097_p8, %p3096_p7 }
 0x36e   : > { %p3094_p2 = pneg %p3093_p5 }
 0x36f   : > { %p3100_p11 = por %p3099_p6, %p3098_p10 }
 0x371   : > { %p3101_p13 = pnand %p3100_p11, %p3094_p2 }
 0x373   : > { %3104 = shalt.err (!%p3101_p13)
}
 0x374   : > { %2520 = dma.vmem_to_hbm [thread:$0]  (%p3209_p9), %s5380_s22, 16, %s5378_s25, %s2406_s27  }
 0x375 PF: > { %s2430_s6 = sand.u32 1, %s3131_s9   ;;  %p5745_p12 = scmp.ne.s32.totalorder %s5515_s21, 0 }
 0x376   : > { %p5746_p0 = scmp.ge.s32.totalorder %s3143_s12, 2  ;;  %s2431_s14 = scalar_lea.sflag [#allocation4], %s2430_s6 }
 0x378   : > { %p2523_p1 = pnand %p5746_p0, %p5745_p12 }
 0x37a   : > { %3126 = dma.done.wait (!%p2523_p1), %s2431_s14, 16  }
 0x37b   : > { %3128 = vsyncadd (!%p2523_p1), %s2431_s14, 4294967280  ;;  %p15_p3 = scmp.ge.s32.totalorder %s3190_s15, 4   ;;  %s5747_s9 = smov %s3135_s10 }
 0x37c   : > { %s5748_s10 = smov %s3139_s11  ;;  %s5749_s11 = smov %s3202_s18 }
 0x37d   : > { %s5750_s12 = smov %s3190_s15  ;;  %17 = sbr.rel (!%p15_p3) target bundleno = 5 (0x5), region = 76 }
 0x384   :  { %2435 = vsyncpa [#allocation3], 1 }
 0x385   :  { %2437 = vsyncpa [#allocation3 + $0x1], 1 }
 0x386   :  { %2438 = vsyncpa [#allocation4], 1 }
 0x387   :  { %2440 = vsyncpa [#allocation4 + $0x1], 1 }

</bundles_post_ra>
